<compile_context>
chip_gen: v5e
topology: v5e:2x2
jax: 0.10.0
libtpu: 0.0.40
codegen_flags: <defaults>
</compile_context>

<pallas_src>
import math
from functools import partial

import numpy as np
import jax
import jax.numpy as jnp
from jax import lax
from jax.experimental import pallas as pl
from jax.experimental.pallas import tpu as pltpu

EPS_LN = 1e-5
EPS_BN = 1e-5
BF16 = jnp.bfloat16
F32 = jnp.float32


# ----------------------------- in-kernel helpers -----------------------------

def _layernorm(x, g, b):
    mu = jnp.mean(x, axis=-1, keepdims=True)
    var = jnp.mean((x - mu) ** 2, axis=-1, keepdims=True)
    return (x - mu) * jax.lax.rsqrt(var + EPS_LN) * g + b


def _gelu_exact(x):
    # PyTorch nn.GELU() default (erf form)
    return 0.5 * x * (1.0 + jax.lax.erf(x * np.float32(1.0 / math.sqrt(2.0))))


# ----------------------------- fused kernel ----------------------------------

def _conformer_kernel(
        x_ref,
        # ffn1
        f1_g, f1_b, f1_w1, f1_b1, f1_w2, f1_b2,
        # self-attention (stacked QKV + per-head output projection)
        a_g, a_b, w_qkv, b_qkv, wo_r, bo_r,
        # convolution module
        c_g, c_b, wpa_r, wpg_r, wdw_r, bn_g, bn_b, bn_m, bn_v, wpc2_r,
        # ffn2
        f2_g, f2_b, f2_w1, f2_b1, f2_w2, f2_b2,
        # final layer norm
        fl_g, fl_b,
        o_ref,
        qkv_sc, attn_sc,
        *, n_head, ksize, approx_gelu):
    x = x_ref[...].astype(F32)                                    # (T, D)
    T, D = x.shape
    dk = D // n_head
    scale = np.float32(1.0 / math.sqrt(dk))

    if approx_gelu:
        # tanh approximation -> EUP (free VLIW slot); small deviation from
        # PyTorch's default erf GELU, gated behind a flag.
        gelu = lambda v: jax.nn.gelu(v, approximate=True)
    else:
        gelu = _gelu_exact

    def ffn(xin, g, b, w1, b1, w2, b2):
        xn = _layernorm(xin, g[...], b[...])
        h = jnp.dot(xn.astype(BF16), w1[...], preferred_element_type=F32) + b1[...]
        h = gelu(h)
        return jnp.dot(h.astype(BF16), w2[...], preferred_element_type=F32) + b2[...]

    # ---- FFN1, half residual -------------------------------------------------
    x = 0.5 * ffn(x, f1_g, f1_b, f1_w1, f1_b1, f1_w2, f1_b2) + x

    # ---- Multi-head self-attention (absolute), residual ----------------------
    xn = _layernorm(x, a_g[...], a_b[...])
    # Single lane-dense (T,D)@(D,3D) projection, f32 accumulation + bias.
    qkv = jnp.dot(xn.astype(BF16), w_qkv[...],
                  preferred_element_type=F32) + b_qkv[...]         # (T, 3D)
    # Scatter per-head (T, dk) slabs into a VMEM scratch so the head loop can
    # index the leading axis dynamically (no lane slicing inside the loop).
    for i in range(3 * n_head):
        qkv_sc[i] = qkv[:, i * dk:(i + 1) * dk]

    attn_sc[...] = jnp.zeros_like(attn_sc)

    def head_body(h, carry):
        q_h = (qkv_sc[h] * scale).astype(BF16)                     # (T, dk)
        k_h = qkv_sc[n_head + h].astype(BF16)                      # (T, dk)
        v_h = qkv_sc[2 * n_head + h].astype(BF16)                  # (T, dk)
        # scores: contract last dims directly (no explicit K^T transpose).
        s = lax.dot_general(q_h, k_h, (((1,), (1,)), ((), ())),
                            preferred_element_type=F32)            # (T, T)
        s = s - jnp.max(s, axis=-1, keepdims=True)
        e = jnp.exp(s)
        p_attn = e * pl.reciprocal(jnp.sum(e, axis=-1, keepdims=True), approx=True)
        ctx = jnp.dot(p_attn.astype(BF16), v_h,
                      preferred_element_type=F32)                  # (T, dk)
        # Per-head accumulation of the output projection (N = D lane-dense).
        attn_sc[...] += jnp.dot(ctx.astype(BF16), wo_r[h],
                                preferred_element_type=F32)        # (T, D)
        return carry

    lax.fori_loop(0, n_head, head_body, 0)
    x = attn_sc[...] + bo_r[...] + x

    # ---- Convolution module, residual ----------------------------------------
    # LN -> pw-conv1 (two lane-dense matmuls) -> GLU -> depthwise conv
    # (XLU rolls + edge masks) -> BN(eval) -> SiLU -> pw-conv2
    xn = _layernorm(x, c_g[...], c_b[...])
    xnb = xn.astype(BF16)
    a_half = jnp.dot(xnb, wpa_r[...], preferred_element_type=F32)   # (T, C)
    g_half = jnp.dot(xnb, wpg_r[...], preferred_element_type=F32)   # (T, C)
    g = a_half * jax.nn.sigmoid(g_half)                             # GLU

    pad = (ksize - 1) // 2                      # ksize is odd (asserted in wrapper)
    wdw = wdw_r[...].astype(F32)                                    # (K, C)
    acc = g * wdw[pad:pad + 1, :]                                   # center tap
    if ksize > 1:
        row = lax.broadcasted_iota(jnp.int32, (T, 1), 0)
        for j in range(ksize):
            off = j - pad
            if off == 0 or abs(off) >= T:
                continue                        # center handled / tap fully out of range
            # shifted[t] = g[(t + off) mod T]; wrapped rows are masked to zero.
            shifted = pltpu.roll(g, shift=(-off) % T, axis=0)
            valid = ((row + off >= 0) & (row + off < T)).astype(F32)  # (T, 1)
            acc = acc + shifted * valid * wdw[j:j + 1, :]

    yb = (acc - bn_m[...]) * jax.lax.rsqrt(bn_v[...] + EPS_BN) * bn_g[...] + bn_b[...]
    ys = yb * jax.nn.sigmoid(yb)                                    # SiLU
    x = x + jnp.dot(ys.astype(BF16), wpc2_r[...], preferred_element_type=F32)

    # ---- FFN2, half residual + final layer norm -------------------------------
    x = 0.5 * ffn(x, f2_g, f2_b, f2_w1, f2_b1, f2_w2, f2_b2) + x
    o_ref[...] = _layernorm(x, fl_g[...], fl_b[...])


# ----------------------------- wrapper ----------------------------------------

def conformer_encoder_layer(x, p, *, n_head, ksize, approx_gelu=False,
                            single_buffer_weights=True):
    """Fused Conformer encoder layer.  x: (B, T, D) f32, p: parameter dict."""
    B, T, D = x.shape
    assert D % n_head == 0
    assert ksize % 2 == 1, "depthwise kernel_size must be odd for 'SAME' padding"
    dk = D // n_head
    FF = p["ffn1_w1"].shape[1]

    # Stack Q/K/V weights into one lane-dense (D, 3D) bf16 matrix (head-major
    # column blocks of width dk within each of the q/k/v thirds).
    w_qkv = jnp.concatenate([p["wq"], p["wk"], p["wv"]], axis=1).astype(BF16)
    b_qkv = jnp.concatenate([p["bq"], p["bk"], p["bv"]], axis=1)
    # Output projection split by head rows: wo_h[h] = wo[h*dk:(h+1)*dk, :].
    wo_h = p["wo"].reshape(n_head, dk, D).astype(BF16)

    params = (
        # ffn1
        p["ffn1_ln_g"], p["ffn1_ln_b"],
        p["ffn1_w1"].astype(BF16), p["ffn1_b1"],
        p["ffn1_w2"].astype(BF16), p["ffn1_b2"],
        # attention
        p["attn_ln_g"], p["attn_ln_b"],
        w_qkv, b_qkv, wo_h, p["bo"],
        # convolution module (GLU weight split into a/gate halves)
        p["conv_ln_g"], p["conv_ln_b"],
        p["wpc1"][:, :D].astype(BF16), p["wpc1"][:, D:].astype(BF16),
        p["wdw"], p["bn_g"], p["bn_b"], p["bn_m"], p["bn_v"],
        p["wpc2"].astype(BF16),
        # ffn2
        p["ffn2_ln_g"], p["ffn2_ln_b"],
        p["ffn2_w1"].astype(BF16), p["ffn2_b1"],
        p["ffn2_w2"].astype(BF16), p["ffn2_b2"],
        # final layer norm
        p["final_ln_g"], p["final_ln_b"],
    )

    def const_spec(a):
        nd = a.ndim
        if single_buffer_weights:
            # Constant block across the grid -> single buffer (VMEM headroom).
            return pl.BlockSpec(a.shape, lambda b, _nd=nd: (0,) * _nd,
                                pipeline_mode=pl.Buffered(1))
        return pl.BlockSpec(a.shape, lambda b, _nd=nd: (0,) * _nd)

    x_spec = pl.BlockSpec((None, T, D), lambda b: (b, 0, 0))

    # Advisory cost estimate for the XLA scheduler.
    flops = B * (
        8 * T * D * FF                # ffn1 + ffn2 (2 matmuls each)
        + 2 * T * D * (3 * D)         # QKV projection
        + 4 * T * T * D               # scores + context over all heads
        + 2 * T * D * D               # attention output projection
        + 2 * T * D * (2 * D)         # pointwise conv1
        + 2 * T * D * ksize           # depthwise conv
        + 2 * T * D * D               # pointwise conv2
    )
    transcendentals = B * (n_head * T * T + 2 * T * FF + 3 * T * D)
    bytes_accessed = (2 * x.size * x.dtype.itemsize
                      + sum(int(a.size) * a.dtype.itemsize for a in params))

    return pl.pallas_call(
        partial(_conformer_kernel, n_head=n_head, ksize=ksize,
                approx_gelu=approx_gelu),
        out_shape=jax.ShapeDtypeStruct((B, T, D), jnp.float32),
        grid=(B,),
        in_specs=[x_spec] + [const_spec(a) for a in params],
        out_specs=x_spec,
        scratch_shapes=[
            pltpu.VMEM((3 * n_head, T, dk), F32),   # per-head q/k/v slabs
            pltpu.VMEM((T, D), F32),                # attention output accumulator
        ],
        compiler_params=pltpu.CompilerParams(
            dimension_semantics=("parallel",),
            vmem_limit_bytes=56 * 1024 * 1024),
        cost_estimate=pl.CostEstimate(
            flops=int(flops),
            transcendentals=int(transcendentals),
            bytes_accessed=int(bytes_accessed)),
    )(x, *params)


# ----------------------------- pure-JAX reference -----------------------------

def _reference(x, p, *, n_head, ksize):
    B, T, D = x.shape
    dk = D // n_head

    def ffn(x, g, b, w1, b1, w2, b2):
        xn = _layernorm(x, g, b)
        h = _gelu_exact(xn @ w1 + b1)
        return h @ w2 + b2

    x = 0.5 * ffn(x, p["ffn1_ln_g"], p["ffn1_ln_b"], p["ffn1_w1"], p["ffn1_b1"],
                  p["ffn1_w2"], p["ffn1_b2"]) + x

    xn = _layernorm(x, p["attn_ln_g"], p["attn_ln_b"])
    q = (xn @ p["wq"] + p["bq"]).reshape(B, T, n_head, dk).transpose(0, 2, 1, 3)
    k = (xn @ p["wk"] + p["bk"]).reshape(B, T, n_head, dk).transpose(0, 2, 1, 3)
    v = (xn @ p["wv"] + p["bv"]).reshape(B, T, n_head, dk).transpose(0, 2, 1, 3)
    s = jnp.einsum("bhqd,bhkd->bhqk", q, k) / math.sqrt(dk)
    attn = jax.nn.softmax(s, axis=-1)
    ctx = jnp.einsum("bhqk,bhkd->bhqd", attn, v).transpose(0, 2, 1, 3).reshape(B, T, D)
    x = ctx @ p["wo"] + p["bo"] + x

    xn = _layernorm(x, p["conv_ln_g"], p["conv_ln_b"])
    h = xn @ p["wpc1"]
    C = D
    g = h[..., :C] * jax.nn.sigmoid(h[..., C:])
    pad = (ksize - 1) // 2
    gp = jnp.pad(g, ((0, 0), (pad, pad), (0, 0)))
    acc = sum(gp[:, j:j + T, :] * p["wdw"][j] for j in range(ksize))
    yb = (acc - p["bn_m"]) * jax.lax.rsqrt(p["bn_v"] + EPS_BN) * p["bn_g"] + p["bn_b"]
    ys = yb * jax.nn.sigmoid(yb)
    x = x + ys @ p["wpc2"]

    x = 0.5 * ffn(x, p["ffn2_ln_g"], p["ffn2_ln_b"], p["ffn2_w1"], p["ffn2_b1"],
                  p["ffn2_w2"], p["ffn2_b2"]) + x
    return _layernorm(x, p["final_ln_g"], p["final_ln_b"])


# ----------------------------- main -------------------------------------------

if __name__ == "__main__":
    B, T, D, H, FF, K = 2, 8, 32, 4, 64, 3   # batch, time, embed, heads, ffn, dw-kernel

    key = jax.random.PRNGKey(0)
    keys = iter(jax.random.split(key, 64))

    def w(shape, scale=0.1):
        return jax.random.normal(next(keys), shape, jnp.float32) * scale

    p = {
        # ffn1
        "ffn1_ln_g": 1.0 + w((1, D), 0.05), "ffn1_ln_b": w((1, D), 0.05),
        "ffn1_w1": w((D, FF)), "ffn1_b1": w((1, FF)),
        "ffn1_w2": w((FF, D)), "ffn1_b2": w((1, D)),
        # self-attention (weights stored as (in, out))
        "attn_ln_g": 1.0 + w((1, D), 0.05), "attn_ln_b": w((1, D), 0.05),
        "wq": w((D, D)), "bq": w((1, D)),
        "wk": w((D, D)), "bk": w((1, D)),
        "wv": w((D, D)), "bv": w((1, D)),
        "wo": w((D, D)), "bo": w((1, D)),
        # convolution module (channels == D, conv biases disabled as in module)
        "conv_ln_g": 1.0 + w((1, D), 0.05), "conv_ln_b": w((1, D), 0.05),
        "wpc1": w((D, 2 * D)),                 # pointwise_conv1: (in, 2*channels)
        "wdw": w((K, D)),                      # depthwise kernel per channel
        "bn_g": 1.0 + w((1, D), 0.05), "bn_b": w((1, D), 0.05),
        "bn_m": w((1, D), 0.05), "bn_v": 1.0 + jnp.abs(w((1, D), 0.05)),
        "wpc2": w((D, D)),                     # pointwise_conv2: (channels, out)
        # ffn2
        "ffn2_ln_g": 1.0 + w((1, D), 0.05), "ffn2_ln_b": w((1, D), 0.05),
        "ffn2_w1": w((D, FF)), "ffn2_b1": w((1, FF)),
        "ffn2_w2": w((FF, D)), "ffn2_b2": w((1, D)),
        # final layer norm
        "final_ln_g": 1.0 + w((1, D), 0.05), "final_ln_b": w((1, D), 0.05),
    }

    x = jax.random.normal(next(keys), (B, T, D), jnp.float32)

    run = jax.jit(partial(conformer_encoder_layer, n_head=H, ksize=K))
    try:
        y = jax.block_until_ready(run(x, p))
    except Exception:
        # Fallback: if single-buffered constant weights (pl.Buffered(1)) are not
        # supported by this jax/libtpu build, retry with default double buffering.
        run = jax.jit(partial(conformer_encoder_layer, n_head=H, ksize=K,
                              single_buffer_weights=False))
        y = jax.block_until_ready(run(x, p))

    # Reference in full f32 precision; the kernel uses bf16 MXU operands with
    # f32 accumulation and an approximate softmax reciprocal, so allow a
    # correspondingly looser tolerance.
    with jax.default_matmul_precision("highest"):
        y_ref = jax.block_until_ready(_reference(x, p, n_head=H, ksize=K))
    np.testing.assert_allclose(np.asarray(y), np.asarray(y_ref),
                               rtol=3e-2, atol=3e-2)

    print("KERNEL_OK")
</pallas_src>

<mosaic_0001>
module attributes {stable_mosaic.version = 11 : i64} {
  func.func @_conformer_kernel(%arg0: i32, %arg1: memref<1x8x32xf32, #tpu.memory_space<vmem>>, %arg2: memref<1x32xf32, #tpu.memory_space<vmem>>, %arg3: memref<1x32xf32, #tpu.memory_space<vmem>>, %arg4: memref<32x64xbf16, #tpu.memory_space<vmem>>, %arg5: memref<1x64xf32, #tpu.memory_space<vmem>>, %arg6: memref<64x32xbf16, #tpu.memory_space<vmem>>, %arg7: memref<1x32xf32, #tpu.memory_space<vmem>>, %arg8: memref<1x32xf32, #tpu.memory_space<vmem>>, %arg9: memref<1x32xf32, #tpu.memory_space<vmem>>, %arg10: memref<32x96xbf16, #tpu.memory_space<vmem>>, %arg11: memref<1x96xf32, #tpu.memory_space<vmem>>, %arg12: memref<4x8x32xbf16, #tpu.memory_space<vmem>>, %arg13: memref<1x32xf32, #tpu.memory_space<vmem>>, %arg14: memref<1x32xf32, #tpu.memory_space<vmem>>, %arg15: memref<1x32xf32, #tpu.memory_space<vmem>>, %arg16: memref<32x32xbf16, #tpu.memory_space<vmem>>, %arg17: memref<32x32xbf16, #tpu.memory_space<vmem>>, %arg18: memref<3x32xf32, #tpu.memory_space<vmem>>, %arg19: memref<1x32xf32, #tpu.memory_space<vmem>>, %arg20: memref<1x32xf32, #tpu.memory_space<vmem>>, %arg21: memref<1x32xf32, #tpu.memory_space<vmem>>, %arg22: memref<1x32xf32, #tpu.memory_space<vmem>>, %arg23: memref<32x32xbf16, #tpu.memory_space<vmem>>, %arg24: memref<1x32xf32, #tpu.memory_space<vmem>>, %arg25: memref<1x32xf32, #tpu.memory_space<vmem>>, %arg26: memref<32x64xbf16, #tpu.memory_space<vmem>>, %arg27: memref<1x64xf32, #tpu.memory_space<vmem>>, %arg28: memref<64x32xbf16, #tpu.memory_space<vmem>>, %arg29: memref<1x32xf32, #tpu.memory_space<vmem>>, %arg30: memref<1x32xf32, #tpu.memory_space<vmem>>, %arg31: memref<1x32xf32, #tpu.memory_space<vmem>>, %arg32: memref<1x8x32xf32, #tpu.memory_space<vmem>>, %arg33: memref<12x8x8xf32, #tpu.memory_space<vmem>>, %arg34: memref<8x32xf32, #tpu.memory_space<vmem>>) attributes {dimension_semantics = [#tpu.dimension_semantics<parallel>], iteration_bounds = array<i64: 2>, scalar_prefetch = 0 : i64, scratch_operands = 2 : i64, tpu.core_type = #tpu.core_type<tc>, window_params = [{transform_indices = @transform_0, window_bounds = array<i64: 1, 8, 32>}, {pipeline_mode = #tpu.pipeline_mode<synchronous>, transform_indices = @transform_1, window_bounds = array<i64: 1, 32>}, {pipeline_mode = #tpu.pipeline_mode<synchronous>, transform_indices = @transform_2, window_bounds = array<i64: 1, 32>}, {pipeline_mode = #tpu.pipeline_mode<synchronous>, transform_indices = @transform_3, window_bounds = array<i64: 32, 64>}, {pipeline_mode = #tpu.pipeline_mode<synchronous>, transform_indices = @transform_4, window_bounds = array<i64: 1, 64>}, {pipeline_mode = #tpu.pipeline_mode<synchronous>, transform_indices = @transform_5, window_bounds = array<i64: 64, 32>}, {pipeline_mode = #tpu.pipeline_mode<synchronous>, transform_indices = @transform_6, window_bounds = array<i64: 1, 32>}, {pipeline_mode = #tpu.pipeline_mode<synchronous>, transform_indices = @transform_7, window_bounds = array<i64: 1, 32>}, {pipeline_mode = #tpu.pipeline_mode<synchronous>, transform_indices = @transform_8, window_bounds = array<i64: 1, 32>}, {pipeline_mode = #tpu.pipeline_mode<synchronous>, transform_indices = @transform_9, window_bounds = array<i64: 32, 96>}, {pipeline_mode = #tpu.pipeline_mode<synchronous>, transform_indices = @transform_10, window_bounds = array<i64: 1, 96>}, {pipeline_mode = #tpu.pipeline_mode<synchronous>, transform_indices = @transform_11, window_bounds = array<i64: 4, 8, 32>}, {pipeline_mode = #tpu.pipeline_mode<synchronous>, transform_indices = @transform_12, window_bounds = array<i64: 1, 32>}, {pipeline_mode = #tpu.pipeline_mode<synchronous>, transform_indices = @transform_13, window_bounds = array<i64: 1, 32>}, {pipeline_mode = #tpu.pipeline_mode<synchronous>, transform_indices = @transform_14, window_bounds = array<i64: 1, 32>}, {pipeline_mode = #tpu.pipeline_mode<synchronous>, transform_indices = @transform_15, window_bounds = array<i64: 32, 32>}, {pipeline_mode = #tpu.pipeline_mode<synchronous>, transform_indices = @transform_16, window_bounds = array<i64: 32, 32>}, {pipeline_mode = #tpu.pipeline_mode<synchronous>, transform_indices = @transform_17, window_bounds = array<i64: 3, 32>}, {pipeline_mode = #tpu.pipeline_mode<synchronous>, transform_indices = @transform_18, window_bounds = array<i64: 1, 32>}, {pipeline_mode = #tpu.pipeline_mode<synchronous>, transform_indices = @transform_19, window_bounds = array<i64: 1, 32>}, {pipeline_mode = #tpu.pipeline_mode<synchronous>, transform_indices = @transform_20, window_bounds = array<i64: 1, 32>}, {pipeline_mode = #tpu.pipeline_mode<synchronous>, transform_indices = @transform_21, window_bounds = array<i64: 1, 32>}, {pipeline_mode = #tpu.pipeline_mode<synchronous>, transform_indices = @transform_22, window_bounds = array<i64: 32, 32>}, {pipeline_mode = #tpu.pipeline_mode<synchronous>, transform_indices = @transform_23, window_bounds = array<i64: 1, 32>}, {pipeline_mode = #tpu.pipeline_mode<synchronous>, transform_indices = @transform_24, window_bounds = array<i64: 1, 32>}, {pipeline_mode = #tpu.pipeline_mode<synchronous>, transform_indices = @transform_25, window_bounds = array<i64: 32, 64>}, {pipeline_mode = #tpu.pipeline_mode<synchronous>, transform_indices = @transform_26, window_bounds = array<i64: 1, 64>}, {pipeline_mode = #tpu.pipeline_mode<synchronous>, transform_indices = @transform_27, window_bounds = array<i64: 64, 32>}, {pipeline_mode = #tpu.pipeline_mode<synchronous>, transform_indices = @transform_28, window_bounds = array<i64: 1, 32>}, {pipeline_mode = #tpu.pipeline_mode<synchronous>, transform_indices = @transform_29, window_bounds = array<i64: 1, 32>}, {pipeline_mode = #tpu.pipeline_mode<synchronous>, transform_indices = @transform_30, window_bounds = array<i64: 1, 32>}, {transform_indices = @transform_31, window_bounds = array<i64: 1, 8, 32>}]} {
    %c0 = arith.constant 0 : index
    %c0_0 = arith.constant 0 : index
    %c0_1 = arith.constant 0 : index
    %0 = vector.load %arg1[%c0, %c0_0, %c0_1] : memref<1x8x32xf32, #tpu.memory_space<vmem>>, vector<1x8x32xf32>
    %1 = vector.shape_cast %0 : vector<1x8x32xf32> to vector<8x32xf32>
    %c0_2 = arith.constant 0 : index
    %c0_3 = arith.constant 0 : index
    %2 = vector.load %arg2[%c0_2, %c0_3] : memref<1x32xf32, #tpu.memory_space<vmem>>, vector<1x32xf32>
    %c0_4 = arith.constant 0 : index
    %c0_5 = arith.constant 0 : index
    %3 = vector.load %arg3[%c0_4, %c0_5] : memref<1x32xf32, #tpu.memory_space<vmem>>, vector<1x32xf32>
    %cst = arith.constant dense<0.000000e+00> : vector<8xf32>
    %4 = vector.multi_reduction <add>, %1, %cst [1] : vector<8x32xf32> to vector<8xf32>
    %5 = vector.shape_cast %4 : vector<8xf32> to vector<8x1xf32>
    %cst_6 = arith.constant 3.200000e+01 : f32
    %6 = vector.broadcast %cst_6 : f32 to vector<8x1xf32>
    %7 = arith.divf %5, %6 : vector<8x1xf32>
    %8 = vector.broadcast %7 : vector<8x1xf32> to vector<8x32xf32>
    %9 = arith.subf %1, %8 : vector<8x32xf32>
    %10 = arith.mulf %9, %9 : vector<8x32xf32>
    %cst_7 = arith.constant dense<0.000000e+00> : vector<8xf32>
    %11 = vector.multi_reduction <add>, %10, %cst_7 [1] : vector<8x32xf32> to vector<8xf32>
    %12 = vector.shape_cast %11 : vector<8xf32> to vector<8x1xf32>
    %cst_8 = arith.constant 3.200000e+01 : f32
    %13 = vector.broadcast %cst_8 : f32 to vector<8x1xf32>
    %14 = arith.divf %12, %13 : vector<8x1xf32>
    %15 = vector.broadcast %7 : vector<8x1xf32> to vector<8x32xf32>
    %16 = arith.subf %1, %15 : vector<8x32xf32>
    %cst_9 = arith.constant 9.99999974E-6 : f32
    %17 = vector.broadcast %cst_9 : f32 to vector<8x1xf32>
    %18 = arith.addf %14, %17 : vector<8x1xf32>
    %19 = math.rsqrt %18 : vector<8x1xf32>
    %20 = vector.broadcast %19 : vector<8x1xf32> to vector<8x32xf32>
    %21 = arith.mulf %16, %20 : vector<8x32xf32>
    %22 = vector.broadcast %2 : vector<1x32xf32> to vector<8x32xf32>
    %23 = arith.mulf %21, %22 : vector<8x32xf32>
    %24 = vector.broadcast %3 : vector<1x32xf32> to vector<8x32xf32>
    %25 = arith.addf %23, %24 : vector<8x32xf32>
    %26 = arith.truncf %25 : vector<8x32xf32> to vector<8x32xbf16>
    %c0_10 = arith.constant 0 : index
    %c0_11 = arith.constant 0 : index
    %27 = vector.load %arg4[%c0_10, %c0_11] : memref<32x64xbf16, #tpu.memory_space<vmem>>, vector<32x64xbf16>
    %cst_12 = arith.constant dense<0.000000e+00> : vector<8x64xf32>
    %28 = tpu.matmul %26, %27, %cst_12 {dimension_numbers = #tpu.dot_dimension_numbers<[1], [0], [0], [1], [0, 0, 1, 1], [], []>} : vector<8x32xbf16>, vector<32x64xbf16>, vector<8x64xf32> -> vector<8x64xf32>
    %c0_13 = arith.constant 0 : index
    %c0_14 = arith.constant 0 : index
    %29 = vector.load %arg5[%c0_13, %c0_14] : memref<1x64xf32, #tpu.memory_space<vmem>>, vector<1x64xf32>
    %30 = vector.broadcast %29 : vector<1x64xf32> to vector<8x64xf32>
    %31 = arith.addf %28, %30 : vector<8x64xf32>
    %cst_15 = arith.constant 5.000000e-01 : f32
    %32 = vector.broadcast %cst_15 : f32 to vector<8x64xf32>
    %33 = arith.mulf %32, %31 : vector<8x64xf32>
    %cst_16 = arith.constant 0.707106769 : f32
    %34 = vector.broadcast %cst_16 : f32 to vector<8x64xf32>
    %35 = arith.mulf %31, %34 : vector<8x64xf32>
    %36 = math.erf %35 : vector<8x64xf32>
    %cst_17 = arith.constant 1.000000e+00 : f32
    %37 = vector.broadcast %cst_17 : f32 to vector<8x64xf32>
    %38 = arith.addf %37, %36 : vector<8x64xf32>
    %39 = arith.mulf %33, %38 : vector<8x64xf32>
    %40 = arith.truncf %39 : vector<8x64xf32> to vector<8x64xbf16>
    %c0_18 = arith.constant 0 : index
    %c0_19 = arith.constant 0 : index
    %41 = vector.load %arg6[%c0_18, %c0_19] : memref<64x32xbf16, #tpu.memory_space<vmem>>, vector<64x32xbf16>
    %cst_20 = arith.constant dense<0.000000e+00> : vector<8x32xf32>
    %42 = tpu.matmul %40, %41, %cst_20 {dimension_numbers = #tpu.dot_dimension_numbers<[1], [0], [0], [1], [0, 0, 1, 1], [], []>} : vector<8x64xbf16>, vector<64x32xbf16>, vector<8x32xf32> -> vector<8x32xf32>
    %c0_21 = arith.constant 0 : index
    %c0_22 = arith.constant 0 : index
    %43 = vector.load %arg7[%c0_21, %c0_22] : memref<1x32xf32, #tpu.memory_space<vmem>>, vector<1x32xf32>
    %44 = vector.broadcast %43 : vector<1x32xf32> to vector<8x32xf32>
    %45 = arith.addf %42, %44 : vector<8x32xf32>
    %cst_23 = arith.constant 5.000000e-01 : f32
    %46 = vector.broadcast %cst_23 : f32 to vector<8x32xf32>
    %47 = arith.mulf %46, %45 : vector<8x32xf32>
    %48 = arith.addf %47, %1 : vector<8x32xf32>
    %c0_24 = arith.constant 0 : index
    %c0_25 = arith.constant 0 : index
    %49 = vector.load %arg8[%c0_24, %c0_25] : memref<1x32xf32, #tpu.memory_space<vmem>>, vector<1x32xf32>
    %c0_26 = arith.constant 0 : index
    %c0_27 = arith.constant 0 : index
    %50 = vector.load %arg9[%c0_26, %c0_27] : memref<1x32xf32, #tpu.memory_space<vmem>>, vector<1x32xf32>
    %cst_28 = arith.constant dense<0.000000e+00> : vector<8xf32>
    %51 = vector.multi_reduction <add>, %48, %cst_28 [1] : vector<8x32xf32> to vector<8xf32>
    %52 = vector.shape_cast %51 : vector<8xf32> to vector<8x1xf32>
    %cst_29 = arith.constant 3.200000e+01 : f32
    %53 = vector.broadcast %cst_29 : f32 to vector<8x1xf32>
    %54 = arith.divf %52, %53 : vector<8x1xf32>
    %55 = vector.broadcast %54 : vector<8x1xf32> to vector<8x32xf32>
    %56 = arith.subf %48, %55 : vector<8x32xf32>
    %57 = arith.mulf %56, %56 : vector<8x32xf32>
    %cst_30 = arith.constant dense<0.000000e+00> : vector<8xf32>
    %58 = vector.multi_reduction <add>, %57, %cst_30 [1] : vector<8x32xf32> to vector<8xf32>
    %59 = vector.shape_cast %58 : vector<8xf32> to vector<8x1xf32>
    %cst_31 = arith.constant 3.200000e+01 : f32
    %60 = vector.broadcast %cst_31 : f32 to vector<8x1xf32>
    %61 = arith.divf %59, %60 : vector<8x1xf32>
    %62 = vector.broadcast %54 : vector<8x1xf32> to vector<8x32xf32>
    %63 = arith.subf %48, %62 : vector<8x32xf32>
    %cst_32 = arith.constant 9.99999974E-6 : f32
    %64 = vector.broadcast %cst_32 : f32 to vector<8x1xf32>
    %65 = arith.addf %61, %64 : vector<8x1xf32>
    %66 = math.rsqrt %65 : vector<8x1xf32>
    %67 = vector.broadcast %66 : vector<8x1xf32> to vector<8x32xf32>
    %68 = arith.mulf %63, %67 : vector<8x32xf32>
    %69 = vector.broadcast %49 : vector<1x32xf32> to vector<8x32xf32>
    %70 = arith.mulf %68, %69 : vector<8x32xf32>
    %71 = vector.broadcast %50 : vector<1x32xf32> to vector<8x32xf32>
    %72 = arith.addf %70, %71 : vector<8x32xf32>
    %73 = arith.truncf %72 : vector<8x32xf32> to vector<8x32xbf16>
    %c0_33 = arith.constant 0 : index
    %c0_34 = arith.constant 0 : index
    %74 = vector.load %arg10[%c0_33, %c0_34] : memref<32x96xbf16, #tpu.memory_space<vmem>>, vector<32x96xbf16>
    %cst_35 = arith.constant dense<0.000000e+00> : vector<8x96xf32>
    %75 = tpu.matmul %73, %74, %cst_35 {dimension_numbers = #tpu.dot_dimension_numbers<[1], [0], [0], [1], [0, 0, 1, 1], [], []>} : vector<8x32xbf16>, vector<32x96xbf16>, vector<8x96xf32> -> vector<8x96xf32>
    %c0_36 = arith.constant 0 : index
    %c0_37 = arith.constant 0 : index
    %76 = vector.load %arg11[%c0_36, %c0_37] : memref<1x96xf32, #tpu.memory_space<vmem>>, vector<1x96xf32>
    %77 = vector.broadcast %76 : vector<1x96xf32> to vector<8x96xf32>
    %78 = arith.addf %75, %77 : vector<8x96xf32>
    %79 = vector.extract_strided_slice %78 {offsets = [0, 0], sizes = [8, 8], strides = [1, 1]} : vector<8x96xf32> to vector<8x8xf32>
    %c0_38 = arith.constant 0 : index
    %c0_39 = arith.constant 0 : index
    %c0_40 = arith.constant 0 : index
    %80 = vector.load %arg33[%c0_38, %c0_39, %c0_40] : memref<12x8x8xf32, #tpu.memory_space<vmem>>, vector<1x8x8xf32>
    %81 = vector.shape_cast %80 : vector<1x8x8xf32> to vector<8x8xf32>
    %82 = vector.shape_cast %79 : vector<8x8xf32> to vector<1x8x8xf32>
    tpu.vector_store %arg33[%c0_38, %c0_39, %c0_40], %82 {strides = array<i32>} : memref<12x8x8xf32, #tpu.memory_space<vmem>>, vector<1x8x8xf32>,
    %83 = vector.extract_strided_slice %78 {offsets = [0, 8], sizes = [8, 8], strides = [1, 1]} : vector<8x96xf32> to vector<8x8xf32>
    %c1 = arith.constant 1 : index
    %c0_41 = arith.constant 0 : index
    %c0_42 = arith.constant 0 : index
    %84 = vector.load %arg33[%c1, %c0_41, %c0_42] : memref<12x8x8xf32, #tpu.memory_space<vmem>>, vector<1x8x8xf32>
    %85 = vector.shape_cast %84 : vector<1x8x8xf32> to vector<8x8xf32>
    %86 = vector.shape_cast %83 : vector<8x8xf32> to vector<1x8x8xf32>
    tpu.vector_store %arg33[%c1, %c0_41, %c0_42], %86 {strides = array<i32>} : memref<12x8x8xf32, #tpu.memory_space<vmem>>, vector<1x8x8xf32>,
    %87 = vector.extract_strided_slice %78 {offsets = [0, 16], sizes = [8, 8], strides = [1, 1]} : vector<8x96xf32> to vector<8x8xf32>
    %c2 = arith.constant 2 : index
    %c0_43 = arith.constant 0 : index
    %c0_44 = arith.constant 0 : index
    %88 = vector.load %arg33[%c2, %c0_43, %c0_44] : memref<12x8x8xf32, #tpu.memory_space<vmem>>, vector<1x8x8xf32>
    %89 = vector.shape_cast %88 : vector<1x8x8xf32> to vector<8x8xf32>
    %90 = vector.shape_cast %87 : vector<8x8xf32> to vector<1x8x8xf32>
    tpu.vector_store %arg33[%c2, %c0_43, %c0_44], %90 {strides = array<i32>} : memref<12x8x8xf32, #tpu.memory_space<vmem>>, vector<1x8x8xf32>,
    %91 = vector.extract_strided_slice %78 {offsets = [0, 24], sizes = [8, 8], strides = [1, 1]} : vector<8x96xf32> to vector<8x8xf32>
    %c3 = arith.constant 3 : index
    %c0_45 = arith.constant 0 : index
    %c0_46 = arith.constant 0 : index
    %92 = vector.load %arg33[%c3, %c0_45, %c0_46] : memref<12x8x8xf32, #tpu.memory_space<vmem>>, vector<1x8x8xf32>
    %93 = vector.shape_cast %92 : vector<1x8x8xf32> to vector<8x8xf32>
    %94 = vector.shape_cast %91 : vector<8x8xf32> to vector<1x8x8xf32>
    tpu.vector_store %arg33[%c3, %c0_45, %c0_46], %94 {strides = array<i32>} : memref<12x8x8xf32, #tpu.memory_space<vmem>>, vector<1x8x8xf32>,
    %95 = vector.extract_strided_slice %78 {offsets = [0, 32], sizes = [8, 8], strides = [1, 1]} : vector<8x96xf32> to vector<8x8xf32>
    %c4 = arith.constant 4 : index
    %c0_47 = arith.constant 0 : index
    %c0_48 = arith.constant 0 : index
    %96 = vector.load %arg33[%c4, %c0_47, %c0_48] : memref<12x8x8xf32, #tpu.memory_space<vmem>>, vector<1x8x8xf32>
    %97 = vector.shape_cast %96 : vector<1x8x8xf32> to vector<8x8xf32>
    %98 = vector.shape_cast %95 : vector<8x8xf32> to vector<1x8x8xf32>
    tpu.vector_store %arg33[%c4, %c0_47, %c0_48], %98 {strides = array<i32>} : memref<12x8x8xf32, #tpu.memory_space<vmem>>, vector<1x8x8xf32>,
    %99 = vector.extract_strided_slice %78 {offsets = [0, 40], sizes = [8, 8], strides = [1, 1]} : vector<8x96xf32> to vector<8x8xf32>
    %c5 = arith.constant 5 : index
    %c0_49 = arith.constant 0 : index
    %c0_50 = arith.constant 0 : index
    %100 = vector.load %arg33[%c5, %c0_49, %c0_50] : memref<12x8x8xf32, #tpu.memory_space<vmem>>, vector<1x8x8xf32>
    %101 = vector.shape_cast %100 : vector<1x8x8xf32> to vector<8x8xf32>
    %102 = vector.shape_cast %99 : vector<8x8xf32> to vector<1x8x8xf32>
    tpu.vector_store %arg33[%c5, %c0_49, %c0_50], %102 {strides = array<i32>} : memref<12x8x8xf32, #tpu.memory_space<vmem>>, vector<1x8x8xf32>,
    %103 = vector.extract_strided_slice %78 {offsets = [0, 48], sizes = [8, 8], strides = [1, 1]} : vector<8x96xf32> to vector<8x8xf32>
    %c6 = arith.constant 6 : index
    %c0_51 = arith.constant 0 : index
    %c0_52 = arith.constant 0 : index
    %104 = vector.load %arg33[%c6, %c0_51, %c0_52] : memref<12x8x8xf32, #tpu.memory_space<vmem>>, vector<1x8x8xf32>
    %105 = vector.shape_cast %104 : vector<1x8x8xf32> to vector<8x8xf32>
    %106 = vector.shape_cast %103 : vector<8x8xf32> to vector<1x8x8xf32>
    tpu.vector_store %arg33[%c6, %c0_51, %c0_52], %106 {strides = array<i32>} : memref<12x8x8xf32, #tpu.memory_space<vmem>>, vector<1x8x8xf32>,
    %107 = vector.extract_strided_slice %78 {offsets = [0, 56], sizes = [8, 8], strides = [1, 1]} : vector<8x96xf32> to vector<8x8xf32>
    %c7 = arith.constant 7 : index
    %c0_53 = arith.constant 0 : index
    %c0_54 = arith.constant 0 : index
    %108 = vector.load %arg33[%c7, %c0_53, %c0_54] : memref<12x8x8xf32, #tpu.memory_space<vmem>>, vector<1x8x8xf32>
    %109 = vector.shape_cast %108 : vector<1x8x8xf32> to vector<8x8xf32>
    %110 = vector.shape_cast %107 : vector<8x8xf32> to vector<1x8x8xf32>
    tpu.vector_store %arg33[%c7, %c0_53, %c0_54], %110 {strides = array<i32>} : memref<12x8x8xf32, #tpu.memory_space<vmem>>, vector<1x8x8xf32>,
    %111 = vector.extract_strided_slice %78 {offsets = [0, 64], sizes = [8, 8], strides = [1, 1]} : vector<8x96xf32> to vector<8x8xf32>
    %c8 = arith.constant 8 : index
    %c0_55 = arith.constant 0 : index
    %c0_56 = arith.constant 0 : index
    %112 = vector.load %arg33[%c8, %c0_55, %c0_56] : memref<12x8x8xf32, #tpu.memory_space<vmem>>, vector<1x8x8xf32>
    %113 = vector.shape_cast %112 : vector<1x8x8xf32> to vector<8x8xf32>
    %114 = vector.shape_cast %111 : vector<8x8xf32> to vector<1x8x8xf32>
    tpu.vector_store %arg33[%c8, %c0_55, %c0_56], %114 {strides = array<i32>} : memref<12x8x8xf32, #tpu.memory_space<vmem>>, vector<1x8x8xf32>,
    %115 = vector.extract_strided_slice %78 {offsets = [0, 72], sizes = [8, 8], strides = [1, 1]} : vector<8x96xf32> to vector<8x8xf32>
    %c9 = arith.constant 9 : index
    %c0_57 = arith.constant 0 : index
    %c0_58 = arith.constant 0 : index
    %116 = vector.load %arg33[%c9, %c0_57, %c0_58] : memref<12x8x8xf32, #tpu.memory_space<vmem>>, vector<1x8x8xf32>
    %117 = vector.shape_cast %116 : vector<1x8x8xf32> to vector<8x8xf32>
    %118 = vector.shape_cast %115 : vector<8x8xf32> to vector<1x8x8xf32>
    tpu.vector_store %arg33[%c9, %c0_57, %c0_58], %118 {strides = array<i32>} : memref<12x8x8xf32, #tpu.memory_space<vmem>>, vector<1x8x8xf32>,
    %119 = vector.extract_strided_slice %78 {offsets = [0, 80], sizes = [8, 8], strides = [1, 1]} : vector<8x96xf32> to vector<8x8xf32>
    %c10 = arith.constant 10 : index
    %c0_59 = arith.constant 0 : index
    %c0_60 = arith.constant 0 : index
    %120 = vector.load %arg33[%c10, %c0_59, %c0_60] : memref<12x8x8xf32, #tpu.memory_space<vmem>>, vector<1x8x8xf32>
    %121 = vector.shape_cast %120 : vector<1x8x8xf32> to vector<8x8xf32>
    %122 = vector.shape_cast %119 : vector<8x8xf32> to vector<1x8x8xf32>
    tpu.vector_store %arg33[%c10, %c0_59, %c0_60], %122 {strides = array<i32>} : memref<12x8x8xf32, #tpu.memory_space<vmem>>, vector<1x8x8xf32>,
    %123 = vector.extract_strided_slice %78 {offsets = [0, 88], sizes = [8, 8], strides = [1, 1]} : vector<8x96xf32> to vector<8x8xf32>
    %c11 = arith.constant 11 : index
    %c0_61 = arith.constant 0 : index
    %c0_62 = arith.constant 0 : index
    %124 = vector.load %arg33[%c11, %c0_61, %c0_62] : memref<12x8x8xf32, #tpu.memory_space<vmem>>, vector<1x8x8xf32>
    %125 = vector.shape_cast %124 : vector<1x8x8xf32> to vector<8x8xf32>
    %126 = vector.shape_cast %123 : vector<8x8xf32> to vector<1x8x8xf32>
    tpu.vector_store %arg33[%c11, %c0_61, %c0_62], %126 {strides = array<i32>} : memref<12x8x8xf32, #tpu.memory_space<vmem>>, vector<1x8x8xf32>,
    %cst_63 = arith.constant 0.000000e+00 : f32
    %127 = vector.broadcast %cst_63 : f32 to vector<8x32xf32>
    %c0_64 = arith.constant 0 : index
    %c0_65 = arith.constant 0 : index
    %128 = vector.load %arg34[%c0_64, %c0_65] : memref<8x32xf32, #tpu.memory_space<vmem>>, vector<8x32xf32>
    tpu.vector_store %arg34[%c0_64, %c0_65], %127 {strides = array<i32>} : memref<8x32xf32, #tpu.memory_space<vmem>>, vector<8x32xf32>,
    %c0_i32 = arith.constant 0 : i32
    %c4_i32 = arith.constant 4 : i32
    %129 = arith.addi %c0_i32, %c4_i32 : i32
    %c1_i32 = arith.constant 1 : i32
    scf.for %arg35 = %c0_i32 to %129 step %c1_i32  : i32 {
      %310 = arith.index_cast %arg35 : i32 to index
      %c0_144 = arith.constant 0 : index
      %c0_145 = arith.constant 0 : index
      %311 = vector.load %arg33[%310, %c0_144, %c0_145] : memref<12x8x8xf32, #tpu.memory_space<vmem>>, vector<1x8x8xf32>
      %312 = vector.shape_cast %311 : vector<1x8x8xf32> to vector<8x8xf32>
      %cst_146 = arith.constant 0.353553385 : f32
      %313 = vector.broadcast %cst_146 : f32 to vector<8x8xf32>
      %314 = arith.mulf %312, %313 : vector<8x8xf32>
      %315 = arith.truncf %314 : vector<8x8xf32> to vector<8x8xbf16>
      %c4_i32_147 = arith.constant 4 : i32
      %316 = arith.addi %c4_i32_147, %arg35 : i32
      %317 = arith.index_cast %316 : i32 to index
      %c0_148 = arith.constant 0 : index
      %c0_149 = arith.constant 0 : index
      %318 = vector.load %arg33[%317, %c0_148, %c0_149] : memref<12x8x8xf32, #tpu.memory_space<vmem>>, vector<1x8x8xf32>
      %319 = vector.shape_cast %318 : vector<1x8x8xf32> to vector<8x8xf32>
      %320 = arith.truncf %319 : vector<8x8xf32> to vector<8x8xbf16>
      %c8_i32_150 = arith.constant 8 : i32
      %321 = arith.addi %c8_i32_150, %arg35 : i32
      %322 = arith.index_cast %321 : i32 to index
      %c0_151 = arith.constant 0 : index
      %c0_152 = arith.constant 0 : index
      %323 = vector.load %arg33[%322, %c0_151, %c0_152] : memref<12x8x8xf32, #tpu.memory_space<vmem>>, vector<1x8x8xf32>
      %324 = vector.shape_cast %323 : vector<1x8x8xf32> to vector<8x8xf32>
      %325 = arith.truncf %324 : vector<8x8xf32> to vector<8x8xbf16>
      %cst_153 = arith.constant dense<0.000000e+00> : vector<8x8xf32>
      %326 = tpu.matmul %315, %320, %cst_153 {dimension_numbers = #tpu.dot_dimension_numbers<[1], [1], [0], [0], [0, 0, 1, 0], [], []>} : vector<8x8xbf16>, vector<8x8xbf16>, vector<8x8xf32> -> vector<8x8xf32>
      %cst_154 = arith.constant dense<0xFF800000> : vector<8xf32>
      %327 = vector.multi_reduction <maximumf>, %326, %cst_154 [1] : vector<8x8xf32> to vector<8xf32>
      %328 = vector.shape_cast %327 : vector<8xf32> to vector<8x1xf32>
      %329 = vector.broadcast %328 : vector<8x1xf32> to vector<8x8xf32>
      %330 = arith.subf %326, %329 : vector<8x8xf32>
      %331 = math.exp %330 : vector<8x8xf32>
      %cst_155 = arith.constant dense<0.000000e+00> : vector<8xf32>
      %332 = vector.multi_reduction <add>, %331, %cst_155 [1] : vector<8x8xf32> to vector<8xf32>
      %333 = vector.shape_cast %332 : vector<8xf32> to vector<8x1xf32>
      %334 = tpu.reciprocal %333 {approx = true} : vector<8x1xf32> -> vector<8x1xf32>
      %335 = vector.broadcast %334 : vector<8x1xf32> to vector<8x8xf32>
      %336 = arith.mulf %331, %335 : vector<8x8xf32>
      %337 = arith.truncf %336 : vector<8x8xf32> to vector<8x8xbf16>
      %cst_156 = arith.constant dense<0.000000e+00> : vector<8x8xf32>
      %338 = tpu.matmul %337, %325, %cst_156 {dimension_numbers = #tpu.dot_dimension_numbers<[1], [0], [0], [1], [0, 0, 1, 1], [], []>} : vector<8x8xbf16>, vector<8x8xbf16>, vector<8x8xf32> -> vector<8x8xf32>
      %c0_157 = arith.constant 0 : index
      %c0_158 = arith.constant 0 : index
      %339 = vector.load %arg34[%c0_157, %c0_158] : memref<8x32xf32, #tpu.memory_space<vmem>>, vector<8x32xf32>
      %340 = arith.truncf %338 : vector<8x8xf32> to vector<8x8xbf16>
      %341 = arith.index_cast %arg35 : i32 to index
      %c0_159 = arith.constant 0 : index
      %c0_160 = arith.constant 0 : index
      %342 = vector.load %arg12[%341, %c0_159, %c0_160] : memref<4x8x32xbf16, #tpu.memory_space<vmem>>, vector<1x8x32xbf16>
      %343 = vector.shape_cast %342 : vector<1x8x32xbf16> to vector<8x32xbf16>
      %cst_161 = arith.constant dense<0.000000e+00> : vector<8x32xf32>
      %344 = tpu.matmul %340, %343, %cst_161 {dimension_numbers = #tpu.dot_dimension_numbers<[1], [0], [0], [1], [0, 0, 1, 1], [], []>} : vector<8x8xbf16>, vector<8x32xbf16>, vector<8x32xf32> -> vector<8x32xf32>
      %345 = arith.addf %339, %344 : vector<8x32xf32>
      %c0_162 = arith.constant 0 : index
      %c0_163 = arith.constant 0 : index
      %346 = vector.load %arg34[%c0_162, %c0_163] : memref<8x32xf32, #tpu.memory_space<vmem>>, vector<8x32xf32>
      tpu.vector_store %arg34[%c0_162, %c0_163], %345 {strides = array<i32>} : memref<8x32xf32, #tpu.memory_space<vmem>>, vector<8x32xf32>,
    }
    %c4_i32_66 = arith.constant 4 : i32
    %c0_67 = arith.constant 0 : index
    %c0_68 = arith.constant 0 : index
    %130 = vector.load %arg34[%c0_67, %c0_68] : memref<8x32xf32, #tpu.memory_space<vmem>>, vector<8x32xf32>
    %c0_69 = arith.constant 0 : index
    %c0_70 = arith.constant 0 : index
    %131 = vector.load %arg13[%c0_69, %c0_70] : memref<1x32xf32, #tpu.memory_space<vmem>>, vector<1x32xf32>
    %132 = vector.broadcast %131 : vector<1x32xf32> to vector<8x32xf32>
    %133 = arith.addf %130, %132 : vector<8x32xf32>
    %134 = arith.addf %133, %48 : vector<8x32xf32>
    %c0_71 = arith.constant 0 : index
    %c0_72 = arith.constant 0 : index
    %135 = vector.load %arg14[%c0_71, %c0_72] : memref<1x32xf32, #tpu.memory_space<vmem>>, vector<1x32xf32>
    %c0_73 = arith.constant 0 : index
    %c0_74 = arith.constant 0 : index
    %136 = vector.load %arg15[%c0_73, %c0_74] : memref<1x32xf32, #tpu.memory_space<vmem>>, vector<1x32xf32>
    %cst_75 = arith.constant dense<0.000000e+00> : vector<8xf32>
    %137 = vector.multi_reduction <add>, %134, %cst_75 [1] : vector<8x32xf32> to vector<8xf32>
    %138 = vector.shape_cast %137 : vector<8xf32> to vector<8x1xf32>
    %cst_76 = arith.constant 3.200000e+01 : f32
    %139 = vector.broadcast %cst_76 : f32 to vector<8x1xf32>
    %140 = arith.divf %138, %139 : vector<8x1xf32>
    %141 = vector.broadcast %140 : vector<8x1xf32> to vector<8x32xf32>
    %142 = arith.subf %134, %141 : vector<8x32xf32>
    %143 = arith.mulf %142, %142 : vector<8x32xf32>
    %cst_77 = arith.constant dense<0.000000e+00> : vector<8xf32>
    %144 = vector.multi_reduction <add>, %143, %cst_77 [1] : vector<8x32xf32> to vector<8xf32>
    %145 = vector.shape_cast %144 : vector<8xf32> to vector<8x1xf32>
    %cst_78 = arith.constant 3.200000e+01 : f32
    %146 = vector.broadcast %cst_78 : f32 to vector<8x1xf32>
    %147 = arith.divf %145, %146 : vector<8x1xf32>
    %148 = vector.broadcast %140 : vector<8x1xf32> to vector<8x32xf32>
    %149 = arith.subf %134, %148 : vector<8x32xf32>
    %cst_79 = arith.constant 9.99999974E-6 : f32
    %150 = vector.broadcast %cst_79 : f32 to vector<8x1xf32>
    %151 = arith.addf %147, %150 : vector<8x1xf32>
    %152 = math.rsqrt %151 : vector<8x1xf32>
    %153 = vector.broadcast %152 : vector<8x1xf32> to vector<8x32xf32>
    %154 = arith.mulf %149, %153 : vector<8x32xf32>
    %155 = vector.broadcast %135 : vector<1x32xf32> to vector<8x32xf32>
    %156 = arith.mulf %154, %155 : vector<8x32xf32>
    %157 = vector.broadcast %136 : vector<1x32xf32> to vector<8x32xf32>
    %158 = arith.addf %156, %157 : vector<8x32xf32>
    %159 = arith.truncf %158 : vector<8x32xf32> to vector<8x32xbf16>
    %c0_80 = arith.constant 0 : index
    %c0_81 = arith.constant 0 : index
    %160 = vector.load %arg16[%c0_80, %c0_81] : memref<32x32xbf16, #tpu.memory_space<vmem>>, vector<32x32xbf16>
    %cst_82 = arith.constant dense<0.000000e+00> : vector<8x32xf32>
    %161 = tpu.matmul %159, %160, %cst_82 {dimension_numbers = #tpu.dot_dimension_numbers<[1], [0], [0], [1], [0, 0, 1, 1], [], []>} : vector<8x32xbf16>, vector<32x32xbf16>, vector<8x32xf32> -> vector<8x32xf32>
    %c0_83 = arith.constant 0 : index
    %c0_84 = arith.constant 0 : index
    %162 = vector.load %arg17[%c0_83, %c0_84] : memref<32x32xbf16, #tpu.memory_space<vmem>>, vector<32x32xbf16>
    %cst_85 = arith.constant dense<0.000000e+00> : vector<8x32xf32>
    %163 = tpu.matmul %159, %162, %cst_85 {dimension_numbers = #tpu.dot_dimension_numbers<[1], [0], [0], [1], [0, 0, 1, 1], [], []>} : vector<8x32xbf16>, vector<32x32xbf16>, vector<8x32xf32> -> vector<8x32xf32>
    %164 = arith.negf %163 : vector<8x32xf32>
    %165 = math.exp %164 : vector<8x32xf32>
    %cst_86 = arith.constant 1.000000e+00 : f32
    %166 = vector.broadcast %cst_86 : f32 to vector<8x32xf32>
    %167 = arith.addf %166, %165 : vector<8x32xf32>
    %168 = arith.divf %166, %167 : vector<8x32xf32>
    %169 = arith.mulf %161, %168 : vector<8x32xf32>
    %c0_87 = arith.constant 0 : index
    %c0_88 = arith.constant 0 : index
    %170 = vector.load %arg18[%c0_87, %c0_88] : memref<3x32xf32, #tpu.memory_space<vmem>>, vector<3x32xf32>
    %171 = vector.extract_strided_slice %170 {offsets = [1, 0], sizes = [1, 32], strides = [1, 1]} : vector<3x32xf32> to vector<1x32xf32>
    %172 = vector.broadcast %171 : vector<1x32xf32> to vector<8x32xf32>
    %173 = arith.mulf %169, %172 : vector<8x32xf32>
    %174 = tpu.iota {dimensions = array<i32: 0>} : vector<8x1xi32>
    %c1_i32_89 = arith.constant 1 : i32
    %175 = tpu.dynamic_rotate %169 by %c1_i32_89 dim 0 : vector<8x32xf32>, i32 -> vector<8x32xf32>
    %c-1_i32 = arith.constant -1 : i32
    %176 = vector.broadcast %c-1_i32 : i32 to vector<8x1xi32>
    %177 = arith.addi %174, %176 : vector<8x1xi32>
    %c0_i32_90 = arith.constant 0 : i32
    %178 = vector.broadcast %c0_i32_90 : i32 to vector<8x1xi32>
    %179 = arith.cmpi sge, %177, %178 : vector<8x1xi32>
    %c-1_i32_91 = arith.constant -1 : i32
    %180 = vector.broadcast %c-1_i32_91 : i32 to vector<8x1xi32>
    %181 = arith.addi %174, %180 : vector<8x1xi32>
    %c8_i32 = arith.constant 8 : i32
    %182 = vector.broadcast %c8_i32 : i32 to vector<8x1xi32>
    %183 = arith.cmpi slt, %181, %182 : vector<8x1xi32>
    %184 = arith.andi %179, %183 : vector<8x1xi1>
    %185 = arith.extui %184 : vector<8x1xi1> to vector<8x1xi32>
    %186 = arith.sitofp %185 : vector<8x1xi32> to vector<8x1xf32>
    %187 = vector.broadcast %186 : vector<8x1xf32> to vector<8x32xf32>
    %188 = arith.mulf %175, %187 : vector<8x32xf32>
    %189 = vector.extract_strided_slice %170 {offsets = [0, 0], sizes = [1, 32], strides = [1, 1]} : vector<3x32xf32> to vector<1x32xf32>
    %190 = vector.broadcast %189 : vector<1x32xf32> to vector<8x32xf32>
    %191 = arith.mulf %188, %190 : vector<8x32xf32>
    %192 = arith.addf %173, %191 : vector<8x32xf32>
    %c7_i32 = arith.constant 7 : i32
    %193 = tpu.dynamic_rotate %169 by %c7_i32 dim 0 : vector<8x32xf32>, i32 -> vector<8x32xf32>
    %c1_i32_92 = arith.constant 1 : i32
    %194 = vector.broadcast %c1_i32_92 : i32 to vector<8x1xi32>
    %195 = arith.addi %174, %194 : vector<8x1xi32>
    %c0_i32_93 = arith.constant 0 : i32
    %196 = vector.broadcast %c0_i32_93 : i32 to vector<8x1xi32>
    %197 = arith.cmpi sge, %195, %196 : vector<8x1xi32>
    %c1_i32_94 = arith.constant 1 : i32
    %198 = vector.broadcast %c1_i32_94 : i32 to vector<8x1xi32>
    %199 = arith.addi %174, %198 : vector<8x1xi32>
    %c8_i32_95 = arith.constant 8 : i32
    %200 = vector.broadcast %c8_i32_95 : i32 to vector<8x1xi32>
    %201 = arith.cmpi slt, %199, %200 : vector<8x1xi32>
    %202 = arith.andi %197, %201 : vector<8x1xi1>
    %203 = arith.extui %202 : vector<8x1xi1> to vector<8x1xi32>
    %204 = arith.sitofp %203 : vector<8x1xi32> to vector<8x1xf32>
    %205 = vector.broadcast %204 : vector<8x1xf32> to vector<8x32xf32>
    %206 = arith.mulf %193, %205 : vector<8x32xf32>
    %207 = vector.extract_strided_slice %170 {offsets = [2, 0], sizes = [1, 32], strides = [1, 1]} : vector<3x32xf32> to vector<1x32xf32>
    %208 = vector.broadcast %207 : vector<1x32xf32> to vector<8x32xf32>
    %209 = arith.mulf %206, %208 : vector<8x32xf32>
    %210 = arith.addf %192, %209 : vector<8x32xf32>
    %c0_96 = arith.constant 0 : index
    %c0_97 = arith.constant 0 : index
    %211 = vector.load %arg21[%c0_96, %c0_97] : memref<1x32xf32, #tpu.memory_space<vmem>>, vector<1x32xf32>
    %212 = vector.broadcast %211 : vector<1x32xf32> to vector<8x32xf32>
    %213 = arith.subf %210, %212 : vector<8x32xf32>
    %c0_98 = arith.constant 0 : index
    %c0_99 = arith.constant 0 : index
    %214 = vector.load %arg22[%c0_98, %c0_99] : memref<1x32xf32, #tpu.memory_space<vmem>>, vector<1x32xf32>
    %cst_100 = arith.constant 9.99999974E-6 : f32
    %215 = vector.broadcast %cst_100 : f32 to vector<1x32xf32>
    %216 = arith.addf %214, %215 : vector<1x32xf32>
    %217 = math.rsqrt %216 : vector<1x32xf32>
    %218 = vector.broadcast %217 : vector<1x32xf32> to vector<8x32xf32>
    %219 = arith.mulf %213, %218 : vector<8x32xf32>
    %c0_101 = arith.constant 0 : index
    %c0_102 = arith.constant 0 : index
    %220 = vector.load %arg19[%c0_101, %c0_102] : memref<1x32xf32, #tpu.memory_space<vmem>>, vector<1x32xf32>
    %221 = vector.broadcast %220 : vector<1x32xf32> to vector<8x32xf32>
    %222 = arith.mulf %219, %221 : vector<8x32xf32>
    %c0_103 = arith.constant 0 : index
    %c0_104 = arith.constant 0 : index
    %223 = vector.load %arg20[%c0_103, %c0_104] : memref<1x32xf32, #tpu.memory_space<vmem>>, vector<1x32xf32>
    %224 = vector.broadcast %223 : vector<1x32xf32> to vector<8x32xf32>
    %225 = arith.addf %222, %224 : vector<8x32xf32>
    %226 = arith.negf %225 : vector<8x32xf32>
    %227 = math.exp %226 : vector<8x32xf32>
    %cst_105 = arith.constant 1.000000e+00 : f32
    %228 = vector.broadcast %cst_105 : f32 to vector<8x32xf32>
    %229 = arith.addf %228, %227 : vector<8x32xf32>
    %230 = arith.divf %228, %229 : vector<8x32xf32>
    %231 = arith.mulf %225, %230 : vector<8x32xf32>
    %232 = arith.truncf %231 : vector<8x32xf32> to vector<8x32xbf16>
    %c0_106 = arith.constant 0 : index
    %c0_107 = arith.constant 0 : index
    %233 = vector.load %arg23[%c0_106, %c0_107] : memref<32x32xbf16, #tpu.memory_space<vmem>>, vector<32x32xbf16>
    %cst_108 = arith.constant dense<0.000000e+00> : vector<8x32xf32>
    %234 = tpu.matmul %232, %233, %cst_108 {dimension_numbers = #tpu.dot_dimension_numbers<[1], [0], [0], [1], [0, 0, 1, 1], [], []>} : vector<8x32xbf16>, vector<32x32xbf16>, vector<8x32xf32> -> vector<8x32xf32>
    %235 = arith.addf %134, %234 : vector<8x32xf32>
    %c0_109 = arith.constant 0 : index
    %c0_110 = arith.constant 0 : index
    %236 = vector.load %arg24[%c0_109, %c0_110] : memref<1x32xf32, #tpu.memory_space<vmem>>, vector<1x32xf32>
    %c0_111 = arith.constant 0 : index
    %c0_112 = arith.constant 0 : index
    %237 = vector.load %arg25[%c0_111, %c0_112] : memref<1x32xf32, #tpu.memory_space<vmem>>, vector<1x32xf32>
    %cst_113 = arith.constant dense<0.000000e+00> : vector<8xf32>
    %238 = vector.multi_reduction <add>, %235, %cst_113 [1] : vector<8x32xf32> to vector<8xf32>
    %239 = vector.shape_cast %238 : vector<8xf32> to vector<8x1xf32>
    %cst_114 = arith.constant 3.200000e+01 : f32
    %240 = vector.broadcast %cst_114 : f32 to vector<8x1xf32>
    %241 = arith.divf %239, %240 : vector<8x1xf32>
    %242 = vector.broadcast %241 : vector<8x1xf32> to vector<8x32xf32>
    %243 = arith.subf %235, %242 : vector<8x32xf32>
    %244 = arith.mulf %243, %243 : vector<8x32xf32>
    %cst_115 = arith.constant dense<0.000000e+00> : vector<8xf32>
    %245 = vector.multi_reduction <add>, %244, %cst_115 [1] : vector<8x32xf32> to vector<8xf32>
    %246 = vector.shape_cast %245 : vector<8xf32> to vector<8x1xf32>
    %cst_116 = arith.constant 3.200000e+01 : f32
    %247 = vector.broadcast %cst_116 : f32 to vector<8x1xf32>
    %248 = arith.divf %246, %247 : vector<8x1xf32>
    %249 = vector.broadcast %241 : vector<8x1xf32> to vector<8x32xf32>
    %250 = arith.subf %235, %249 : vector<8x32xf32>
    %cst_117 = arith.constant 9.99999974E-6 : f32
    %251 = vector.broadcast %cst_117 : f32 to vector<8x1xf32>
    %252 = arith.addf %248, %251 : vector<8x1xf32>
    %253 = math.rsqrt %252 : vector<8x1xf32>
    %254 = vector.broadcast %253 : vector<8x1xf32> to vector<8x32xf32>
    %255 = arith.mulf %250, %254 : vector<8x32xf32>
    %256 = vector.broadcast %236 : vector<1x32xf32> to vector<8x32xf32>
    %257 = arith.mulf %255, %256 : vector<8x32xf32>
    %258 = vector.broadcast %237 : vector<1x32xf32> to vector<8x32xf32>
    %259 = arith.addf %257, %258 : vector<8x32xf32>
    %260 = arith.truncf %259 : vector<8x32xf32> to vector<8x32xbf16>
    %c0_118 = arith.constant 0 : index
    %c0_119 = arith.constant 0 : index
    %261 = vector.load %arg26[%c0_118, %c0_119] : memref<32x64xbf16, #tpu.memory_space<vmem>>, vector<32x64xbf16>
    %cst_120 = arith.constant dense<0.000000e+00> : vector<8x64xf32>
    %262 = tpu.matmul %260, %261, %cst_120 {dimension_numbers = #tpu.dot_dimension_numbers<[1], [0], [0], [1], [0, 0, 1, 1], [], []>} : vector<8x32xbf16>, vector<32x64xbf16>, vector<8x64xf32> -> vector<8x64xf32>
    %c0_121 = arith.constant 0 : index
    %c0_122 = arith.constant 0 : index
    %263 = vector.load %arg27[%c0_121, %c0_122] : memref<1x64xf32, #tpu.memory_space<vmem>>, vector<1x64xf32>
    %264 = vector.broadcast %263 : vector<1x64xf32> to vector<8x64xf32>
    %265 = arith.addf %262, %264 : vector<8x64xf32>
    %cst_123 = arith.constant 5.000000e-01 : f32
    %266 = vector.broadcast %cst_123 : f32 to vector<8x64xf32>
    %267 = arith.mulf %266, %265 : vector<8x64xf32>
    %cst_124 = arith.constant 0.707106769 : f32
    %268 = vector.broadcast %cst_124 : f32 to vector<8x64xf32>
    %269 = arith.mulf %265, %268 : vector<8x64xf32>
    %270 = math.erf %269 : vector<8x64xf32>
    %cst_125 = arith.constant 1.000000e+00 : f32
    %271 = vector.broadcast %cst_125 : f32 to vector<8x64xf32>
    %272 = arith.addf %271, %270 : vector<8x64xf32>
    %273 = arith.mulf %267, %272 : vector<8x64xf32>
    %274 = arith.truncf %273 : vector<8x64xf32> to vector<8x64xbf16>
    %c0_126 = arith.constant 0 : index
    %c0_127 = arith.constant 0 : index
    %275 = vector.load %arg28[%c0_126, %c0_127] : memref<64x32xbf16, #tpu.memory_space<vmem>>, vector<64x32xbf16>
    %cst_128 = arith.constant dense<0.000000e+00> : vector<8x32xf32>
    %276 = tpu.matmul %274, %275, %cst_128 {dimension_numbers = #tpu.dot_dimension_numbers<[1], [0], [0], [1], [0, 0, 1, 1], [], []>} : vector<8x64xbf16>, vector<64x32xbf16>, vector<8x32xf32> -> vector<8x32xf32>
    %c0_129 = arith.constant 0 : index
    %c0_130 = arith.constant 0 : index
    %277 = vector.load %arg29[%c0_129, %c0_130] : memref<1x32xf32, #tpu.memory_space<vmem>>, vector<1x32xf32>
    %278 = vector.broadcast %277 : vector<1x32xf32> to vector<8x32xf32>
    %279 = arith.addf %276, %278 : vector<8x32xf32>
    %cst_131 = arith.constant 5.000000e-01 : f32
    %280 = vector.broadcast %cst_131 : f32 to vector<8x32xf32>
    %281 = arith.mulf %280, %279 : vector<8x32xf32>
    %282 = arith.addf %281, %235 : vector<8x32xf32>
    %c0_132 = arith.constant 0 : index
    %c0_133 = arith.constant 0 : index
    %283 = vector.load %arg30[%c0_132, %c0_133] : memref<1x32xf32, #tpu.memory_space<vmem>>, vector<1x32xf32>
    %c0_134 = arith.constant 0 : index
    %c0_135 = arith.constant 0 : index
    %284 = vector.load %arg31[%c0_134, %c0_135] : memref<1x32xf32, #tpu.memory_space<vmem>>, vector<1x32xf32>
    %cst_136 = arith.constant dense<0.000000e+00> : vector<8xf32>
    %285 = vector.multi_reduction <add>, %282, %cst_136 [1] : vector<8x32xf32> to vector<8xf32>
    %286 = vector.shape_cast %285 : vector<8xf32> to vector<8x1xf32>
    %cst_137 = arith.constant 3.200000e+01 : f32
    %287 = vector.broadcast %cst_137 : f32 to vector<8x1xf32>
    %288 = arith.divf %286, %287 : vector<8x1xf32>
    %289 = vector.broadcast %288 : vector<8x1xf32> to vector<8x32xf32>
    %290 = arith.subf %282, %289 : vector<8x32xf32>
    %291 = arith.mulf %290, %290 : vector<8x32xf32>
    %cst_138 = arith.constant dense<0.000000e+00> : vector<8xf32>
    %292 = vector.multi_reduction <add>, %291, %cst_138 [1] : vector<8x32xf32> to vector<8xf32>
    %293 = vector.shape_cast %292 : vector<8xf32> to vector<8x1xf32>
    %cst_139 = arith.constant 3.200000e+01 : f32
    %294 = vector.broadcast %cst_139 : f32 to vector<8x1xf32>
    %295 = arith.divf %293, %294 : vector<8x1xf32>
    %296 = vector.broadcast %288 : vector<8x1xf32> to vector<8x32xf32>
    %297 = arith.subf %282, %296 : vector<8x32xf32>
    %cst_140 = arith.constant 9.99999974E-6 : f32
    %298 = vector.broadcast %cst_140 : f32 to vector<8x1xf32>
    %299 = arith.addf %295, %298 : vector<8x1xf32>
    %300 = math.rsqrt %299 : vector<8x1xf32>
    %301 = vector.broadcast %300 : vector<8x1xf32> to vector<8x32xf32>
    %302 = arith.mulf %297, %301 : vector<8x32xf32>
    %303 = vector.broadcast %283 : vector<1x32xf32> to vector<8x32xf32>
    %304 = arith.mulf %302, %303 : vector<8x32xf32>
    %305 = vector.broadcast %284 : vector<1x32xf32> to vector<8x32xf32>
    %306 = arith.addf %304, %305 : vector<8x32xf32>
    %c0_141 = arith.constant 0 : index
    %c0_142 = arith.constant 0 : index
    %c0_143 = arith.constant 0 : index
    %307 = vector.load %arg32[%c0_141, %c0_142, %c0_143] : memref<1x8x32xf32, #tpu.memory_space<vmem>>, vector<1x8x32xf32>
    %308 = vector.shape_cast %307 : vector<1x8x32xf32> to vector<8x32xf32>
    %309 = vector.shape_cast %306 : vector<8x32xf32> to vector<1x8x32xf32>
    tpu.vector_store %arg32[%c0_141, %c0_142, %c0_143], %309 {strides = array<i32>} : memref<1x8x32xf32, #tpu.memory_space<vmem>>, vector<1x8x32xf32>,
    return
  }
  func.func @transform_0(%arg0: i32) -> (i32, i32, i32) {
    %c0_i32 = arith.constant 0 : i32
    %c0_i32_0 = arith.constant 0 : i32
    %c0_i32_1 = arith.constant 0 : i32
    return %arg0, %c0_i32, %c0_i32_0 : i32, i32, i32
  }
  func.func @transform_1(%arg0: i32) -> (i32, i32) {
    %c0_i32 = arith.constant 0 : i32
    %c0_i32_0 = arith.constant 0 : i32
    %c0_i32_1 = arith.constant 0 : i32
    return %c0_i32, %c0_i32_0 : i32, i32
  }
  func.func @transform_2(%arg0: i32) -> (i32, i32) {
    %c0_i32 = arith.constant 0 : i32
    %c0_i32_0 = arith.constant 0 : i32
    %c0_i32_1 = arith.constant 0 : i32
    return %c0_i32, %c0_i32_0 : i32, i32
  }
  func.func @transform_3(%arg0: i32) -> (i32, i32) {
    %c0_i32 = arith.constant 0 : i32
    %c0_i32_0 = arith.constant 0 : i32
    %c0_i32_1 = arith.constant 0 : i32
    return %c0_i32, %c0_i32_0 : i32, i32
  }
  func.func @transform_4(%arg0: i32) -> (i32, i32) {
    %c0_i32 = arith.constant 0 : i32
    %c0_i32_0 = arith.constant 0 : i32
    %c0_i32_1 = arith.constant 0 : i32
    return %c0_i32, %c0_i32_0 : i32, i32
  }
  func.func @transform_5(%arg0: i32) -> (i32, i32) {
    %c0_i32 = arith.constant 0 : i32
    %c0_i32_0 = arith.constant 0 : i32
    %c0_i32_1 = arith.constant 0 : i32
    return %c0_i32, %c0_i32_0 : i32, i32
  }
  func.func @transform_6(%arg0: i32) -> (i32, i32) {
    %c0_i32 = arith.constant 0 : i32
    %c0_i32_0 = arith.constant 0 : i32
    %c0_i32_1 = arith.constant 0 : i32
    return %c0_i32, %c0_i32_0 : i32, i32
  }
  func.func @transform_7(%arg0: i32) -> (i32, i32) {
    %c0_i32 = arith.constant 0 : i32
    %c0_i32_0 = arith.constant 0 : i32
    %c0_i32_1 = arith.constant 0 : i32
    return %c0_i32, %c0_i32_0 : i32, i32
  }
  func.func @transform_8(%arg0: i32) -> (i32, i32) {
    %c0_i32 = arith.constant 0 : i32
    %c0_i32_0 = arith.constant 0 : i32
    %c0_i32_1 = arith.constant 0 : i32
    return %c0_i32, %c0_i32_0 : i32, i32
  }
  func.func @transform_9(%arg0: i32) -> (i32, i32) {
    %c0_i32 = arith.constant 0 : i32
    %c0_i32_0 = arith.constant 0 : i32
    %c0_i32_1 = arith.constant 0 : i32
    return %c0_i32, %c0_i32_0 : i32, i32
  }
  func.func @transform_10(%arg0: i32) -> (i32, i32) {
    %c0_i32 = arith.constant 0 : i32
    %c0_i32_0 = arith.constant 0 : i32
    %c0_i32_1 = arith.constant 0 : i32
    return %c0_i32, %c0_i32_0 : i32, i32
  }
  func.func @transform_11(%arg0: i32) -> (i32, i32, i32) {
    %c0_i32 = arith.constant 0 : i32
    %c0_i32_0 = arith.constant 0 : i32
    %c0_i32_1 = arith.constant 0 : i32
    %c0_i32_2 = arith.constant 0 : i32
    return %c0_i32, %c0_i32_0, %c0_i32_1 : i32, i32, i32
  }
  func.func @transform_12(%arg0: i32) -> (i32, i32) {
    %c0_i32 = arith.constant 0 : i32
    %c0_i32_0 = arith.constant 0 : i32
    %c0_i32_1 = arith.constant 0 : i32
    return %c0_i32, %c0_i32_0 : i32, i32
  }
  func.func @transform_13(%arg0: i32) -> (i32, i32) {
    %c0_i32 = arith.constant 0 : i32
    %c0_i32_0 = arith.constant 0 : i32
    %c0_i32_1 = arith.constant 0 : i32
    return %c0_i32, %c0_i32_0 : i32, i32
  }
  func.func @transform_14(%arg0: i32) -> (i32, i32) {
    %c0_i32 = arith.constant 0 : i32
    %c0_i32_0 = arith.constant 0 : i32
    %c0_i32_1 = arith.constant 0 : i32
    return %c0_i32, %c0_i32_0 : i32, i32
  }
  func.func @transform_15(%arg0: i32) -> (i32, i32) {
    %c0_i32 = arith.constant 0 : i32
    %c0_i32_0 = arith.constant 0 : i32
    %c0_i32_1 = arith.constant 0 : i32
    return %c0_i32, %c0_i32_0 : i32, i32
  }
  func.func @transform_16(%arg0: i32) -> (i32, i32) {
    %c0_i32 = arith.constant 0 : i32
    %c0_i32_0 = arith.constant 0 : i32
    %c0_i32_1 = arith.constant 0 : i32
    return %c0_i32, %c0_i32_0 : i32, i32
  }
  func.func @transform_17(%arg0: i32) -> (i32, i32) {
    %c0_i32 = arith.constant 0 : i32
    %c0_i32_0 = arith.constant 0 : i32
    %c0_i32_1 = arith.constant 0 : i32
    return %c0_i32, %c0_i32_0 : i32, i32
  }
  func.func @transform_18(%arg0: i32) -> (i32, i32) {
    %c0_i32 = arith.constant 0 : i32
    %c0_i32_0 = arith.constant 0 : i32
    %c0_i32_1 = arith.constant 0 : i32
    return %c0_i32, %c0_i32_0 : i32, i32
  }
  func.func @transform_19(%arg0: i32) -> (i32, i32) {
    %c0_i32 = arith.constant 0 : i32
    %c0_i32_0 = arith.constant 0 : i32
    %c0_i32_1 = arith.constant 0 : i32
    return %c0_i32, %c0_i32_0 : i32, i32
  }
  func.func @transform_20(%arg0: i32) -> (i32, i32) {
    %c0_i32 = arith.constant 0 : i32
    %c0_i32_0 = arith.constant 0 : i32
    %c0_i32_1 = arith.constant 0 : i32
    return %c0_i32, %c0_i32_0 : i32, i32
  }
  func.func @transform_21(%arg0: i32) -> (i32, i32) {
    %c0_i32 = arith.constant 0 : i32
    %c0_i32_0 = arith.constant 0 : i32
    %c0_i32_1 = arith.constant 0 : i32
    return %c0_i32, %c0_i32_0 : i32, i32
  }
  func.func @transform_22(%arg0: i32) -> (i32, i32) {
    %c0_i32 = arith.constant 0 : i32
    %c0_i32_0 = arith.constant 0 : i32
    %c0_i32_1 = arith.constant 0 : i32
    return %c0_i32, %c0_i32_0 : i32, i32
  }
  func.func @transform_23(%arg0: i32) -> (i32, i32) {
    %c0_i32 = arith.constant 0 : i32
    %c0_i32_0 = arith.constant 0 : i32
    %c0_i32_1 = arith.constant 0 : i32
    return %c0_i32, %c0_i32_0 : i32, i32
  }
  func.func @transform_24(%arg0: i32) -> (i32, i32) {
    %c0_i32 = arith.constant 0 : i32
    %c0_i32_0 = arith.constant 0 : i32
    %c0_i32_1 = arith.constant 0 : i32
    return %c0_i32, %c0_i32_0 : i32, i32
  }
  func.func @transform_25(%arg0: i32) -> (i32, i32) {
    %c0_i32 = arith.constant 0 : i32
    %c0_i32_0 = arith.constant 0 : i32
    %c0_i32_1 = arith.constant 0 : i32
    return %c0_i32, %c0_i32_0 : i32, i32
  }
  func.func @transform_26(%arg0: i32) -> (i32, i32) {
    %c0_i32 = arith.constant 0 : i32
    %c0_i32_0 = arith.constant 0 : i32
    %c0_i32_1 = arith.constant 0 : i32
    return %c0_i32, %c0_i32_0 : i32, i32
  }
  func.func @transform_27(%arg0: i32) -> (i32, i32) {
    %c0_i32 = arith.constant 0 : i32
    %c0_i32_0 = arith.constant 0 : i32
    %c0_i32_1 = arith.constant 0 : i32
    return %c0_i32, %c0_i32_0 : i32, i32
  }
  func.func @transform_28(%arg0: i32) -> (i32, i32) {
    %c0_i32 = arith.constant 0 : i32
    %c0_i32_0 = arith.constant 0 : i32
    %c0_i32_1 = arith.constant 0 : i32
    return %c0_i32, %c0_i32_0 : i32, i32
  }
  func.func @transform_29(%arg0: i32) -> (i32, i32) {
    %c0_i32 = arith.constant 0 : i32
    %c0_i32_0 = arith.constant 0 : i32
    %c0_i32_1 = arith.constant 0 : i32
    return %c0_i32, %c0_i32_0 : i32, i32
  }
  func.func @transform_30(%arg0: i32) -> (i32, i32) {
    %c0_i32 = arith.constant 0 : i32
    %c0_i32_0 = arith.constant 0 : i32
    %c0_i32_1 = arith.constant 0 : i32
    return %c0_i32, %c0_i32_0 : i32, i32
  }
  func.func @transform_31(%arg0: i32) -> (i32, i32, i32) {
    %c0_i32 = arith.constant 0 : i32
    %c0_i32_0 = arith.constant 0 : i32
    %c0_i32_1 = arith.constant 0 : i32
    return %arg0, %c0_i32, %c0_i32_0 : i32, i32, i32
  }
}

module attributes {stable_mosaic.version = 11 : i64} {
  func.func @_conformer_kernel(%arg0: i32, %arg1: memref<1x8x32xf32, #tpu.memory_space<vmem>>, %arg2: memref<1x32xf32, #tpu.memory_space<vmem>>, %arg3: memref<1x32xf32, #tpu.memory_space<vmem>>, %arg4: memref<32x64xbf16, #tpu.memory_space<vmem>>, %arg5: memref<1x64xf32, #tpu.memory_space<vmem>>, %arg6: memref<64x32xbf16, #tpu.memory_space<vmem>>, %arg7: memref<1x32xf32, #tpu.memory_space<vmem>>, %arg8: memref<1x32xf32, #tpu.memory_space<vmem>>, %arg9: memref<1x32xf32, #tpu.memory_space<vmem>>, %arg10: memref<32x96xbf16, #tpu.memory_space<vmem>>, %arg11: memref<1x96xf32, #tpu.memory_space<vmem>>, %arg12: memref<4x8x32xbf16, #tpu.memory_space<vmem>>, %arg13: memref<1x32xf32, #tpu.memory_space<vmem>>, %arg14: memref<1x32xf32, #tpu.memory_space<vmem>>, %arg15: memref<1x32xf32, #tpu.memory_space<vmem>>, %arg16: memref<32x32xbf16, #tpu.memory_space<vmem>>, %arg17: memref<32x32xbf16, #tpu.memory_space<vmem>>, %arg18: memref<3x32xf32, #tpu.memory_space<vmem>>, %arg19: memref<1x32xf32, #tpu.memory_space<vmem>>, %arg20: memref<1x32xf32, #tpu.memory_space<vmem>>, %arg21: memref<1x32xf32, #tpu.memory_space<vmem>>, %arg22: memref<1x32xf32, #tpu.memory_space<vmem>>, %arg23: memref<32x32xbf16, #tpu.memory_space<vmem>>, %arg24: memref<1x32xf32, #tpu.memory_space<vmem>>, %arg25: memref<1x32xf32, #tpu.memory_space<vmem>>, %arg26: memref<32x64xbf16, #tpu.memory_space<vmem>>, %arg27: memref<1x64xf32, #tpu.memory_space<vmem>>, %arg28: memref<64x32xbf16, #tpu.memory_space<vmem>>, %arg29: memref<1x32xf32, #tpu.memory_space<vmem>>, %arg30: memref<1x32xf32, #tpu.memory_space<vmem>>, %arg31: memref<1x32xf32, #tpu.memory_space<vmem>>, %arg32: memref<1x8x32xf32, #tpu.memory_space<vmem>>, %arg33: memref<12x8x8xf32, #tpu.memory_space<vmem>>, %arg34: memref<8x32xf32, #tpu.memory_space<vmem>>) attributes {dimension_semantics = [#tpu.dimension_semantics<parallel>], iteration_bounds = array<i64: 2>, scalar_prefetch = 0 : i64, scratch_operands = 2 : i64, tpu.core_type = #tpu.core_type<tc>, window_params = [{transform_indices = @transform_0, window_bounds = array<i64: 1, 8, 32>}, {pipeline_mode = #tpu.pipeline_mode<synchronous>, transform_indices = @transform_1, window_bounds = array<i64: 1, 32>}, {pipeline_mode = #tpu.pipeline_mode<synchronous>, transform_indices = @transform_2, window_bounds = array<i64: 1, 32>}, {pipeline_mode = #tpu.pipeline_mode<synchronous>, transform_indices = @transform_3, window_bounds = array<i64: 32, 64>}, {pipeline_mode = #tpu.pipeline_mode<synchronous>, transform_indices = @transform_4, window_bounds = array<i64: 1, 64>}, {pipeline_mode = #tpu.pipeline_mode<synchronous>, transform_indices = @transform_5, window_bounds = array<i64: 64, 32>}, {pipeline_mode = #tpu.pipeline_mode<synchronous>, transform_indices = @transform_6, window_bounds = array<i64: 1, 32>}, {pipeline_mode = #tpu.pipeline_mode<synchronous>, transform_indices = @transform_7, window_bounds = array<i64: 1, 32>}, {pipeline_mode = #tpu.pipeline_mode<synchronous>, transform_indices = @transform_8, window_bounds = array<i64: 1, 32>}, {pipeline_mode = #tpu.pipeline_mode<synchronous>, transform_indices = @transform_9, window_bounds = array<i64: 32, 96>}, {pipeline_mode = #tpu.pipeline_mode<synchronous>, transform_indices = @transform_10, window_bounds = array<i64: 1, 96>}, {pipeline_mode = #tpu.pipeline_mode<synchronous>, transform_indices = @transform_11, window_bounds = array<i64: 4, 8, 32>}, {pipeline_mode = #tpu.pipeline_mode<synchronous>, transform_indices = @transform_12, window_bounds = array<i64: 1, 32>}, {pipeline_mode = #tpu.pipeline_mode<synchronous>, transform_indices = @transform_13, window_bounds = array<i64: 1, 32>}, {pipeline_mode = #tpu.pipeline_mode<synchronous>, transform_indices = @transform_14, window_bounds = array<i64: 1, 32>}, {pipeline_mode = #tpu.pipeline_mode<synchronous>, transform_indices = @transform_15, window_bounds = array<i64: 32, 32>}, {pipeline_mode = #tpu.pipeline_mode<synchronous>, transform_indices = @transform_16, window_bounds = array<i64: 32, 32>}, {pipeline_mode = #tpu.pipeline_mode<synchronous>, transform_indices = @transform_17, window_bounds = array<i64: 3, 32>}, {pipeline_mode = #tpu.pipeline_mode<synchronous>, transform_indices = @transform_18, window_bounds = array<i64: 1, 32>}, {pipeline_mode = #tpu.pipeline_mode<synchronous>, transform_indices = @transform_19, window_bounds = array<i64: 1, 32>}, {pipeline_mode = #tpu.pipeline_mode<synchronous>, transform_indices = @transform_20, window_bounds = array<i64: 1, 32>}, {pipeline_mode = #tpu.pipeline_mode<synchronous>, transform_indices = @transform_21, window_bounds = array<i64: 1, 32>}, {pipeline_mode = #tpu.pipeline_mode<synchronous>, transform_indices = @transform_22, window_bounds = array<i64: 32, 32>}, {pipeline_mode = #tpu.pipeline_mode<synchronous>, transform_indices = @transform_23, window_bounds = array<i64: 1, 32>}, {pipeline_mode = #tpu.pipeline_mode<synchronous>, transform_indices = @transform_24, window_bounds = array<i64: 1, 32>}, {pipeline_mode = #tpu.pipeline_mode<synchronous>, transform_indices = @transform_25, window_bounds = array<i64: 32, 64>}, {pipeline_mode = #tpu.pipeline_mode<synchronous>, transform_indices = @transform_26, window_bounds = array<i64: 1, 64>}, {pipeline_mode = #tpu.pipeline_mode<synchronous>, transform_indices = @transform_27, window_bounds = array<i64: 64, 32>}, {pipeline_mode = #tpu.pipeline_mode<synchronous>, transform_indices = @transform_28, window_bounds = array<i64: 1, 32>}, {pipeline_mode = #tpu.pipeline_mode<synchronous>, transform_indices = @transform_29, window_bounds = array<i64: 1, 32>}, {pipeline_mode = #tpu.pipeline_mode<synchronous>, transform_indices = @transform_30, window_bounds = array<i64: 1, 32>}, {transform_indices = @transform_31, window_bounds = array<i64: 1, 8, 32>}]} {
    %c0 = arith.constant 0 : index
    %c0_0 = arith.constant 0 : index
    %c0_1 = arith.constant 0 : index
    %0 = vector.load %arg1[%c0, %c0_0, %c0_1] : memref<1x8x32xf32, #tpu.memory_space<vmem>>, vector<1x8x32xf32>
    %1 = vector.shape_cast %0 : vector<1x8x32xf32> to vector<8x32xf32>
    %c0_2 = arith.constant 0 : index
    %c0_3 = arith.constant 0 : index
    %2 = vector.load %arg2[%c0_2, %c0_3] : memref<1x32xf32, #tpu.memory_space<vmem>>, vector<1x32xf32>
    %c0_4 = arith.constant 0 : index
    %c0_5 = arith.constant 0 : index
    %3 = vector.load %arg3[%c0_4, %c0_5] : memref<1x32xf32, #tpu.memory_space<vmem>>, vector<1x32xf32>
    %cst = arith.constant dense<0.000000e+00> : vector<8xf32>
    %4 = vector.multi_reduction <add>, %1, %cst [1] : vector<8x32xf32> to vector<8xf32>
    %5 = vector.shape_cast %4 : vector<8xf32> to vector<8x1xf32>
    %cst_6 = arith.constant 3.200000e+01 : f32
    %6 = vector.broadcast %cst_6 : f32 to vector<8x1xf32>
    %7 = arith.divf %5, %6 : vector<8x1xf32>
    %8 = vector.broadcast %7 : vector<8x1xf32> to vector<8x32xf32>
    %9 = arith.subf %1, %8 : vector<8x32xf32>
    %10 = arith.mulf %9, %9 : vector<8x32xf32>
    %cst_7 = arith.constant dense<0.000000e+00> : vector<8xf32>
    %11 = vector.multi_reduction <add>, %10, %cst_7 [1] : vector<8x32xf32> to vector<8xf32>
    %12 = vector.shape_cast %11 : vector<8xf32> to vector<8x1xf32>
    %cst_8 = arith.constant 3.200000e+01 : f32
    %13 = vector.broadcast %cst_8 : f32 to vector<8x1xf32>
    %14 = arith.divf %12, %13 : vector<8x1xf32>
    %15 = vector.broadcast %7 : vector<8x1xf32> to vector<8x32xf32>
    %16 = arith.subf %1, %15 : vector<8x32xf32>
    %cst_9 = arith.constant 9.99999974E-6 : f32
    %17 = vector.broadcast %cst_9 : f32 to vector<8x1xf32>
    %18 = arith.addf %14, %17 : vector<8x1xf32>
    %19 = math.rsqrt %18 : vector<8x1xf32>
    %20 = vector.broadcast %19 : vector<8x1xf32> to vector<8x32xf32>
    %21 = arith.mulf %16, %20 : vector<8x32xf32>
    %22 = vector.broadcast %2 : vector<1x32xf32> to vector<8x32xf32>
    %23 = arith.mulf %21, %22 : vector<8x32xf32>
    %24 = vector.broadcast %3 : vector<1x32xf32> to vector<8x32xf32>
    %25 = arith.addf %23, %24 : vector<8x32xf32>
    %26 = arith.truncf %25 : vector<8x32xf32> to vector<8x32xbf16>
    %c0_10 = arith.constant 0 : index
    %c0_11 = arith.constant 0 : index
    %27 = vector.load %arg4[%c0_10, %c0_11] : memref<32x64xbf16, #tpu.memory_space<vmem>>, vector<32x64xbf16>
    %cst_12 = arith.constant dense<0.000000e+00> : vector<8x64xf32>
    %28 = tpu.matmul %26, %27, %cst_12 {dimension_numbers = #tpu.dot_dimension_numbers<[1], [0], [0], [1], [0, 0, 1, 1], [], []>} : vector<8x32xbf16>, vector<32x64xbf16>, vector<8x64xf32> -> vector<8x64xf32>
    %c0_13 = arith.constant 0 : index
    %c0_14 = arith.constant 0 : index
    %29 = vector.load %arg5[%c0_13, %c0_14] : memref<1x64xf32, #tpu.memory_space<vmem>>, vector<1x64xf32>
    %30 = vector.broadcast %29 : vector<1x64xf32> to vector<8x64xf32>
    %31 = arith.addf %28, %30 : vector<8x64xf32>
    %cst_15 = arith.constant 5.000000e-01 : f32
    %32 = vector.broadcast %cst_15 : f32 to vector<8x64xf32>
    %33 = arith.mulf %32, %31 : vector<8x64xf32>
    %cst_16 = arith.constant 0.707106769 : f32
    %34 = vector.broadcast %cst_16 : f32 to vector<8x64xf32>
    %35 = arith.mulf %31, %34 : vector<8x64xf32>
    %36 = math.erf %35 : vector<8x64xf32>
    %cst_17 = arith.constant 1.000000e+00 : f32
    %37 = vector.broadcast %cst_17 : f32 to vector<8x64xf32>
    %38 = arith.addf %37, %36 : vector<8x64xf32>
    %39 = arith.mulf %33, %38 : vector<8x64xf32>
    %40 = arith.truncf %39 : vector<8x64xf32> to vector<8x64xbf16>
    %c0_18 = arith.constant 0 : index
    %c0_19 = arith.constant 0 : index
    %41 = vector.load %arg6[%c0_18, %c0_19] : memref<64x32xbf16, #tpu.memory_space<vmem>>, vector<64x32xbf16>
    %cst_20 = arith.constant dense<0.000000e+00> : vector<8x32xf32>
    %42 = tpu.matmul %40, %41, %cst_20 {dimension_numbers = #tpu.dot_dimension_numbers<[1], [0], [0], [1], [0, 0, 1, 1], [], []>} : vector<8x64xbf16>, vector<64x32xbf16>, vector<8x32xf32> -> vector<8x32xf32>
    %c0_21 = arith.constant 0 : index
    %c0_22 = arith.constant 0 : index
    %43 = vector.load %arg7[%c0_21, %c0_22] : memref<1x32xf32, #tpu.memory_space<vmem>>, vector<1x32xf32>
    %44 = vector.broadcast %43 : vector<1x32xf32> to vector<8x32xf32>
    %45 = arith.addf %42, %44 : vector<8x32xf32>
    %cst_23 = arith.constant 5.000000e-01 : f32
    %46 = vector.broadcast %cst_23 : f32 to vector<8x32xf32>
    %47 = arith.mulf %46, %45 : vector<8x32xf32>
    %48 = arith.addf %47, %1 : vector<8x32xf32>
    %c0_24 = arith.constant 0 : index
    %c0_25 = arith.constant 0 : index
    %49 = vector.load %arg8[%c0_24, %c0_25] : memref<1x32xf32, #tpu.memory_space<vmem>>, vector<1x32xf32>
    %c0_26 = arith.constant 0 : index
    %c0_27 = arith.constant 0 : index
    %50 = vector.load %arg9[%c0_26, %c0_27] : memref<1x32xf32, #tpu.memory_space<vmem>>, vector<1x32xf32>
    %cst_28 = arith.constant dense<0.000000e+00> : vector<8xf32>
    %51 = vector.multi_reduction <add>, %48, %cst_28 [1] : vector<8x32xf32> to vector<8xf32>
    %52 = vector.shape_cast %51 : vector<8xf32> to vector<8x1xf32>
    %cst_29 = arith.constant 3.200000e+01 : f32
    %53 = vector.broadcast %cst_29 : f32 to vector<8x1xf32>
    %54 = arith.divf %52, %53 : vector<8x1xf32>
    %55 = vector.broadcast %54 : vector<8x1xf32> to vector<8x32xf32>
    %56 = arith.subf %48, %55 : vector<8x32xf32>
    %57 = arith.mulf %56, %56 : vector<8x32xf32>
    %cst_30 = arith.constant dense<0.000000e+00> : vector<8xf32>
    %58 = vector.multi_reduction <add>, %57, %cst_30 [1] : vector<8x32xf32> to vector<8xf32>
    %59 = vector.shape_cast %58 : vector<8xf32> to vector<8x1xf32>
    %cst_31 = arith.constant 3.200000e+01 : f32
    %60 = vector.broadcast %cst_31 : f32 to vector<8x1xf32>
    %61 = arith.divf %59, %60 : vector<8x1xf32>
    %62 = vector.broadcast %54 : vector<8x1xf32> to vector<8x32xf32>
    %63 = arith.subf %48, %62 : vector<8x32xf32>
    %cst_32 = arith.constant 9.99999974E-6 : f32
    %64 = vector.broadcast %cst_32 : f32 to vector<8x1xf32>
    %65 = arith.addf %61, %64 : vector<8x1xf32>
    %66 = math.rsqrt %65 : vector<8x1xf32>
    %67 = vector.broadcast %66 : vector<8x1xf32> to vector<8x32xf32>
    %68 = arith.mulf %63, %67 : vector<8x32xf32>
    %69 = vector.broadcast %49 : vector<1x32xf32> to vector<8x32xf32>
    %70 = arith.mulf %68, %69 : vector<8x32xf32>
    %71 = vector.broadcast %50 : vector<1x32xf32> to vector<8x32xf32>
    %72 = arith.addf %70, %71 : vector<8x32xf32>
    %73 = arith.truncf %72 : vector<8x32xf32> to vector<8x32xbf16>
    %c0_33 = arith.constant 0 : index
    %c0_34 = arith.constant 0 : index
    %74 = vector.load %arg10[%c0_33, %c0_34] : memref<32x96xbf16, #tpu.memory_space<vmem>>, vector<32x96xbf16>
    %cst_35 = arith.constant dense<0.000000e+00> : vector<8x96xf32>
    %75 = tpu.matmul %73, %74, %cst_35 {dimension_numbers = #tpu.dot_dimension_numbers<[1], [0], [0], [1], [0, 0, 1, 1], [], []>} : vector<8x32xbf16>, vector<32x96xbf16>, vector<8x96xf32> -> vector<8x96xf32>
    %c0_36 = arith.constant 0 : index
    %c0_37 = arith.constant 0 : index
    %76 = vector.load %arg11[%c0_36, %c0_37] : memref<1x96xf32, #tpu.memory_space<vmem>>, vector<1x96xf32>
    %77 = vector.broadcast %76 : vector<1x96xf32> to vector<8x96xf32>
    %78 = arith.addf %75, %77 : vector<8x96xf32>
    %79 = vector.extract_strided_slice %78 {offsets = [0, 0], sizes = [8, 8], strides = [1, 1]} : vector<8x96xf32> to vector<8x8xf32>
    %c0_38 = arith.constant 0 : index
    %c0_39 = arith.constant 0 : index
    %c0_40 = arith.constant 0 : index
    %80 = vector.load %arg33[%c0_38, %c0_39, %c0_40] : memref<12x8x8xf32, #tpu.memory_space<vmem>>, vector<1x8x8xf32>
    %81 = vector.shape_cast %80 : vector<1x8x8xf32> to vector<8x8xf32>
    %82 = vector.shape_cast %79 : vector<8x8xf32> to vector<1x8x8xf32>
    tpu.vector_store %arg33[%c0_38, %c0_39, %c0_40], %82 {strides = array<i32>} : memref<12x8x8xf32, #tpu.memory_space<vmem>>, vector<1x8x8xf32>,
    %83 = vector.extract_strided_slice %78 {offsets = [0, 8], sizes = [8, 8], strides = [1, 1]} : vector<8x96xf32> to vector<8x8xf32>
    %c1 = arith.constant 1 : index
    %c0_41 = arith.constant 0 : index
    %c0_42 = arith.constant 0 : index
    %84 = vector.load %arg33[%c1, %c0_41, %c0_42] : memref<12x8x8xf32, #tpu.memory_space<vmem>>, vector<1x8x8xf32>
    %85 = vector.shape_cast %84 : vector<1x8x8xf32> to vector<8x8xf32>
    %86 = vector.shape_cast %83 : vector<8x8xf32> to vector<1x8x8xf32>
    tpu.vector_store %arg33[%c1, %c0_41, %c0_42], %86 {strides = array<i32>} : memref<12x8x8xf32, #tpu.memory_space<vmem>>, vector<1x8x8xf32>,
    %87 = vector.extract_strided_slice %78 {offsets = [0, 16], sizes = [8, 8], strides = [1, 1]} : vector<8x96xf32> to vector<8x8xf32>
    %c2 = arith.constant 2 : index
    %c0_43 = arith.constant 0 : index
    %c0_44 = arith.constant 0 : index
    %88 = vector.load %arg33[%c2, %c0_43, %c0_44] : memref<12x8x8xf32, #tpu.memory_space<vmem>>, vector<1x8x8xf32>
    %89 = vector.shape_cast %88 : vector<1x8x8xf32> to vector<8x8xf32>
    %90 = vector.shape_cast %87 : vector<8x8xf32> to vector<1x8x8xf32>
    tpu.vector_store %arg33[%c2, %c0_43, %c0_44], %90 {strides = array<i32>} : memref<12x8x8xf32, #tpu.memory_space<vmem>>, vector<1x8x8xf32>,
    %91 = vector.extract_strided_slice %78 {offsets = [0, 24], sizes = [8, 8], strides = [1, 1]} : vector<8x96xf32> to vector<8x8xf32>
    %c3 = arith.constant 3 : index
    %c0_45 = arith.constant 0 : index
    %c0_46 = arith.constant 0 : index
    %92 = vector.load %arg33[%c3, %c0_45, %c0_46] : memref<12x8x8xf32, #tpu.memory_space<vmem>>, vector<1x8x8xf32>
    %93 = vector.shape_cast %92 : vector<1x8x8xf32> to vector<8x8xf32>
    %94 = vector.shape_cast %91 : vector<8x8xf32> to vector<1x8x8xf32>
    tpu.vector_store %arg33[%c3, %c0_45, %c0_46], %94 {strides = array<i32>} : memref<12x8x8xf32, #tpu.memory_space<vmem>>, vector<1x8x8xf32>,
    %95 = vector.extract_strided_slice %78 {offsets = [0, 32], sizes = [8, 8], strides = [1, 1]} : vector<8x96xf32> to vector<8x8xf32>
    %c4 = arith.constant 4 : index
    %c0_47 = arith.constant 0 : index
    %c0_48 = arith.constant 0 : index
    %96 = vector.load %arg33[%c4, %c0_47, %c0_48] : memref<12x8x8xf32, #tpu.memory_space<vmem>>, vector<1x8x8xf32>
    %97 = vector.shape_cast %96 : vector<1x8x8xf32> to vector<8x8xf32>
    %98 = vector.shape_cast %95 : vector<8x8xf32> to vector<1x8x8xf32>
    tpu.vector_store %arg33[%c4, %c0_47, %c0_48], %98 {strides = array<i32>} : memref<12x8x8xf32, #tpu.memory_space<vmem>>, vector<1x8x8xf32>,
    %99 = vector.extract_strided_slice %78 {offsets = [0, 40], sizes = [8, 8], strides = [1, 1]} : vector<8x96xf32> to vector<8x8xf32>
    %c5 = arith.constant 5 : index
    %c0_49 = arith.constant 0 : index
    %c0_50 = arith.constant 0 : index
    %100 = vector.load %arg33[%c5, %c0_49, %c0_50] : memref<12x8x8xf32, #tpu.memory_space<vmem>>, vector<1x8x8xf32>
    %101 = vector.shape_cast %100 : vector<1x8x8xf32> to vector<8x8xf32>
    %102 = vector.shape_cast %99 : vector<8x8xf32> to vector<1x8x8xf32>
    tpu.vector_store %arg33[%c5, %c0_49, %c0_50], %102 {strides = array<i32>} : memref<12x8x8xf32, #tpu.memory_space<vmem>>, vector<1x8x8xf32>,
    %103 = vector.extract_strided_slice %78 {offsets = [0, 48], sizes = [8, 8], strides = [1, 1]} : vector<8x96xf32> to vector<8x8xf32>
    %c6 = arith.constant 6 : index
    %c0_51 = arith.constant 0 : index
    %c0_52 = arith.constant 0 : index
    %104 = vector.load %arg33[%c6, %c0_51, %c0_52] : memref<12x8x8xf32, #tpu.memory_space<vmem>>, vector<1x8x8xf32>
    %105 = vector.shape_cast %104 : vector<1x8x8xf32> to vector<8x8xf32>
    %106 = vector.shape_cast %103 : vector<8x8xf32> to vector<1x8x8xf32>
    tpu.vector_store %arg33[%c6, %c0_51, %c0_52], %106 {strides = array<i32>} : memref<12x8x8xf32, #tpu.memory_space<vmem>>, vector<1x8x8xf32>,
    %107 = vector.extract_strided_slice %78 {offsets = [0, 56], sizes = [8, 8], strides = [1, 1]} : vector<8x96xf32> to vector<8x8xf32>
    %c7 = arith.constant 7 : index
    %c0_53 = arith.constant 0 : index
    %c0_54 = arith.constant 0 : index
    %108 = vector.load %arg33[%c7, %c0_53, %c0_54] : memref<12x8x8xf32, #tpu.memory_space<vmem>>, vector<1x8x8xf32>
    %109 = vector.shape_cast %108 : vector<1x8x8xf32> to vector<8x8xf32>
    %110 = vector.shape_cast %107 : vector<8x8xf32> to vector<1x8x8xf32>
    tpu.vector_store %arg33[%c7, %c0_53, %c0_54], %110 {strides = array<i32>} : memref<12x8x8xf32, #tpu.memory_space<vmem>>, vector<1x8x8xf32>,
    %111 = vector.extract_strided_slice %78 {offsets = [0, 64], sizes = [8, 8], strides = [1, 1]} : vector<8x96xf32> to vector<8x8xf32>
    %c8 = arith.constant 8 : index
    %c0_55 = arith.constant 0 : index
    %c0_56 = arith.constant 0 : index
    %112 = vector.load %arg33[%c8, %c0_55, %c0_56] : memref<12x8x8xf32, #tpu.memory_space<vmem>>, vector<1x8x8xf32>
    %113 = vector.shape_cast %112 : vector<1x8x8xf32> to vector<8x8xf32>
    %114 = vector.shape_cast %111 : vector<8x8xf32> to vector<1x8x8xf32>
    tpu.vector_store %arg33[%c8, %c0_55, %c0_56], %114 {strides = array<i32>} : memref<12x8x8xf32, #tpu.memory_space<vmem>>, vector<1x8x8xf32>,
    %115 = vector.extract_strided_slice %78 {offsets = [0, 72], sizes = [8, 8], strides = [1, 1]} : vector<8x96xf32> to vector<8x8xf32>
    %c9 = arith.constant 9 : index
    %c0_57 = arith.constant 0 : index
    %c0_58 = arith.constant 0 : index
    %116 = vector.load %arg33[%c9, %c0_57, %c0_58] : memref<12x8x8xf32, #tpu.memory_space<vmem>>, vector<1x8x8xf32>
    %117 = vector.shape_cast %116 : vector<1x8x8xf32> to vector<8x8xf32>
    %118 = vector.shape_cast %115 : vector<8x8xf32> to vector<1x8x8xf32>
    tpu.vector_store %arg33[%c9, %c0_57, %c0_58], %118 {strides = array<i32>} : memref<12x8x8xf32, #tpu.memory_space<vmem>>, vector<1x8x8xf32>,
    %119 = vector.extract_strided_slice %78 {offsets = [0, 80], sizes = [8, 8], strides = [1, 1]} : vector<8x96xf32> to vector<8x8xf32>
    %c10 = arith.constant 10 : index
    %c0_59 = arith.constant 0 : index
    %c0_60 = arith.constant 0 : index
    %120 = vector.load %arg33[%c10, %c0_59, %c0_60] : memref<12x8x8xf32, #tpu.memory_space<vmem>>, vector<1x8x8xf32>
    %121 = vector.shape_cast %120 : vector<1x8x8xf32> to vector<8x8xf32>
    %122 = vector.shape_cast %119 : vector<8x8xf32> to vector<1x8x8xf32>
    tpu.vector_store %arg33[%c10, %c0_59, %c0_60], %122 {strides = array<i32>} : memref<12x8x8xf32, #tpu.memory_space<vmem>>, vector<1x8x8xf32>,
    %123 = vector.extract_strided_slice %78 {offsets = [0, 88], sizes = [8, 8], strides = [1, 1]} : vector<8x96xf32> to vector<8x8xf32>
    %c11 = arith.constant 11 : index
    %c0_61 = arith.constant 0 : index
    %c0_62 = arith.constant 0 : index
    %124 = vector.load %arg33[%c11, %c0_61, %c0_62] : memref<12x8x8xf32, #tpu.memory_space<vmem>>, vector<1x8x8xf32>
    %125 = vector.shape_cast %124 : vector<1x8x8xf32> to vector<8x8xf32>
    %126 = vector.shape_cast %123 : vector<8x8xf32> to vector<1x8x8xf32>
    tpu.vector_store %arg33[%c11, %c0_61, %c0_62], %126 {strides = array<i32>} : memref<12x8x8xf32, #tpu.memory_space<vmem>>, vector<1x8x8xf32>,
    %cst_63 = arith.constant 0.000000e+00 : f32
    %127 = vector.broadcast %cst_63 : f32 to vector<8x32xf32>
    %c0_64 = arith.constant 0 : index
    %c0_65 = arith.constant 0 : index
    %128 = vector.load %arg34[%c0_64, %c0_65] : memref<8x32xf32, #tpu.memory_space<vmem>>, vector<8x32xf32>
    tpu.vector_store %arg34[%c0_64, %c0_65], %127 {strides = array<i32>} : memref<8x32xf32, #tpu.memory_space<vmem>>, vector<8x32xf32>,
    %c0_i32 = arith.constant 0 : i32
    %c4_i32 = arith.constant 4 : i32
    %129 = arith.addi %c0_i32, %c4_i32 : i32
    %c1_i32 = arith.constant 1 : i32
    scf.for %arg35 = %c0_i32 to %129 step %c1_i32  : i32 {
      %310 = arith.index_cast %arg35 : i32 to index
      %c0_144 = arith.constant 0 : index
      %c0_145 = arith.constant 0 : index
      %311 = vector.load %arg33[%310, %c0_144, %c0_145] : memref<12x8x8xf32, #tpu.memory_space<vmem>>, vector<1x8x8xf32>
      %312 = vector.shape_cast %311 : vector<1x8x8xf32> to vector<8x8xf32>
      %cst_146 = arith.constant 0.353553385 : f32
      %313 = vector.broadcast %cst_146 : f32 to vector<8x8xf32>
      %314 = arith.mulf %312, %313 : vector<8x8xf32>
      %315 = arith.truncf %314 : vector<8x8xf32> to vector<8x8xbf16>
      %c4_i32_147 = arith.constant 4 : i32
      %316 = arith.addi %c4_i32_147, %arg35 : i32
      %317 = arith.index_cast %316 : i32 to index
      %c0_148 = arith.constant 0 : index
      %c0_149 = arith.constant 0 : index
      %318 = vector.load %arg33[%317, %c0_148, %c0_149] : memref<12x8x8xf32, #tpu.memory_space<vmem>>, vector<1x8x8xf32>
      %319 = vector.shape_cast %318 : vector<1x8x8xf32> to vector<8x8xf32>
      %320 = arith.truncf %319 : vector<8x8xf32> to vector<8x8xbf16>
      %c8_i32_150 = arith.constant 8 : i32
      %321 = arith.addi %c8_i32_150, %arg35 : i32
      %322 = arith.index_cast %321 : i32 to index
      %c0_151 = arith.constant 0 : index
      %c0_152 = arith.constant 0 : index
      %323 = vector.load %arg33[%322, %c0_151, %c0_152] : memref<12x8x8xf32, #tpu.memory_space<vmem>>, vector<1x8x8xf32>
      %324 = vector.shape_cast %323 : vector<1x8x8xf32> to vector<8x8xf32>
      %325 = arith.truncf %324 : vector<8x8xf32> to vector<8x8xbf16>
      %cst_153 = arith.constant dense<0.000000e+00> : vector<8x8xf32>
      %326 = tpu.matmul %315, %320, %cst_153 {dimension_numbers = #tpu.dot_dimension_numbers<[1], [1], [0], [0], [0, 0, 1, 0], [], []>} : vector<8x8xbf16>, vector<8x8xbf16>, vector<8x8xf32> -> vector<8x8xf32>
      %cst_154 = arith.constant dense<0xFF800000> : vector<8xf32>
      %327 = vector.multi_reduction <maximumf>, %326, %cst_154 [1] : vector<8x8xf32> to vector<8xf32>
      %328 = vector.shape_cast %327 : vector<8xf32> to vector<8x1xf32>
      %329 = vector.broadcast %328 : vector<8x1xf32> to vector<8x8xf32>
      %330 = arith.subf %326, %329 : vector<8x8xf32>
      %331 = math.exp %330 : vector<8x8xf32>
      %cst_155 = arith.constant dense<0.000000e+00> : vector<8xf32>
      %332 = vector.multi_reduction <add>, %331, %cst_155 [1] : vector<8x8xf32> to vector<8xf32>
      %333 = vector.shape_cast %332 : vector<8xf32> to vector<8x1xf32>
      %334 = tpu.reciprocal %333 {approx = true} : vector<8x1xf32> -> vector<8x1xf32>
      %335 = vector.broadcast %334 : vector<8x1xf32> to vector<8x8xf32>
      %336 = arith.mulf %331, %335 : vector<8x8xf32>
      %337 = arith.truncf %336 : vector<8x8xf32> to vector<8x8xbf16>
      %cst_156 = arith.constant dense<0.000000e+00> : vector<8x8xf32>
      %338 = tpu.matmul %337, %325, %cst_156 {dimension_numbers = #tpu.dot_dimension_numbers<[1], [0], [0], [1], [0, 0, 1, 1], [], []>} : vector<8x8xbf16>, vector<8x8xbf16>, vector<8x8xf32> -> vector<8x8xf32>
      %c0_157 = arith.constant 0 : index
      %c0_158 = arith.constant 0 : index
      %339 = vector.load %arg34[%c0_157, %c0_158] : memref<8x32xf32, #tpu.memory_space<vmem>>, vector<8x32xf32>
      %340 = arith.truncf %338 : vector<8x8xf32> to vector<8x8xbf16>
      %341 = arith.index_cast %arg35 : i32 to index
      %c0_159 = arith.constant 0 : index
      %c0_160 = arith.constant 0 : index
      %342 = vector.load %arg12[%341, %c0_159, %c0_160] : memref<4x8x32xbf16, #tpu.memory_space<vmem>>, vector<1x8x32xbf16>
      %343 = vector.shape_cast %342 : vector<1x8x32xbf16> to vector<8x32xbf16>
      %cst_161 = arith.constant dense<0.000000e+00> : vector<8x32xf32>
      %344 = tpu.matmul %340, %343, %cst_161 {dimension_numbers = #tpu.dot_dimension_numbers<[1], [0], [0], [1], [0, 0, 1, 1], [], []>} : vector<8x8xbf16>, vector<8x32xbf16>, vector<8x32xf32> -> vector<8x32xf32>
      %345 = arith.addf %339, %344 : vector<8x32xf32>
      %c0_162 = arith.constant 0 : index
      %c0_163 = arith.constant 0 : index
      %346 = vector.load %arg34[%c0_162, %c0_163] : memref<8x32xf32, #tpu.memory_space<vmem>>, vector<8x32xf32>
      tpu.vector_store %arg34[%c0_162, %c0_163], %345 {strides = array<i32>} : memref<8x32xf32, #tpu.memory_space<vmem>>, vector<8x32xf32>,
    }
    %c4_i32_66 = arith.constant 4 : i32
    %c0_67 = arith.constant 0 : index
    %c0_68 = arith.constant 0 : index
    %130 = vector.load %arg34[%c0_67, %c0_68] : memref<8x32xf32, #tpu.memory_space<vmem>>, vector<8x32xf32>
    %c0_69 = arith.constant 0 : index
    %c0_70 = arith.constant 0 : index
    %131 = vector.load %arg13[%c0_69, %c0_70] : memref<1x32xf32, #tpu.memory_space<vmem>>, vector<1x32xf32>
    %132 = vector.broadcast %131 : vector<1x32xf32> to vector<8x32xf32>
    %133 = arith.addf %130, %132 : vector<8x32xf32>
    %134 = arith.addf %133, %48 : vector<8x32xf32>
    %c0_71 = arith.constant 0 : index
    %c0_72 = arith.constant 0 : index
    %135 = vector.load %arg14[%c0_71, %c0_72] : memref<1x32xf32, #tpu.memory_space<vmem>>, vector<1x32xf32>
    %c0_73 = arith.constant 0 : index
    %c0_74 = arith.constant 0 : index
    %136 = vector.load %arg15[%c0_73, %c0_74] : memref<1x32xf32, #tpu.memory_space<vmem>>, vector<1x32xf32>
    %cst_75 = arith.constant dense<0.000000e+00> : vector<8xf32>
    %137 = vector.multi_reduction <add>, %134, %cst_75 [1] : vector<8x32xf32> to vector<8xf32>
    %138 = vector.shape_cast %137 : vector<8xf32> to vector<8x1xf32>
    %cst_76 = arith.constant 3.200000e+01 : f32
    %139 = vector.broadcast %cst_76 : f32 to vector<8x1xf32>
    %140 = arith.divf %138, %139 : vector<8x1xf32>
    %141 = vector.broadcast %140 : vector<8x1xf32> to vector<8x32xf32>
    %142 = arith.subf %134, %141 : vector<8x32xf32>
    %143 = arith.mulf %142, %142 : vector<8x32xf32>
    %cst_77 = arith.constant dense<0.000000e+00> : vector<8xf32>
    %144 = vector.multi_reduction <add>, %143, %cst_77 [1] : vector<8x32xf32> to vector<8xf32>
    %145 = vector.shape_cast %144 : vector<8xf32> to vector<8x1xf32>
    %cst_78 = arith.constant 3.200000e+01 : f32
    %146 = vector.broadcast %cst_78 : f32 to vector<8x1xf32>
    %147 = arith.divf %145, %146 : vector<8x1xf32>
    %148 = vector.broadcast %140 : vector<8x1xf32> to vector<8x32xf32>
    %149 = arith.subf %134, %148 : vector<8x32xf32>
    %cst_79 = arith.constant 9.99999974E-6 : f32
    %150 = vector.broadcast %cst_79 : f32 to vector<8x1xf32>
    %151 = arith.addf %147, %150 : vector<8x1xf32>
    %152 = math.rsqrt %151 : vector<8x1xf32>
    %153 = vector.broadcast %152 : vector<8x1xf32> to vector<8x32xf32>
    %154 = arith.mulf %149, %153 : vector<8x32xf32>
    %155 = vector.broadcast %135 : vector<1x32xf32> to vector<8x32xf32>
    %156 = arith.mulf %154, %155 : vector<8x32xf32>
    %157 = vector.broadcast %136 : vector<1x32xf32> to vector<8x32xf32>
    %158 = arith.addf %156, %157 : vector<8x32xf32>
    %159 = arith.truncf %158 : vector<8x32xf32> to vector<8x32xbf16>
    %c0_80 = arith.constant 0 : index
    %c0_81 = arith.constant 0 : index
    %160 = vector.load %arg16[%c0_80, %c0_81] : memref<32x32xbf16, #tpu.memory_space<vmem>>, vector<32x32xbf16>
    %cst_82 = arith.constant dense<0.000000e+00> : vector<8x32xf32>
    %161 = tpu.matmul %159, %160, %cst_82 {dimension_numbers = #tpu.dot_dimension_numbers<[1], [0], [0], [1], [0, 0, 1, 1], [], []>} : vector<8x32xbf16>, vector<32x32xbf16>, vector<8x32xf32> -> vector<8x32xf32>
    %c0_83 = arith.constant 0 : index
    %c0_84 = arith.constant 0 : index
    %162 = vector.load %arg17[%c0_83, %c0_84] : memref<32x32xbf16, #tpu.memory_space<vmem>>, vector<32x32xbf16>
    %cst_85 = arith.constant dense<0.000000e+00> : vector<8x32xf32>
    %163 = tpu.matmul %159, %162, %cst_85 {dimension_numbers = #tpu.dot_dimension_numbers<[1], [0], [0], [1], [0, 0, 1, 1], [], []>} : vector<8x32xbf16>, vector<32x32xbf16>, vector<8x32xf32> -> vector<8x32xf32>
    %164 = arith.negf %163 : vector<8x32xf32>
    %165 = math.exp %164 : vector<8x32xf32>
    %cst_86 = arith.constant 1.000000e+00 : f32
    %166 = vector.broadcast %cst_86 : f32 to vector<8x32xf32>
    %167 = arith.addf %166, %165 : vector<8x32xf32>
    %168 = arith.divf %166, %167 : vector<8x32xf32>
    %169 = arith.mulf %161, %168 : vector<8x32xf32>
    %c0_87 = arith.constant 0 : index
    %c0_88 = arith.constant 0 : index
    %170 = vector.load %arg18[%c0_87, %c0_88] : memref<3x32xf32, #tpu.memory_space<vmem>>, vector<3x32xf32>
    %171 = vector.extract_strided_slice %170 {offsets = [1, 0], sizes = [1, 32], strides = [1, 1]} : vector<3x32xf32> to vector<1x32xf32>
    %172 = vector.broadcast %171 : vector<1x32xf32> to vector<8x32xf32>
    %173 = arith.mulf %169, %172 : vector<8x32xf32>
    %174 = tpu.iota {dimensions = array<i32: 0>} : vector<8x1xi32>
    %c1_i32_89 = arith.constant 1 : i32
    %175 = tpu.dynamic_rotate %169 by %c1_i32_89 dim 0 : vector<8x32xf32>, i32 -> vector<8x32xf32>
    %c-1_i32 = arith.constant -1 : i32
    %176 = vector.broadcast %c-1_i32 : i32 to vector<8x1xi32>
    %177 = arith.addi %174, %176 : vector<8x1xi32>
    %c0_i32_90 = arith.constant 0 : i32
    %178 = vector.broadcast %c0_i32_90 : i32 to vector<8x1xi32>
    %179 = arith.cmpi sge, %177, %178 : vector<8x1xi32>
    %c-1_i32_91 = arith.constant -1 : i32
    %180 = vector.broadcast %c-1_i32_91 : i32 to vector<8x1xi32>
    %181 = arith.addi %174, %180 : vector<8x1xi32>
    %c8_i32 = arith.constant 8 : i32
    %182 = vector.broadcast %c8_i32 : i32 to vector<8x1xi32>
    %183 = arith.cmpi slt, %181, %182 : vector<8x1xi32>
    %184 = arith.andi %179, %183 : vector<8x1xi1>
    %185 = arith.extui %184 : vector<8x1xi1> to vector<8x1xi32>
    %186 = arith.sitofp %185 : vector<8x1xi32> to vector<8x1xf32>
    %187 = vector.broadcast %186 : vector<8x1xf32> to vector<8x32xf32>
    %188 = arith.mulf %175, %187 : vector<8x32xf32>
    %189 = vector.extract_strided_slice %170 {offsets = [0, 0], sizes = [1, 32], strides = [1, 1]} : vector<3x32xf32> to vector<1x32xf32>
    %190 = vector.broadcast %189 : vector<1x32xf32> to vector<8x32xf32>
    %191 = arith.mulf %188, %190 : vector<8x32xf32>
    %192 = arith.addf %173, %191 : vector<8x32xf32>
    %c7_i32 = arith.constant 7 : i32
    %193 = tpu.dynamic_rotate %169 by %c7_i32 dim 0 : vector<8x32xf32>, i32 -> vector<8x32xf32>
    %c1_i32_92 = arith.constant 1 : i32
    %194 = vector.broadcast %c1_i32_92 : i32 to vector<8x1xi32>
    %195 = arith.addi %174, %194 : vector<8x1xi32>
    %c0_i32_93 = arith.constant 0 : i32
    %196 = vector.broadcast %c0_i32_93 : i32 to vector<8x1xi32>
    %197 = arith.cmpi sge, %195, %196 : vector<8x1xi32>
    %c1_i32_94 = arith.constant 1 : i32
    %198 = vector.broadcast %c1_i32_94 : i32 to vector<8x1xi32>
    %199 = arith.addi %174, %198 : vector<8x1xi32>
    %c8_i32_95 = arith.constant 8 : i32
    %200 = vector.broadcast %c8_i32_95 : i32 to vector<8x1xi32>
    %201 = arith.cmpi slt, %199, %200 : vector<8x1xi32>
    %202 = arith.andi %197, %201 : vector<8x1xi1>
    %203 = arith.extui %202 : vector<8x1xi1> to vector<8x1xi32>
    %204 = arith.sitofp %203 : vector<8x1xi32> to vector<8x1xf32>
    %205 = vector.broadcast %204 : vector<8x1xf32> to vector<8x32xf32>
    %206 = arith.mulf %193, %205 : vector<8x32xf32>
    %207 = vector.extract_strided_slice %170 {offsets = [2, 0], sizes = [1, 32], strides = [1, 1]} : vector<3x32xf32> to vector<1x32xf32>
    %208 = vector.broadcast %207 : vector<1x32xf32> to vector<8x32xf32>
    %209 = arith.mulf %206, %208 : vector<8x32xf32>
    %210 = arith.addf %192, %209 : vector<8x32xf32>
    %c0_96 = arith.constant 0 : index
    %c0_97 = arith.constant 0 : index
    %211 = vector.load %arg21[%c0_96, %c0_97] : memref<1x32xf32, #tpu.memory_space<vmem>>, vector<1x32xf32>
    %212 = vector.broadcast %211 : vector<1x32xf32> to vector<8x32xf32>
    %213 = arith.subf %210, %212 : vector<8x32xf32>
    %c0_98 = arith.constant 0 : index
    %c0_99 = arith.constant 0 : index
    %214 = vector.load %arg22[%c0_98, %c0_99] : memref<1x32xf32, #tpu.memory_space<vmem>>, vector<1x32xf32>
    %cst_100 = arith.constant 9.99999974E-6 : f32
    %215 = vector.broadcast %cst_100 : f32 to vector<1x32xf32>
    %216 = arith.addf %214, %215 : vector<1x32xf32>
    %217 = math.rsqrt %216 : vector<1x32xf32>
    %218 = vector.broadcast %217 : vector<1x32xf32> to vector<8x32xf32>
    %219 = arith.mulf %213, %218 : vector<8x32xf32>
    %c0_101 = arith.constant 0 : index
    %c0_102 = arith.constant 0 : index
    %220 = vector.load %arg19[%c0_101, %c0_102] : memref<1x32xf32, #tpu.memory_space<vmem>>, vector<1x32xf32>
    %221 = vector.broadcast %220 : vector<1x32xf32> to vector<8x32xf32>
    %222 = arith.mulf %219, %221 : vector<8x32xf32>
    %c0_103 = arith.constant 0 : index
    %c0_104 = arith.constant 0 : index
    %223 = vector.load %arg20[%c0_103, %c0_104] : memref<1x32xf32, #tpu.memory_space<vmem>>, vector<1x32xf32>
    %224 = vector.broadcast %223 : vector<1x32xf32> to vector<8x32xf32>
    %225 = arith.addf %222, %224 : vector<8x32xf32>
    %226 = arith.negf %225 : vector<8x32xf32>
    %227 = math.exp %226 : vector<8x32xf32>
    %cst_105 = arith.constant 1.000000e+00 : f32
    %228 = vector.broadcast %cst_105 : f32 to vector<8x32xf32>
    %229 = arith.addf %228, %227 : vector<8x32xf32>
    %230 = arith.divf %228, %229 : vector<8x32xf32>
    %231 = arith.mulf %225, %230 : vector<8x32xf32>
    %232 = arith.truncf %231 : vector<8x32xf32> to vector<8x32xbf16>
    %c0_106 = arith.constant 0 : index
    %c0_107 = arith.constant 0 : index
    %233 = vector.load %arg23[%c0_106, %c0_107] : memref<32x32xbf16, #tpu.memory_space<vmem>>, vector<32x32xbf16>
    %cst_108 = arith.constant dense<0.000000e+00> : vector<8x32xf32>
    %234 = tpu.matmul %232, %233, %cst_108 {dimension_numbers = #tpu.dot_dimension_numbers<[1], [0], [0], [1], [0, 0, 1, 1], [], []>} : vector<8x32xbf16>, vector<32x32xbf16>, vector<8x32xf32> -> vector<8x32xf32>
    %235 = arith.addf %134, %234 : vector<8x32xf32>
    %c0_109 = arith.constant 0 : index
    %c0_110 = arith.constant 0 : index
    %236 = vector.load %arg24[%c0_109, %c0_110] : memref<1x32xf32, #tpu.memory_space<vmem>>, vector<1x32xf32>
    %c0_111 = arith.constant 0 : index
    %c0_112 = arith.constant 0 : index
    %237 = vector.load %arg25[%c0_111, %c0_112] : memref<1x32xf32, #tpu.memory_space<vmem>>, vector<1x32xf32>
    %cst_113 = arith.constant dense<0.000000e+00> : vector<8xf32>
    %238 = vector.multi_reduction <add>, %235, %cst_113 [1] : vector<8x32xf32> to vector<8xf32>
    %239 = vector.shape_cast %238 : vector<8xf32> to vector<8x1xf32>
    %cst_114 = arith.constant 3.200000e+01 : f32
    %240 = vector.broadcast %cst_114 : f32 to vector<8x1xf32>
    %241 = arith.divf %239, %240 : vector<8x1xf32>
    %242 = vector.broadcast %241 : vector<8x1xf32> to vector<8x32xf32>
    %243 = arith.subf %235, %242 : vector<8x32xf32>
    %244 = arith.mulf %243, %243 : vector<8x32xf32>
    %cst_115 = arith.constant dense<0.000000e+00> : vector<8xf32>
    %245 = vector.multi_reduction <add>, %244, %cst_115 [1] : vector<8x32xf32> to vector<8xf32>
    %246 = vector.shape_cast %245 : vector<8xf32> to vector<8x1xf32>
    %cst_116 = arith.constant 3.200000e+01 : f32
    %247 = vector.broadcast %cst_116 : f32 to vector<8x1xf32>
    %248 = arith.divf %246, %247 : vector<8x1xf32>
    %249 = vector.broadcast %241 : vector<8x1xf32> to vector<8x32xf32>
    %250 = arith.subf %235, %249 : vector<8x32xf32>
    %cst_117 = arith.constant 9.99999974E-6 : f32
    %251 = vector.broadcast %cst_117 : f32 to vector<8x1xf32>
    %252 = arith.addf %248, %251 : vector<8x1xf32>
    %253 = math.rsqrt %252 : vector<8x1xf32>
    %254 = vector.broadcast %253 : vector<8x1xf32> to vector<8x32xf32>
    %255 = arith.mulf %250, %254 : vector<8x32xf32>
    %256 = vector.broadcast %236 : vector<1x32xf32> to vector<8x32xf32>
    %257 = arith.mulf %255, %256 : vector<8x32xf32>
    %258 = vector.broadcast %237 : vector<1x32xf32> to vector<8x32xf32>
    %259 = arith.addf %257, %258 : vector<8x32xf32>
    %260 = arith.truncf %259 : vector<8x32xf32> to vector<8x32xbf16>
    %c0_118 = arith.constant 0 : index
    %c0_119 = arith.constant 0 : index
    %261 = vector.load %arg26[%c0_118, %c0_119] : memref<32x64xbf16, #tpu.memory_space<vmem>>, vector<32x64xbf16>
    %cst_120 = arith.constant dense<0.000000e+00> : vector<8x64xf32>
    %262 = tpu.matmul %260, %261, %cst_120 {dimension_numbers = #tpu.dot_dimension_numbers<[1], [0], [0], [1], [0, 0, 1, 1], [], []>} : vector<8x32xbf16>, vector<32x64xbf16>, vector<8x64xf32> -> vector<8x64xf32>
    %c0_121 = arith.constant 0 : index
    %c0_122 = arith.constant 0 : index
    %263 = vector.load %arg27[%c0_121, %c0_122] : memref<1x64xf32, #tpu.memory_space<vmem>>, vector<1x64xf32>
    %264 = vector.broadcast %263 : vector<1x64xf32> to vector<8x64xf32>
    %265 = arith.addf %262, %264 : vector<8x64xf32>
    %cst_123 = arith.constant 5.000000e-01 : f32
    %266 = vector.broadcast %cst_123 : f32 to vector<8x64xf32>
    %267 = arith.mulf %266, %265 : vector<8x64xf32>
    %cst_124 = arith.constant 0.707106769 : f32
    %268 = vector.broadcast %cst_124 : f32 to vector<8x64xf32>
    %269 = arith.mulf %265, %268 : vector<8x64xf32>
    %270 = math.erf %269 : vector<8x64xf32>
    %cst_125 = arith.constant 1.000000e+00 : f32
    %271 = vector.broadcast %cst_125 : f32 to vector<8x64xf32>
    %272 = arith.addf %271, %270 : vector<8x64xf32>
    %273 = arith.mulf %267, %272 : vector<8x64xf32>
    %274 = arith.truncf %273 : vector<8x64xf32> to vector<8x64xbf16>
    %c0_126 = arith.constant 0 : index
    %c0_127 = arith.constant 0 : index
    %275 = vector.load %arg28[%c0_126, %c0_127] : memref<64x32xbf16, #tpu.memory_space<vmem>>, vector<64x32xbf16>
    %cst_128 = arith.constant dense<0.000000e+00> : vector<8x32xf32>
    %276 = tpu.matmul %274, %275, %cst_128 {dimension_numbers = #tpu.dot_dimension_numbers<[1], [0], [0], [1], [0, 0, 1, 1], [], []>} : vector<8x64xbf16>, vector<64x32xbf16>, vector<8x32xf32> -> vector<8x32xf32>
    %c0_129 = arith.constant 0 : index
    %c0_130 = arith.constant 0 : index
    %277 = vector.load %arg29[%c0_129, %c0_130] : memref<1x32xf32, #tpu.memory_space<vmem>>, vector<1x32xf32>
    %278 = vector.broadcast %277 : vector<1x32xf32> to vector<8x32xf32>
    %279 = arith.addf %276, %278 : vector<8x32xf32>
    %cst_131 = arith.constant 5.000000e-01 : f32
    %280 = vector.broadcast %cst_131 : f32 to vector<8x32xf32>
    %281 = arith.mulf %280, %279 : vector<8x32xf32>
    %282 = arith.addf %281, %235 : vector<8x32xf32>
    %c0_132 = arith.constant 0 : index
    %c0_133 = arith.constant 0 : index
    %283 = vector.load %arg30[%c0_132, %c0_133] : memref<1x32xf32, #tpu.memory_space<vmem>>, vector<1x32xf32>
    %c0_134 = arith.constant 0 : index
    %c0_135 = arith.constant 0 : index
    %284 = vector.load %arg31[%c0_134, %c0_135] : memref<1x32xf32, #tpu.memory_space<vmem>>, vector<1x32xf32>
    %cst_136 = arith.constant dense<0.000000e+00> : vector<8xf32>
    %285 = vector.multi_reduction <add>, %282, %cst_136 [1] : vector<8x32xf32> to vector<8xf32>
    %286 = vector.shape_cast %285 : vector<8xf32> to vector<8x1xf32>
    %cst_137 = arith.constant 3.200000e+01 : f32
    %287 = vector.broadcast %cst_137 : f32 to vector<8x1xf32>
    %288 = arith.divf %286, %287 : vector<8x1xf32>
    %289 = vector.broadcast %288 : vector<8x1xf32> to vector<8x32xf32>
    %290 = arith.subf %282, %289 : vector<8x32xf32>
    %291 = arith.mulf %290, %290 : vector<8x32xf32>
    %cst_138 = arith.constant dense<0.000000e+00> : vector<8xf32>
    %292 = vector.multi_reduction <add>, %291, %cst_138 [1] : vector<8x32xf32> to vector<8xf32>
    %293 = vector.shape_cast %292 : vector<8xf32> to vector<8x1xf32>
    %cst_139 = arith.constant 3.200000e+01 : f32
    %294 = vector.broadcast %cst_139 : f32 to vector<8x1xf32>
    %295 = arith.divf %293, %294 : vector<8x1xf32>
    %296 = vector.broadcast %288 : vector<8x1xf32> to vector<8x32xf32>
    %297 = arith.subf %282, %296 : vector<8x32xf32>
    %cst_140 = arith.constant 9.99999974E-6 : f32
    %298 = vector.broadcast %cst_140 : f32 to vector<8x1xf32>
    %299 = arith.addf %295, %298 : vector<8x1xf32>
    %300 = math.rsqrt %299 : vector<8x1xf32>
    %301 = vector.broadcast %300 : vector<8x1xf32> to vector<8x32xf32>
    %302 = arith.mulf %297, %301 : vector<8x32xf32>
    %303 = vector.broadcast %283 : vector<1x32xf32> to vector<8x32xf32>
    %304 = arith.mulf %302, %303 : vector<8x32xf32>
    %305 = vector.broadcast %284 : vector<1x32xf32> to vector<8x32xf32>
    %306 = arith.addf %304, %305 : vector<8x32xf32>
    %c0_141 = arith.constant 0 : index
    %c0_142 = arith.constant 0 : index
    %c0_143 = arith.constant 0 : index
    %307 = vector.load %arg32[%c0_141, %c0_142, %c0_143] : memref<1x8x32xf32, #tpu.memory_space<vmem>>, vector<1x8x32xf32>
    %308 = vector.shape_cast %307 : vector<1x8x32xf32> to vector<8x32xf32>
    %309 = vector.shape_cast %306 : vector<8x32xf32> to vector<1x8x32xf32>
    tpu.vector_store %arg32[%c0_141, %c0_142, %c0_143], %309 {strides = array<i32>} : memref<1x8x32xf32, #tpu.memory_space<vmem>>, vector<1x8x32xf32>,
    return
  }
  func.func @transform_0(%arg0: i32) -> (i32, i32, i32) {
    %c0_i32 = arith.constant 0 : i32
    %c0_i32_0 = arith.constant 0 : i32
    %c0_i32_1 = arith.constant 0 : i32
    return %arg0, %c0_i32, %c0_i32_0 : i32, i32, i32
  }
  func.func @transform_1(%arg0: i32) -> (i32, i32) {
    %c0_i32 = arith.constant 0 : i32
    %c0_i32_0 = arith.constant 0 : i32
    %c0_i32_1 = arith.constant 0 : i32
    return %c0_i32, %c0_i32_0 : i32, i32
  }
  func.func @transform_2(%arg0: i32) -> (i32, i32) {
    %c0_i32 = arith.constant 0 : i32
    %c0_i32_0 = arith.constant 0 : i32
    %c0_i32_1 = arith.constant 0 : i32
    return %c0_i32, %c0_i32_0 : i32, i32
  }
  func.func @transform_3(%arg0: i32) -> (i32, i32) {
    %c0_i32 = arith.constant 0 : i32
    %c0_i32_0 = arith.constant 0 : i32
    %c0_i32_1 = arith.constant 0 : i32
    return %c0_i32, %c0_i32_0 : i32, i32
  }
  func.func @transform_4(%arg0: i32) -> (i32, i32) {
    %c0_i32 = arith.constant 0 : i32
    %c0_i32_0 = arith.constant 0 : i32
    %c0_i32_1 = arith.constant 0 : i32
    return %c0_i32, %c0_i32_0 : i32, i32
  }
  func.func @transform_5(%arg0: i32) -> (i32, i32) {
    %c0_i32 = arith.constant 0 : i32
    %c0_i32_0 = arith.constant 0 : i32
    %c0_i32_1 = arith.constant 0 : i32
    return %c0_i32, %c0_i32_0 : i32, i32
  }
  func.func @transform_6(%arg0: i32) -> (i32, i32) {
    %c0_i32 = arith.constant 0 : i32
    %c0_i32_0 = arith.constant 0 : i32
    %c0_i32_1 = arith.constant 0 : i32
    return %c0_i32, %c0_i32_0 : i32, i32
  }
  func.func @transform_7(%arg0: i32) -> (i32, i32) {
    %c0_i32 = arith.constant 0 : i32
    %c0_i32_0 = arith.constant 0 : i32
    %c0_i32_1 = arith.constant 0 : i32
    return %c0_i32, %c0_i32_0 : i32, i32
  }
  func.func @transform_8(%arg0: i32) -> (i32, i32) {
    %c0_i32 = arith.constant 0 : i32
    %c0_i32_0 = arith.constant 0 : i32
    %c0_i32_1 = arith.constant 0 : i32
    return %c0_i32, %c0_i32_0 : i32, i32
  }
  func.func @transform_9(%arg0: i32) -> (i32, i32) {
    %c0_i32 = arith.constant 0 : i32
    %c0_i32_0 = arith.constant 0 : i32
    %c0_i32_1 = arith.constant 0 : i32
    return %c0_i32, %c0_i32_0 : i32, i32
  }
  func.func @transform_10(%arg0: i32) -> (i32, i32) {
    %c0_i32 = arith.constant 0 : i32
    %c0_i32_0 = arith.constant 0 : i32
    %c0_i32_1 = arith.constant 0 : i32
    return %c0_i32, %c0_i32_0 : i32, i32
  }
  func.func @transform_11(%arg0: i32) -> (i32, i32, i32) {
    %c0_i32 = arith.constant 0 : i32
    %c0_i32_0 = arith.constant 0 : i32
    %c0_i32_1 = arith.constant 0 : i32
    %c0_i32_2 = arith.constant 0 : i32
    return %c0_i32, %c0_i32_0, %c0_i32_1 : i32, i32, i32
  }
  func.func @transform_12(%arg0: i32) -> (i32, i32) {
    %c0_i32 = arith.constant 0 : i32
    %c0_i32_0 = arith.constant 0 : i32
    %c0_i32_1 = arith.constant 0 : i32
    return %c0_i32, %c0_i32_0 : i32, i32
  }
  func.func @transform_13(%arg0: i32) -> (i32, i32) {
    %c0_i32 = arith.constant 0 : i32
    %c0_i32_0 = arith.constant 0 : i32
    %c0_i32_1 = arith.constant 0 : i32
    return %c0_i32, %c0_i32_0 : i32, i32
  }
  func.func @transform_14(%arg0: i32) -> (i32, i32) {
    %c0_i32 = arith.constant 0 : i32
    %c0_i32_0 = arith.constant 0 : i32
    %c0_i32_1 = arith.constant 0 : i32
    return %c0_i32, %c0_i32_0 : i32, i32
  }
  func.func @transform_15(%arg0: i32) -> (i32, i32) {
    %c0_i32 = arith.constant 0 : i32
    %c0_i32_0 = arith.constant 0 : i32
    %c0_i32_1 = arith.constant 0 : i32
    return %c0_i32, %c0_i32_0 : i32, i32
  }
  func.func @transform_16(%arg0: i32) -> (i32, i32) {
    %c0_i32 = arith.constant 0 : i32
    %c0_i32_0 = arith.constant 0 : i32
    %c0_i32_1 = arith.constant 0 : i32
    return %c0_i32, %c0_i32_0 : i32, i32
  }
  func.func @transform_17(%arg0: i32) -> (i32, i32) {
    %c0_i32 = arith.constant 0 : i32
    %c0_i32_0 = arith.constant 0 : i32
    %c0_i32_1 = arith.constant 0 : i32
    return %c0_i32, %c0_i32_0 : i32, i32
  }
  func.func @transform_18(%arg0: i32) -> (i32, i32) {
    %c0_i32 = arith.constant 0 : i32
    %c0_i32_0 = arith.constant 0 : i32
    %c0_i32_1 = arith.constant 0 : i32
    return %c0_i32, %c0_i32_0 : i32, i32
  }
  func.func @transform_19(%arg0: i32) -> (i32, i32) {
    %c0_i32 = arith.constant 0 : i32
    %c0_i32_0 = arith.constant 0 : i32
    %c0_i32_1 = arith.constant 0 : i32
    return %c0_i32, %c0_i32_0 : i32, i32
  }
  func.func @transform_20(%arg0: i32) -> (i32, i32) {
    %c0_i32 = arith.constant 0 : i32
    %c0_i32_0 = arith.constant 0 : i32
    %c0_i32_1 = arith.constant 0 : i32
    return %c0_i32, %c0_i32_0 : i32, i32
  }
  func.func @transform_21(%arg0: i32) -> (i32, i32) {
    %c0_i32 = arith.constant 0 : i32
    %c0_i32_0 = arith.constant 0 : i32
    %c0_i32_1 = arith.constant 0 : i32
    return %c0_i32, %c0_i32_0 : i32, i32
  }
  func.func @transform_22(%arg0: i32) -> (i32, i32) {
    %c0_i32 = arith.constant 0 : i32
    %c0_i32_0 = arith.constant 0 : i32
    %c0_i32_1 = arith.constant 0 : i32
    return %c0_i32, %c0_i32_0 : i32, i32
  }
  func.func @transform_23(%arg0: i32) -> (i32, i32) {
    %c0_i32 = arith.constant 0 : i32
    %c0_i32_0 = arith.constant 0 : i32
    %c0_i32_1 = arith.constant 0 : i32
    return %c0_i32, %c0_i32_0 : i32, i32
  }
  func.func @transform_24(%arg0: i32) -> (i32, i32) {
    %c0_i32 = arith.constant 0 : i32
    %c0_i32_0 = arith.constant 0 : i32
    %c0_i32_1 = arith.constant 0 : i32
    return %c0_i32, %c0_i32_0 : i32, i32
  }
  func.func @transform_25(%arg0: i32) -> (i32, i32) {
    %c0_i32 = arith.constant 0 : i32
    %c0_i32_0 = arith.constant 0 : i32
    %c0_i32_1 = arith.constant 0 : i32
    return %c0_i32, %c0_i32_0 : i32, i32
  }
  func.func @transform_26(%arg0: i32) -> (i32, i32) {
    %c0_i32 = arith.constant 0 : i32
    %c0_i32_0 = arith.constant 0 : i32
    %c0_i32_1 = arith.constant 0 : i32
    return %c0_i32, %c0_i32_0 : i32, i32
  }
  func.func @transform_27(%arg0: i32) -> (i32, i32) {
    %c0_i32 = arith.constant 0 : i32
    %c0_i32_0 = arith.constant 0 : i32
    %c0_i32_1 = arith.constant 0 : i32
    return %c0_i32, %c0_i32_0 : i32, i32
  }
  func.func @transform_28(%arg0: i32) -> (i32, i32) {
    %c0_i32 = arith.constant 0 : i32
    %c0_i32_0 = arith.constant 0 : i32
    %c0_i32_1 = arith.constant 0 : i32
    return %c0_i32, %c0_i32_0 : i32, i32
  }
  func.func @transform_29(%arg0: i32) -> (i32, i32) {
    %c0_i32 = arith.constant 0 : i32
    %c0_i32_0 = arith.constant 0 : i32
    %c0_i32_1 = arith.constant 0 : i32
    return %c0_i32, %c0_i32_0 : i32, i32
  }
  func.func @transform_30(%arg0: i32) -> (i32, i32) {
    %c0_i32 = arith.constant 0 : i32
    %c0_i32_0 = arith.constant 0 : i32
    %c0_i32_1 = arith.constant 0 : i32
    return %c0_i32, %c0_i32_0 : i32, i32
  }
  func.func @transform_31(%arg0: i32) -> (i32, i32, i32) {
    %c0_i32 = arith.constant 0 : i32
    %c0_i32_0 = arith.constant 0 : i32
    %c0_i32_1 = arith.constant 0 : i32
    return %arg0, %c0_i32, %c0_i32_0 : i32, i32, i32
  }
}

</mosaic_0001>

<bundles_post_ra>
// kernel: conformer_encoder_layer.1
= control target key start
LH: loop header
LB: loop body
LE: loop exit
PB: predicated region body
PF: predicated region fallthrough
CT: control target
= control target key end

     0   :  { %s2259_s6 = smov 1   ;;  %s2260_s10 = smov 2   ;;  %s2682_s0 = inlined_call_operand.smem [shape: u32[32], index: -1, kind: input, shape index: {}] }
   0x1   :  { %s2311_s5 = sld [smem:[%s2682_s0]]   ;;  %s2261_s14 = smov 3  }
   0x2   :  { %s2316_s9 = sld [smem:[%s2682_s0 + %s2259_s6]]   ;;  %s2262_s18 = smov 4  }
   0x3   :  { %s2321_s13 = sld [smem:[%s2682_s0 + %s2260_s10]]   ;;  %s2263_s22 = smov 5  }
   0x4   :  { %s2326_s17 = sld [smem:[%s2682_s0 + %s2261_s14]]   ;;  %s2264_s26 = smov 6  }
   0x5   :  { %s2331_s21 = sld [smem:[%s2682_s0 + %s2262_s18]]   ;;  %s2265_s30 = smov 7  }
   0x6   :  { %s2336_s25 = sld [smem:[%s2682_s0 + %s2263_s22]]   ;;  %s2266_s4 = smov 8  }
   0x7   :  { %2691 = sst [smem:[#allocation7_spill]] %s2311_s5  ;;  %s2267_s10 = smov 9  }
   0x8   :  { %2692 = sst [smem:[#allocation8_spill]] %s2316_s9  ;;  %s2268_s15 = smov 10  }
   0x9   :  { %2693 = sst [smem:[#allocation9_spill]] %s2321_s13  ;;  %s2269_s20 = smov 11  }
   0xa   :  { %s2341_s29 = sld [smem:[%s2682_s0 + %s2264_s26]]   ;;  %s2270_s26 = smov 12  }
   0xb   :  { %s2346_s3 = sld [smem:[%s2682_s0 + %s2265_s30]]   ;;  %s2271_s1 = smov 13  }
   0xc   :  { %s2351_s8 = sld [smem:[%s2682_s0 + %s2266_s4]]   ;;  %s2272_s7 = smov 14  }
   0xd   :  { %s2356_s14 = sld [smem:[%s2682_s0 + %s2267_s10]]   ;;  %s2274_s22 = smov 16  }
   0xe   :  { %s2361_s19 = sld [smem:[%s2682_s0 + %s2268_s15]]   ;;  %s2273_s15 = smov 15  }
   0xf   :  { %s2366_s24 = sld [smem:[%s2682_s0 + %s2269_s20]]   ;;  %s2275_s28 = smov 17  }
  0x10   :  { %s2371_s30 = sld [smem:[%s2682_s0 + %s2270_s26]]  }
  0x11   :  { %2694 = sst [smem:[#allocation10_spill]] %s2346_s3 }
  0x12   :  { %2695 = sst [smem:[#allocation11_spill]] %s2351_s8 }
  0x13   :  { %2696 = sst [smem:[#allocation12_spill]] %s2356_s14 }
  0x14   :  { %s2376_s6 = sld [smem:[%s2682_s0 + %s2271_s1]]  }
  0x15   :  { %s2381_s12 = sld [smem:[%s2682_s0 + %s2272_s7]]   ;;  %s2276_s7 = smov 18  }
  0x16   :  { %s2386_s20 = sld [smem:[%s2682_s0 + %s2273_s15]]   ;;  %s2277_s15 = smov 19  }
  0x17   :  { %s2391_s27 = sld [smem:[%s2682_s0 + %s2274_s22]]   ;;  %s2278_s22 = smov 20  }
  0x18   :  { %s2396_s4 = sld [smem:[%s2682_s0 + %s2275_s28]]   ;;  %s2279_s28 = smov 21  }
  0x1a   :  { %2697 = sst [smem:[#allocation13_spill]] %s2376_s6 }
  0x1b   :  { %2698 = sst [smem:[#allocation14_spill]] %s2381_s12 }
  0x1c   :  { %s2401_s12 = sld [smem:[%s2682_s0 + %s2276_s7]]   ;;  %s2280_s7 = smov 22  }
  0x1d   :  { %2699 = sst [smem:[#allocation15_spill]] %s2391_s27 }
  0x1e   :  { %2700 = sst [smem:[#allocation16_spill]] %s2396_s4 }
  0x1f   :  { %s2406_s6 = sld [smem:[%s2682_s0 + %s2277_s15]]   ;;  %s2281_s15 = smov 23  }
  0x20   :  { %s2411_s27 = sld [smem:[%s2682_s0 + %s2278_s22]]   ;;  %s2282_s22 = smov 24  }
  0x21   :  { %s2416_s4 = sld [smem:[%s2682_s0 + %s2279_s28]]   ;;  %s2283_s28 = smov 25  }
  0x22   :  { %2701 = sst [smem:[#allocation17_spill]] %s2401_s12 }
  0x23   :  { %s2421_s12 = sld [smem:[%s2682_s0 + %s2280_s7]]   ;;  %s2284_s7 = smov 26  }
  0x25   :  { %2702 = sst [smem:[#allocation18_spill]] %s2406_s6 }
  0x26   :  { %2703 = sst [smem:[#allocation19_spill]] %s2411_s27 }
  0x27   :  { %2704 = sst [smem:[#allocation20_spill]] %s2416_s4 }
  0x28   :  { %s2426_s6 = sld [smem:[%s2682_s0 + %s2281_s15]]   ;;  %s2285_s15 = smov 27  }
  0x29   :  { %2705 = sst [smem:[#allocation21_spill]] %s2421_s12 }
  0x2a   :  { %s2431_s27 = sld [smem:[%s2682_s0 + %s2282_s22]]   ;;  %s2286_s22 = smov 28  }
  0x2b   :  { %s2436_s4 = sld [smem:[%s2682_s0 + %s2283_s28]]   ;;  %s2287_s28 = smov 29  }
  0x2c   :  { %s2441_s12 = sld [smem:[%s2682_s0 + %s2284_s7]]   ;;  %s2288_s7 = smov 30  }
  0x2e   :  { %2706 = sst [smem:[#allocation22_spill]] %s2426_s6 }
  0x2f   :  { %s2446_s6 = sld [smem:[%s2682_s0 + %s2285_s15]]   ;;  %s2289_s15 = smov 31  }
  0x30   :  { %2707 = sst [smem:[#allocation23_spill]] %s2431_s27 }
  0x31   :  { %2708 = sst [smem:[#allocation24_spill]] %s2436_s4 }
  0x32   :  { %2709 = sst [smem:[#allocation25_spill]] %s2441_s12 }
  0x33   :  { %s2451_s27 = sld [smem:[%s2682_s0 + %s2286_s22]]  }
  0x34   :  { %s2456_s4 = sld [smem:[%s2682_s0 + %s2287_s28]]  }
  0x35   :  { %2710 = sst [smem:[#allocation26_spill]] %s2446_s6 }
  0x36   :  { %s2461_s12 = sld [smem:[%s2682_s0 + %s2288_s7]]  }
  0x37   :  { %s2466_s6 = sld [smem:[%s2682_s0 + %s2289_s15]]  }
  0x3a   :  { %2711 = sst [smem:[#allocation27_spill]] %s2456_s4 }
  0x3b   :  { %68 = vsyncpa [#allocation5], 0 }
  0x3c   :  { %70 = vsyncpa [#allocation5 + $0x1], 0  ;;  %s2468_s22 = smov 0   ;;  %s2470_s23 = smov 0  }
  0x3d   :  { %s2472_s26 = smov 0   ;;  %s2474_s28 = smov 0  }
  0x3e LB: > { %s2712_s14 = sld [smem:[#allocation12_spill]]  ;;  %s2489_s0 = sadd.s32 4294967295, %s2253_s28   ;;  %s2241_s22 = sphi %s2468_s22, %s2736_s22   ;;  %s2253_s28 = sphi %s2474_s28, %s2739_s28   ;;  %s2249_s26 = sphi %s2472_s26, %s2738_s26   ;;  %s2245_s23 = sphi %s2470_s23, %s2737_s23  }
  0x3f   : > { %s1914_s1 = sadd.s32 4294967294, %s2253_s28   ;;  %s2493_s2 = sadd.s32 1, %s2253_s28  }
  0x40   : > { %s739_s7 = sadd.s32 1, %s2249_s26  ;;  %s736_s10 = ssub.s32 %s2253_s28, %s2493_s2 }
  0x41   : > { %p749_p0 = scmp.ne.s32.totalorder %s2249_s26, %s2245_s23  ;;  %p737_p1 = scmp.eq.s32.totalorder %s736_s10, 0 }
  0x42   : > { %p750_p2 = scmp.eq.s32.totalorder %s2489_s0, 1  ;;  %p755_p3 = scmp.ne.s32.totalorder %s2245_s23, %s2241_s22 }
  0x43   : > { %p756_p4 = scmp.eq.s32.totalorder %s1914_s1, 1  ;;  %p1917_p7 = scmp.ge.s32.totalorder %s2253_s28, 1 }
  0x44   : > { %s2504_s11 = scalar_select %p737_p1, %s2249_s26, %s739_s7  }
  0x45   : > { %p2506_p5 = por %p750_p2, %p749_p0  ;;  %p2510_p6 = por %p756_p4, %p755_p3 }
  0x46   : > { %p871_p8 = scmp.lt.s32.totalorder %s2253_s28, 3 }
  0x48   : > { %p872_p9 = pnand %p1917_p7, %p871_p8 }
  0x49   : > { %s2715_s5 = sld [smem:[#allocation7_spill]] (!%p872_p9)  ;;  %p950_p10 = scmp.lt.s32.totalorder (!%p872_p9), %s2489_s0, 1 }
  0x4a   : > { %875 = sbr.rel (%p872_p9) target bundleno = 3347 (0xd13), region = 144  ;;  %s2687_s10 = sand.u32 (!%p872_p9), 1, %s2245_s23  }
  0x4b   : > { %s2716_s9 = sld [smem:[#allocation8_spill]] (!%p872_p9) }
  0x4c   : > { %s2717_s13 = sld [smem:[#allocation9_spill]] (!%p872_p9) }
  0x4d   : > { %s2718_s3 = sld [smem:[#allocation10_spill]] (!%p872_p9) }
  0x4e   : > { %s2719_s8 = sld [smem:[#allocation11_spill]] (!%p872_p9) }
  0x4f   : > { %vm958_vm0 = vcmask 261120   ;;  %v2290_v0 = vmov 0.0   ;;  %s951_s18 = scalar_select %p950_p10, %s2489_s0, 1  ;;  %v2291_v3 = vmov 32.0   ;;  %v2028_v15 = vld [vmem:[%s2326_s17 + $0x8] sm:$0xff]  ;;  %v2027_v16 = vld [vmem:[%s2326_s17] sm:$0xff] }
  0x50   : > { %1260 = vst.msk [vmem:[#allocation3] sm:$0xff] %vm958_vm0, %v2290_v0  ;;  %2145 = vrcp.f32 %v2291_v3  ;;  %1026 = vmatpush.bf16.msra.mxu0 %v2028_v15  ;;  %v2140_v33 = vld [vmem:[%s2331_s21] ss:$0 sm:$0xff]  ;;  %v2032_v40 = vld [vmem:[%s2336_s25 + $0x18] sm:$0xff]  ;;  %v2031_v45 = vld [vmem:[%s2336_s25 + $0x10] sm:$0xff]  ;;  %vm1114_vm9 = vcmask 523264  }
  0x51   : > { %s1919_s1 = sshll.u32 %s951_s18, 3  ;;  %s2533_s18 = sshll.u32 %s2687_s10, 3  ;;  %v2138_v26 = vld [vmem:[%s2716_s9] ss:$0 sm:$0xff]  ;;  %1122 = vmatpush.bf16.msra.mxu1 %v2032_v40  ;;  %v2030_v48 = vld [vmem:[%s2336_s25 + $0x8] sm:$0xff]  ;;  %vm1202_vm13 = vcmask 64512  }
  0x52   : > { %s953_s7 = scalar_lea.vmem %s2715_s5, %s1919_s1  ;;  %v2139_v29 = vld [vmem:[%s2717_s13] ss:$0 sm:$0xff]  ;;  %s2292_s1 = smov 96  }
  0x53   : > { %v2521_v1 = vld [vmem:[%s953_s7] sm:$0xff]  ;;  %s2293_s7 = smov 104   ;;  %s2294_s10 = smov 120  }
  0x54   : > { %v959_v2 = vsel %vm958_vm0, %v2521_v1, 0.0  ;;  %1027 = vmatpush.bf16.msra.mxu0 %v2027_v16  ;;  %v2029_v52 = vld [vmem:[%s2336_s25] sm:$0xff]  ;;  %s2296_s5 = smov 64   ;;  %s2298_s9 = smov 40  }
  0x55   : > { %960 = vadd.xlane.f32.xlu0 %v959_v2  ;;  %1123 = vmatpush.bf16.msra.mxu1 %v2031_v45  ;;  %v2143_v45 = vld [vmem:[%s2719_s8] ss:$0 sm:$0xff]  ;;  %s2297_s8 = smov 112   ;;  %s2299_s13 = smov 88  }
  0x56   : > { %v2146_v4 = vpop.eup %2145 }
  0x57   : > { %v963_v5 = vmul.f32 32.0, %v2146_v4  ;;  %vm967_vm1 = vweird.f32 %v2146_v4 }
  0x59   : > { %v964_v6 = vsub.f32 1.0, %v963_v5  ;;  %1124 = vmatpush.bf16.msra.mxu1 %v2030_v48 }
  0x5b   : > { %v965_v7 = vmul.f32 %v2146_v4, %v964_v6 }
  0x5d   : > { %v966_v8 = vadd.f32 %v2146_v4, %v965_v7  ;;  %1125 = vmatpush.bf16.msra.mxu1 %v2029_v52 }
  0x5f   : > { %v2525_v9 = vsel %vm967_vm1, %v2146_v4, %v966_v8 }
  0xc8   : > { %v961_v10 = vpop.xlane.xlu0 %960 }
  0xc9   : > { %v969_v11 = vmul.f32 %v2525_v9, %v961_v10 }
  0xcb   : > { %v970_v12 = vsub.f32 %v2521_v1, %v969_v11 }
  0xcd   : > { %v971_v13 = vmul.f32 %v970_v12, %v970_v12 }
  0xcf   : > { %v972_v14 = vsel %vm958_vm0, %v971_v13, 0.0 }
  0xd0   : > { %973 = vadd.xlane.f32.xlu0 %v972_v14 }
 0x143   : > { %v974_v17 = vpop.xlane.xlu0 %973 }
 0x144   : > { %v975_v18 = vmul.f32 %v974_v17, %v2525_v9 }
 0x146   : > { %v976_v19 = vadd.f32 1e-05, %v975_v18 }
 0x148   : > { %2147 = vrsqrt.f32 %v976_v19  ;;  %vm983_vm3 = vweird.f32 %v976_v19 }
 0x14e   : > { %v2148_v20 = vpop.eup %2147 }
 0x14f   : > { %v978_v21 = vmul.f32 %v2148_v20, %v976_v19  ;;  %vm984_vm2 = vweird.f32 %v2148_v20 }
 0x150   : > { %vm985_vm4 = vmor %vm983_vm3, %vm984_vm2 }
 0x151   : > { %v979_v22 = vmul.f32 %v2148_v20, %v978_v21 }
 0x153   : > { %v980_v23 = vmul.f32 0.5, %v979_v22 }
 0x155   : > { %v981_v24 = vsub.f32 1.5, %v980_v23 }
 0x157   : > { %v982_v25 = vmul.f32 %v2148_v20, %v981_v24 }
 0x159   : > { %v986_v27 = vsel %vm985_vm4, %v2148_v20, %v982_v25  ;;  %v2141_v20 = vld [vmem:[%s2341_s29] ss:$0 sm:$0xff] }
 0x15a   : > { %v987_v28 = vmul.f32 %v986_v27, %v970_v12 }
 0x15c   : > { %v991_v30 = vmul.f32 %v2138_v26, %v987_v28 }
 0x15e   : > { %v995_v31 = vadd.f32 %v2139_v29, %v991_v30 }
 0x160   : > { %v996_v32 = vpack.c.bf16 %v995_v31, %v995_v31 }
 0x162   : > { %1928 = vmatmul.msk.bf16.vlgmr.msra.gmra.mxu0 %vm958_vm0, %v996_v32  ;;  %v2034_v32 = vld [vmem:[%s2712_s14 + $0x8] sm:$0xff] }
 0x163   : > { %1195 = vmatpush.bf16.msra.mxu2 %v2034_v32 }
 0x1df   : > { %v1029_v34 = vpop.f32.mrf.mxu0 }
 0x1e0   : > { %v1030_v35 = vadd.f32 %v2140_v33, %v1029_v34  ;;  %v2033_v33 = vld [vmem:[%s2712_s14] sm:$0xff]  ;;  %s2300_s14 = smov 80  }
 0x1e1   : > { %1196 = vmatpush.bf16.msra.mxu2 %v2033_v33 }
 0x1e2   : > { %v1034_v36 = vmul.f32 0.70710677, %v1030_v35  ;;  %v1033_v16 = vmul.f32 0.5, %v1030_v35 }
 0x1e4   : > { %v1035_v37 = vmul.f32 %v1034_v36, %v1034_v36 }
 0x1e6   : > { %v1036_v38 = vmin.f32 %v1035_v37, 16.0 }
 0x1e7   : > { %v1031_v39 = vpop.f32.mrf.mxu0 }
 0x1e8   : > { %v1037_v41 = vmul.f32 2.1237322e-06, %v1036_v38  ;;  %v1048_v42 = vmul.f32 3.8918573e-05, %v1036_v38 }
 0x1ea   : > { %v1038_v43 = vadd.f32 0.00028619796, %v1037_v41  ;;  %v1049_v44 = vadd.f32 0.001143296, %v1048_v42  ;;  %v2142_v42 = vld [vmem:[%s2718_s3] ss:$0 sm:$0xff] }
 0x1eb   : > { %s2295_s3 = smov 48  }
 0x1ec   : > { %v1039_v46 = vmul.f32 %v1038_v43, %v1036_v38  ;;  %v1050_v47 = vmul.f32 %v1049_v44, %v1036_v38 }
 0x1ee   : > { %v1051_v49 = vadd.f32 0.014752088, %v1050_v47  ;;  %v1040_v50 = vadd.f32 0.0036580483, %v1039_v46 }
 0x1f0   : > { %v1052_v51 = vmul.f32 %v1051_v49, %v1036_v38  ;;  %v1041_v54 = vmul.f32 %v1040_v50, %v1036_v38  ;;  %v2144_v49 = vld [vmem:[%s2361_s19] ss:$0 sm:$0xff] }
 0x1f2   : > { %v1053_v53 = vadd.f32 0.112945676, %v1052_v51  ;;  %v1042_v57 = vadd.f32 0.05243302, %v1041_v54 }
 0x1f4   : > { %v1054_v55 = vmul.f32 %v1053_v53, %v1036_v38  ;;  %v1043_v60 = vmul.f32 %v1042_v57, %v1036_v38 }
 0x1f6   : > { %v1055_v56 = vadd.f32 0.4994258, %v1054_v55  ;;  %v1044_v61 = vadd.f32 0.18741608, %v1043_v60 }
 0x1f8   : > { %v1056_v58 = vmul.f32 %v1055_v56, %v1036_v38  ;;  %v1045_v63 = vmul.f32 %v1044_v61, %v1036_v38 }
 0x1fa   : > { %v1057_v59 = vadd.f32 1.0, %v1056_v58  ;;  %v1046_v5 = vadd.f32 1.1283791, %v1045_v63 }
 0x1fc   : > { %2149 = vrcp.f32 %v1057_v59  ;;  %v1069_v4 = vand.u32 2147483648, %v1057_v59  ;;  %v1067_v7 = vand.u32 2147483647, %v1057_v59  ;;  %vm1063_vm6 = vweird.f32 %v1057_v59 }
 0x1fd   : > { %v1047_v11 = vmul.f32 %v1046_v5, %v1034_v36 }
 0x1fe   : > { %v1070_v10 = vor.u32 1.1754944e-38, %v1069_v4  ;;  %vm1068_vm8 = vcmp.eq.f32.partialorder %v1067_v7, 8.507059e+37 }
 0x202   : > { %v2150_v62 = vpop.eup %2149 }
 0x203   : > { %v1059_v2 = vmul.f32 %v2150_v62, %v1057_v59  ;;  %vm1064_vm5 = vweird.f32 %v2150_v62 }
 0x204   : > { %vm1065_vm7 = vmor %vm1063_vm6, %vm1064_vm5 }
 0x205   : > { %v1060_v3 = vsub.f32 1.0, %v1059_v2 }
 0x207   : > { %v1061_v6 = vmul.f32 %v2150_v62, %v1060_v3 }
 0x209   : > { %v1062_v8 = vadd.f32 %v2150_v62, %v1061_v6 }
 0x20b   : > { %v1066_v12 = vsel %vm1065_vm7, %v2150_v62, %v1062_v8 }
 0x20c   : > { %v1071_v13 = vsel %vm1068_vm8, %v1070_v10, %v1066_v12 }
 0x20d   : > { %v1072_v14 = vmul.f32 %v1071_v13, %v1047_v11 }
 0x20f   : > { %v1929_v15 = vclamps-f32 %v1072_v14, 1.0 }
 0x211   : > { %v1075_v17 = vadd.f32 1.0, %v1929_v15 }
 0x213   : > { %v1076_v18 = vmul.f32 %v1075_v17, %v1033_v16 }
 0x215   : > { %v1077_v19 = vpack.c.bf16 %v1076_v18, %v1076_v18 }
 0x217   : > { %1946 = vmatmul.msk.bf16.vlgmr.msra.gmra.mxu1 %vm1114_vm9, %v1077_v19 }
 0x294   : > { %v1127_v21 = vpop.f32.mrf.mxu1 }
 0x295   : > { %v1128_v22 = vadd.f32 %v2141_v20, %v1127_v21 }
 0x297   : > { %v1131_v23 = vmul.f32 0.5, %v1128_v22 }
 0x299   : > { %v2549_v24 = vadd.f32 %v1131_v23, %v2521_v1 }
 0x29b   : > { %v1135_v25 = vsel %vm958_vm0, %v2549_v24, 0.0 }
 0x29c   : > { %v1129_v26 = vpop.f32.mrf.mxu1  ;;  %1136 = vadd.xlane.f32.xlu1 %v1135_v25 }
 0x30f   : > { %v1137_v27 = vpop.xlane.xlu1 %1136 }
 0x310   : > { %v1138_v28 = vmul.f32 %v1137_v27, %v2525_v9 }
 0x312   : > { %v1139_v29 = vsub.f32 %v2549_v24, %v1138_v28 }
 0x314   : > { %v1140_v30 = vmul.f32 %v1139_v29, %v1139_v29 }
 0x316   : > { %v1141_v31 = vsel %vm958_vm0, %v1140_v30, 0.0 }
 0x317   : > { %1142 = vadd.xlane.f32.xlu1 %v1141_v31 }
 0x38a   : > { %v1143_v1 = vpop.xlane.xlu1 %1142 }
 0x38b   : > { %v1144_v34 = vmul.f32 %v1143_v1, %v2525_v9 }
 0x38d   : > { %v1145_v35 = vadd.f32 1e-05, %v1144_v34 }
 0x38f   : > { %2151 = vrsqrt.f32 %v1145_v35  ;;  %vm1152_vm11 = vweird.f32 %v1145_v35 }
 0x395   : > { %v2152_v36 = vpop.eup %2151 }
 0x396   : > { %v1147_v37 = vmul.f32 %v2152_v36, %v1145_v35  ;;  %vm1153_vm10 = vweird.f32 %v2152_v36 }
 0x397   : > { %vm1154_vm12 = vmor %vm1152_vm11, %vm1153_vm10 }
 0x398   : > { %v1148_v38 = vmul.f32 %v2152_v36, %v1147_v37 }
 0x39a   : > { %v1149_v39 = vmul.f32 0.5, %v1148_v38 }
 0x39c   : > { %v1150_v40 = vsub.f32 1.5, %v1149_v39 }
 0x39e   : > { %v1151_v41 = vmul.f32 %v2152_v36, %v1150_v40 }
 0x3a0   : > { %v1155_v43 = vsel %vm1154_vm12, %v2152_v36, %v1151_v41 }
 0x3a1   : > { %v1156_v44 = vmul.f32 %v1155_v43, %v1139_v29 }
 0x3a3   : > { %v1160_v46 = vmul.f32 %v2142_v42, %v1156_v44 }
 0x3a5   : > { %v1164_v47 = vadd.f32 %v2143_v45, %v1160_v46 }
 0x3a7   : > { %v1165_v48 = vpack.c.bf16 %v1164_v47, %v1164_v47 }
 0x3a9   : > { %1955 = vmatmul.msk.bf16.vlgmr.msra.gmra.mxu2 %vm958_vm0, %v1165_v48 }
 0x42c   : > { %v1198_v50 = vpop.f32.mrf.mxu2 }
 0x42d   : > { %v1199_v51 = vadd.f32 %v2144_v49, %v1198_v50 }
 0x42f   : > { %1220 = vrot.lane.b32.xlu1 %v1199_v51, %s2292_s1  ;;  %1215 = vrot.lane.b32.xlu0 %v1199_v51, %s2293_s7  ;;  %1203 = vst.msk [vmem:[#allocation2] sm:$0xff] %vm1202_vm13, %v1199_v51  ;;  %s2301_s1 = smov 72   ;;  %s2302_s7 = smov 56  }
 0x430   : > { %1205 = vrot.lane.b32.xlu2 %v1199_v51, %s2294_s10 }
 0x434   : > { %v1200_v52 = vpop.f32.mrf.mxu2 }
 0x437   : > { %1250 = vrot.lane.b32.xlu1 %v1199_v51, %s2295_s3  ;;  %1240 = vrot.lane.b32.xlu0 %v1199_v51, %s2296_s5  ;;  %s949_s5 = scalar_lea.vmem [#allocation4], %s2533_s18 }
 0x438   : > { %1210 = vrot.lane.b32.xlu2 %v1199_v51, %s2297_s8 }
 0x43f   : > { %1255 = vrot.lane.b32.xlu0 %v1199_v51, %s2298_s9  ;;  %s2576_s9 = smov 0  }
 0x440   : > { %1225 = vrot.lane.b32.xlu2 %v1199_v51, %s2299_s13 }
 0x448   : > { %1230 = vrot.lane.b32.xlu2 %v1199_v51, %s2300_s14 }
 0x450   : > { %1235 = vrot.lane.b32.xlu2 %v1199_v51, %s2301_s1 }
 0x458   : > { %1245 = vrot.lane.b32.xlu2 %v1199_v51, %s2302_s7 }
 0x48a   : > { %v1206_v53 = vpop.permute.xlu2 %1205 }
 0x48b   : > { %1209 = vst.msk [vmem:[#allocation2 + $0x8] sm:$0xff] %vm1202_vm13, %v1206_v53 }
 0x492   : > { %v1211_v54 = vpop.permute.xlu2 %1210 }
 0x493   : > { %1214 = vst.msk [vmem:[#allocation2 + $0x10] sm:$0xff] %vm1202_vm13, %v1211_v54 }
 0x49a   : > { %v1226_v55 = vpop.permute.xlu2 %1225 }
 0x49b   : > { %1229 = vst.msk [vmem:[#allocation2 + $0x28] sm:$0xff] %vm1202_vm13, %v1226_v55 }
 0x4a1   : > { %v1221_v56 = vpop.permute.xlu1 %1220  ;;  %v1216_v57 = vpop.permute.xlu0 %1215 }
 0x4a2   : > { %1224 = vst.msk [vmem:[#allocation2 + $0x20] sm:$0xff] %vm1202_vm13, %v1221_v56  ;;  %v1231_v58 = vpop.permute.xlu2 %1230 }
 0x4a3   : > { %1219 = vst.msk [vmem:[#allocation2 + $0x18] sm:$0xff] %vm1202_vm13, %v1216_v57 }
 0x4a4   : > { %1234 = vst.msk [vmem:[#allocation2 + $0x30] sm:$0xff] %vm1202_vm13, %v1231_v58 }
 0x4a9   : > { %v1251_v59 = vpop.permute.xlu1 %1250  ;;  %v1241_v60 = vpop.permute.xlu0 %1240 }
 0x4aa   : > { %1254 = vst.msk [vmem:[#allocation2 + $0x50] sm:$0xff] %vm1202_vm13, %v1251_v59  ;;  %v1236_v61 = vpop.permute.xlu2 %1235 }
 0x4ab   : > { %1244 = vst.msk [vmem:[#allocation2 + $0x40] sm:$0xff] %vm1202_vm13, %v1241_v60 }
 0x4ac   : > { %1239 = vst.msk [vmem:[#allocation2 + $0x38] sm:$0xff] %vm1202_vm13, %v1236_v61 }
 0x4b1   : > { %v1256_v62 = vpop.permute.xlu0 %1255 }
 0x4b2   : > { %1259 = vst.msk [vmem:[#allocation2 + $0x58] sm:$0xff] %vm1202_vm13, %v1256_v62  ;;  %v1246_v63 = vpop.permute.xlu2 %1245 }
 0x4b3   : > { %1249 = vst.msk [vmem:[#allocation2 + $0x48] sm:$0xff] %vm1202_vm13, %v1246_v63 }
 0x4b4 LB: >> { %s1956_s13 = sshll.u32 %s2257_s9, 3  ;;  %vm1316_vm14 = vcmask 1043456   ;;  %s1963_s8 = sshll.u32 %s2257_s9, 2  ;;  %v1333_v30 = vld [vmem:[#allocation3] sm:$0xff]  ;;  %s2257_s9 = sphi %s2576_s9, %s1266_s9  }
 0x4b5   : >> { %s1268_s3 = scalar_lea.vmem [#allocation2], %s1956_s13  ;;  %s1336_s14 = scalar_lea.vmem %s2366_s24, %s1963_s8 }
 0x4b6   : >> { %v1337_v25 = vld [vmem:[%s1336_s14] sm:$0xf]  ;;  %s1266_s9 = sadd.s32 1, %s2257_s9  }
 0x4b7   : >> { %v1342_v26 = vsel %vm1316_vm14, %v1337_v25, 0  ;;  %p1263_p11 = scmp.ge.s32.totalorder %s1266_s9, 4  }
 0x4b8   : >> { %1351 = vmatpush.bf16.msra.mxu2 %v1342_v26  ;;  %s2720_s10 = sld [smem:[#allocation15_spill]] (%p1263_p11)  ;;  %v2157_v34 = vld [vmem:[%s2371_s30] ss:$0 sm:$0xff] (%p1263_p11)  ;;  %v2036_v43 = vld [vmem:[%s2386_s20 + $0x8] sm:$0xff] (%p1263_p11) }
 0x4b9   : > { %v2035_v45 = vld [vmem:[%s2386_s20] sm:$0xff] (%p1263_p11)  ;;  %s2721_s1 = sld [smem:[#allocation13_spill]] (%p1263_p11) }
 0x4ba   : >> { %v1958_v2 = vld [vmem:[%s1268_s3 + $0x20] sm:$0xff]  ;;  %s2722_s7 = sld [smem:[#allocation14_spill]] (%p1263_p11) }
 0x4bb   : >> { %v1269_v3 = vld [vmem:[%s1268_s3] sm:$0xff]  ;;  %v1276_v4 = vpack.c.bf16 %v1958_v2, %v1958_v2  ;;  %s2723_s9 = sld [smem:[#allocation21_spill]] (%p1263_p11) }
 0x4bc   : >> { %v1270_v6 = vmul.f32 0.35355338, %v1269_v3  ;;  %v1960_v17 = vld [vmem:[%s1268_s3 + $0x40] sm:$0xff]  ;;  %s2724_s13 = sld [smem:[#allocation20_spill]] (%p1263_p11) }
 0x4bd   : >> { %v1286_v5 = vsel %vm1202_vm13, %v1276_v4, 0  ;;  %v1281_v18 = vpack.c.bf16 %v1960_v17, %v1960_v17  ;;  %s2725_s3 = sld [smem:[#allocation16_spill]] (%p1263_p11) }
 0x4be   : >> { %1295 = vmatpush.bf16.xpose.msra.mxu0 %v1286_v5  ;;  %v1271_v7 = vpack.c.bf16 %v1270_v6, %v1270_v6  ;;  %v2038_v44 = vld [vmem:[%s2720_s10 + $0x8] sm:$0xff] (%p1263_p11)  ;;  %s2726_s8 = sld [smem:[#allocation19_spill]] (%p1263_p11) }
 0x4bf   : >> { %v1318_v19 = vsel %vm1316_vm14, %v1281_v18, 0  ;;  %v2158_v55 = vld [vmem:[%s2721_s1] ss:$0 sm:$0xff] (%p1263_p11)  ;;  %s2727_s14 = sld [smem:[#allocation17_spill]] (%p1263_p11) }
 0x4c0   : >> { %1327 = vmatpush.bf16.msra.mxu1 %v1318_v19  ;;  %v2159_v58 = vld [vmem:[%s2722_s7] ss:$0 sm:$0xff] (%p1263_p11)  ;;  %s2728_s1 = sld [smem:[#allocation18_spill]] (%p1263_p11) }
 0x4c1   : > { %v2040_v62 = vld [vmem:[%s2723_s9 + $0x8] sm:$0xff] (%p1263_p11)  ;;  %v2039_v63 = vld [vmem:[%s2723_s9] sm:$0xff] (%p1263_p11)  ;;  %s2729_s7 = sld [smem:[#allocation24_spill]] (%p1263_p11)  ;;  %s2207_s9 = scalar_lea.hbm (%p1263_p11), %s2466_s6, 16 }
 0x4c2   : > { %v1512_v4 = vld [vmem:[%s2724_s13] sm:$0x1] (%p1263_p11)  ;;  %s2730_s13 = sld [smem:[#allocation22_spill]] (%p1263_p11) }
 0x4c3   : > { %v1513_v6 = vadd.f32 (%p1263_p11), 1e-05, %v1512_v4  ;;  %s2734_s4 = sld [smem:[#allocation27_spill]] (%p1263_p11) }
 0x4c5   : >> { %1961 = vmatmul.msk.bf16.vlgmr.msra.gmra.mxu0 %vm1202_vm13, %v1271_v7  ;;  %vm1520_vm10 = vweird.f32 (%p1263_p11), %v1513_v6 }
 0x4c6   : > { %1424 = vmatpush.bf16.msra.mxu0 (%p1263_p11), %v2036_v43 }
 0x4ca   : > { %1425 = vmatpush.bf16.msra.mxu0 (%p1263_p11), %v2035_v45 }
 0x542   : >> { %v1297_v8 = vpop.f32.mrf.mxu0 }
 0x543   : >> { %v1301_v10 = vsel %vm1202_vm13, %v1297_v8, -inf }
 0x544   : >> { %1302 = vmax.xlane.f32.xlu0 %v1301_v10 }
 0x54a   : >> { %v1299_v11 = vpop.f32.mrf.mxu0 }
 0x5b7   : >> { %v1303_v12 = vpop.xlane.xlu0 %1302 }
 0x5b8   : >> { %v1304_v13 = vsub.f32 %v1297_v8, %v1303_v12 }
 0x5ba   : >> { %v1305_v14 = vmul.f32 1.442695, %v1304_v13  ;;  %v1483_v13 = vlaneseq (%p1263_p11) }
 0x5bc   : >> { %2153 = vpow2.f32 %v1305_v14 }
 0x5c2   : >> { %v2154_v15 = vpop.eup %2153 }
 0x5c3   : >> { %v1307_v16 = vsel %vm1202_vm13, %v2154_v15, 0.0 }
 0x5c4   : >> { %1308 = vadd.xlane.f32.xlu0 %v1307_v16  ;;  %v1484_v16 = vshrl.u32 (%p1263_p11), %v1483_v13, 7 }
 0x5c6   : > { %v1497_v25 = vadd.s32 (%p1263_p11), 1, %v1484_v16 }
 0x5c8   : > { %vm1499_vm8 = vcmp.lt.s32.totalorder (%p1263_p11), %v1497_v25, 8 }
 0x637   : >> { %v1309_v20 = vpop.xlane.xlu0 %1308 }
 0x638   : >> { %2155 = vrcp.f32 %v1309_v20 }
 0x63e   : >> { %v2156_v21 = vpop.eup %2155 }
 0x63f   : >> { %v1311_v22 = vmul.f32 %v2156_v21, %v2154_v15  ;;  %v1486_v21 = vadd.s32 (%p1263_p11), 4294967295, %v1484_v16 }
 0x641   : >> { %v1312_v23 = vpack.c.bf16 %v1311_v22, %v1311_v22  ;;  %vm1487_vm7 = vcmp.ge.s32.totalorder (%p1263_p11), %v1486_v21, 0 }
 0x643   : >> { %1962 = vmatmul.msk.bf16.vlgmr.msra.gmra.mxu1 %vm1202_vm13, %v1312_v23 }
 0x644   : > { %1453 = vmatpush.bf16.msra.mxu1 (%p1263_p11), %v2038_v44 }
 0x6c0   : >> { %v1329_v27 = vpop.f32.mrf.mxu1 }
 0x6c1   : >> { %v1334_v28 = vpack.c.bf16 %v1329_v27, %v1329_v27 }
 0x6c3   : >> { %1964 = vmatmul.msk.bf16.vlgmr.msra.gmra.mxu2 %vm1202_vm13, %v1334_v28 }
 0x6c4   : > { %1584 = vmatpush.bf16.msra.mxu2 (%p1263_p11), %v2040_v62 }
 0x6c8   : >> { %v1331_v29 = vpop.f32.mrf.mxu1  ;;  %1585 = vmatpush.bf16.msra.mxu2 (%p1263_p11), %v2039_v63 }
 0x746   : >> { %v1353_v31 = vpop.f32.mrf.mxu2 }
 0x747   : >> { %v1357_v32 = vadd.f32 %v1353_v31, %v1333_v30  ;;  %v1480_v31 = vld [vmem:[%s2725_s3] sm:$0x7] (%p1263_p11)  ;;  %s2731_s3 = sld [smem:[#allocation23_spill]] (%p1263_p11) }
 0x748   : > { %v1504_v43 = vperm.slane (%p1263_p11), %v1480_v31, 2 }
 0x749   : >> { %1358 = vst.msk [vmem:[#allocation3] sm:$0xff] %vm958_vm0, %v1357_v32 }
 0x74e   : >> { %v1355_v33 = vpop.f32.mrf.mxu2  ;;  %1265 = sbr.rel (!%p1263_p11) target bundleno = 1204 (0x4b4), region = 232 }
 0x750   : > { %v1359_v1 = vld [vmem:[#allocation3] sm:$0xff] (%p1263_p11) }
 0x751   : > { %v1364_v35 = vadd.f32 (%p1263_p11), %v2157_v34, %v1359_v1  ;;  %v1984_v1 = vsel (%p1263_p11), %vm1487_vm7, 1.0, %v2290_v0  ;;  %v1985_v34 = vsel (%p1263_p11), %vm1499_vm8, 1.0, %v2290_v0  ;;  %v2160_v0 = vld [vmem:[%s2726_s8] ss:$0 sm:$0xff] (%p1263_p11)  ;;  %s2732_s8 = sld [smem:[#allocation25_spill]] (%p1263_p11) }
 0x753   : > { %v2596_v36 = vadd.f32 %v1364_v35, %v2549_v24  ;;  %v2037_v24 = vld [vmem:[%s2720_s10] sm:$0xff]  ;;  %v1481_v35 = vperm.slane %v1480_v31, 1 }
 0x754   : > { %1454 = vmatpush.bf16.msra.mxu1 %v2037_v24 }
 0x755   : > { %v1368_v37 = vsel %vm958_vm0, %v2596_v36, 0.0 }
 0x756   : > { %1369 = vadd.xlane.f32.xlu0 %v1368_v37 }
 0x7c9   : > { %v1370_v38 = vpop.xlane.xlu0 %1369 }
 0x7ca   : > { %v1371_v39 = vmul.f32 %v1370_v38, %v2525_v9  ;;  %v1493_v38 = vperm.slane %v1480_v31, 0 }
 0x7cc   : > { %v1372_v40 = vsub.f32 %v2596_v36, %v1371_v39 }
 0x7ce   : > { %v1373_v41 = vmul.f32 %v1372_v40, %v1372_v40 }
 0x7d0   : > { %v1374_v42 = vsel %vm958_vm0, %v1373_v41, 0.0 }
 0x7d1   : > { %1375 = vadd.xlane.f32.xlu0 %v1374_v42 }
 0x844   : > { %v1376_v46 = vpop.xlane.xlu0 %1375 }
 0x845   : > { %v1377_v47 = vmul.f32 %v1376_v46, %v2525_v9 }
 0x847   : > { %v1378_v48 = vadd.f32 1e-05, %v1377_v47 }
 0x849   : > { %2169 = vrsqrt.f32 %v1378_v48  ;;  %vm1385_vm1 = vweird.f32 %v1378_v48 }
 0x84f   : > { %v2170_v49 = vpop.eup %2169 }
 0x850   : > { %v1380_v50 = vmul.f32 %v2170_v49, %v1378_v48  ;;  %vm1386_vm15 = vweird.f32 %v2170_v49 }
 0x851   : > { %vm1387_vm2 = vmor %vm1385_vm1, %vm1386_vm15 }
 0x852   : > { %v1381_v51 = vmul.f32 %v2170_v49, %v1380_v50 }
 0x854   : > { %v1382_v52 = vmul.f32 0.5, %v1381_v51  ;;  %v2161_v51 = vld [vmem:[%s2727_s14] ss:$0 sm:$0xff]  ;;  %s2733_s14 = sld [smem:[#allocation26_spill]] }
 0x856   : > { %v1383_v53 = vsub.f32 1.5, %v1382_v52 }
 0x858   : > { %v1384_v54 = vmul.f32 %v2170_v49, %v1383_v53  ;;  %v2162_v53 = vld [vmem:[%s2728_s1] ss:$0 sm:$0xff]  ;;  %s2024_s1 = sshll.u32 %s2489_s0, 3  ;;  %s2735_s0 = sand.u32 1, %s2245_s23  }
 0x85a   : > { %v1388_v56 = vsel %vm1387_vm2, %v2170_v49, %v1384_v54 }
 0x85b   : > { %v1389_v57 = vmul.f32 %v1388_v56, %v1372_v40 }
 0x85d   : > { %v1393_v59 = vmul.f32 %v2158_v55, %v1389_v57 }
 0x85f   : > { %v1397_v60 = vadd.f32 %v2159_v58, %v1393_v59 }
 0x861   : > { %v1398_v61 = vpack.c.bf16 %v1397_v60, %v1397_v60 }
 0x863   : > { %1973 = vmatmul.msk.bf16.vlgmr.msra.gmra.mxu0 %vm958_vm0, %v1398_v61  ;;  %1982 = vmatmul.msk.bf16.vlgmr.msra.gmra.mxu1 %vm958_vm0, %v1398_v61 }
 0x8e0   : > { %v1427_v2 = vpop.f32.mrf.mxu0  ;;  %v1456_v3 = vpop.f32.mrf.mxu1 }
 0x8e1   : > { %v1983_v5 = vmul.f32 -1.442695, %v1456_v3 }
 0x8e3   : > { %2171 = vpow2.f32 %v1983_v5 }
 0x8e4   : > { %2173 = vrsqrt.f32 %v1513_v6 }
 0x8e8   : > { %v1429_v7 = vpop.f32.mrf.mxu0  ;;  %v1458_v8 = vpop.f32.mrf.mxu1 }
 0x8e9   : > { %v2172_v10 = vpop.eup %2171 }
 0x8ea   : > { %v1463_v11 = vadd.f32 1.0, %v2172_v10  ;;  %v2174_v12 = vpop.eup %2173 }
 0x8eb   : > { %v1515_v14 = vmul.f32 %v2174_v12, %v1513_v6  ;;  %vm1521_vm11 = vweird.f32 %v2174_v12 }
 0x8ec   : > { %2175 = vrcp.f32 %v1463_v11  ;;  %v1475_v20 = vand.u32 2147483648, %v1463_v11  ;;  %v1473_v23 = vand.u32 2147483647, %v1463_v11  ;;  %vm1469_vm4 = vweird.f32 %v1463_v11  ;;  %vm1522_vm12 = vmor %vm1520_vm10, %vm1521_vm11 }
 0x8ed   : > { %v1516_v18 = vmul.f32 %v2174_v12, %v1515_v14 }
 0x8ee   : > { %v1476_v28 = vor.u32 1.1754944e-38, %v1475_v20  ;;  %vm1474_vm6 = vcmp.eq.f32.partialorder %v1473_v23, 8.507059e+37  ;;  %v2041_v20 = vld [vmem:[%s2729_s7] sm:$0xff] }
 0x8ef   : > { %v1517_v26 = vmul.f32 0.5, %v1516_v18 }
 0x8f1   : > { %v1518_v32 = vsub.f32 1.5, %v1517_v26 }
 0x8f2   : > { %v2176_v15 = vpop.eup %2175 }
 0x8f3   : > { %v1465_v17 = vmul.f32 %v2176_v15, %v1463_v11  ;;  %vm1470_vm3 = vweird.f32 %v2176_v15  ;;  %v1519_v40 = vmul.f32 %v2174_v12, %v1518_v32 }
 0x8f4   : > { %vm1471_vm5 = vmor %vm1469_vm4, %vm1470_vm3 }
 0x8f5   : > { %v1466_v19 = vsub.f32 1.0, %v1465_v17  ;;  %v1523_v24 = vsel %vm1522_vm12, %v2174_v12, %v1519_v40 }
 0x8f6   : > { %v1525_v49 = vperm.slane %v1523_v24, 0 }
 0x8f7   : > { %v1467_v22 = vmul.f32 %v2176_v15, %v1466_v19  ;;  %v2042_v19 = vld [vmem:[%s2729_s7 + $0x8] sm:$0xff]  ;;  %s1794_s7 = scalar_lea.sflag [#allocation5], %s2735_s0 }
 0x8f8   : > { %1654 = vmatpush.bf16.msra.mxu3 %v2042_v19 }
 0x8f9   : > { %v1468_v27 = vadd.f32 %v2176_v15, %v1467_v22 }
 0x8fb   : > { %v1472_v29 = vsel %vm1471_vm5, %v2176_v15, %v1468_v27 }
 0x8fc   : > { %v1477_v30 = vsel %vm1474_vm6, %v1476_v28, %v1472_v29  ;;  %1655 = vmatpush.bf16.msra.mxu3 %v2041_v20 }
 0x8fd   : > { %v1479_v33 = vmul.f32 %v1477_v30, %v1427_v2  ;;  %v2163_v30 = vld [vmem:[%s2730_s13] ss:$0 sm:$0xff]  ;;  %s1804_s13 = scalar_lea.hbm %s2466_s6, %s2024_s1 }
 0x8ff   : > { %v1485_v37 = vrot.slane %v1479_v33, 7  ;;  %v1496_v39 = vrot.slane %v1479_v33, 1  ;;  %v1482_v44 = vmul.f32 %v1481_v35, %v1479_v33  ;;  %v2164_v33 = vld [vmem:[%s2731_s3] ss:$0 sm:$0xff]  ;;  %s1806_s3 = sshll.u32 %s949_s5, 4  ;;  %s1807_s3 = int_to_ptr.vmem [resolvable:$true] %s1806_s3 }
 0x901   : > { %v1492_v41 = vmul.f32 %v1984_v1, %v1485_v37  ;;  %v1503_v42 = vmul.f32 %v1985_v34, %v1496_v39  ;;  %v2165_v37 = vld [vmem:[%s2732_s8] ss:$0 sm:$0xff]  ;;  %s1808_s8 = sshll.u32 %s1804_s13, 4  ;;  %s1809_s8 = int_to_ptr.hbm [resolvable:$true] %s1808_s8 }
 0x903   : > { %v1494_v45 = vmul.f32 %v1493_v38, %v1492_v41  ;;  %v1505_v47 = vmul.f32 %v1504_v43, %v1503_v42 }
 0x905   : > { %v1495_v46 = vadd.f32 %v1494_v45, %v1482_v44  ;;  %v2046_v44 = vld [vmem:[%s2733_s14 + $0x18] sm:$0xff] }
 0x906   : > { %1749 = vmatpush.bf16.msrb.mxu0 %v2046_v44 }
 0x907   : > { %v1506_v48 = vadd.f32 %v1505_v47, %v1495_v46 }
 0x909   : > { %v1511_v50 = vsub.f32 %v1506_v48, %v2160_v0  ;;  %v2045_v0 = vld [vmem:[%s2733_s14 + $0x10] sm:$0xff] }
 0x90a   : > { %1750 = vmatpush.bf16.msrb.mxu0 %v2045_v0 }
 0x90b   : > { %v1527_v52 = vmul.f32 %v1525_v49, %v1511_v50  ;;  %v2044_v50 = vld [vmem:[%s2733_s14 + $0x8] sm:$0xff] }
 0x90d   : > { %v1532_v54 = vmul.f32 %v2161_v51, %v1527_v52 }
 0x90e   : > { %1751 = vmatpush.bf16.msrb.mxu0 %v2044_v50 }
 0x90f   : > { %v1537_v55 = vadd.f32 %v2162_v53, %v1532_v54  ;;  %v2043_v54 = vld [vmem:[%s2733_s14] sm:$0xff] }
 0x911   : > { %v1986_v56 = vmul.f32 -1.442695, %v1537_v55 }
 0x912   : > { %1752 = vmatpush.bf16.msrb.mxu0 %v2043_v54 }
 0x913   : > { %2177 = vpow2.f32 %v1986_v56 }
 0x919   : > { %v2178_v57 = vpop.eup %2177 }
 0x91a   : > { %v1541_v58 = vadd.f32 1.0, %v2178_v57 }
 0x91c   : > { %2179 = vrcp.f32 %v1541_v58  ;;  %v1553_v62 = vand.u32 2147483648, %v1541_v58  ;;  %v1551_v2 = vand.u32 2147483647, %v1541_v58  ;;  %vm1547_vm14 = vweird.f32 %v1541_v58 }
 0x91e   : > { %v1554_v4 = vor.u32 1.1754944e-38, %v1553_v62  ;;  %vm1552_vm1 = vcmp.eq.f32.partialorder %v1551_v2, 8.507059e+37 }
 0x922   : > { %v2180_v59 = vpop.eup %2179 }
 0x923   : > { %v1543_v60 = vmul.f32 %v2180_v59, %v1541_v58  ;;  %vm1548_vm13 = vweird.f32 %v2180_v59 }
 0x924   : > { %vm1549_vm15 = vmor %vm1547_vm14, %vm1548_vm13 }
 0x925   : > { %v1544_v61 = vsub.f32 1.0, %v1543_v60 }
 0x927   : > { %v1545_v63 = vmul.f32 %v2180_v59, %v1544_v61 }
 0x929   : > { %v1546_v3 = vadd.f32 %v2180_v59, %v1545_v63 }
 0x92b   : > { %v1550_v5 = vsel %vm1549_vm15, %v2180_v59, %v1546_v3 }
 0x92c   : > { %v1555_v6 = vsel %vm1552_vm1, %v1554_v4, %v1550_v5 }
 0x92d   : > { %v1557_v7 = vmul.f32 %v1555_v6, %v1537_v55 }
 0x92f   : > { %v1558_v8 = vpack.c.bf16 %v1557_v7, %v1557_v7 }
 0x931   : > { %1995 = vmatmul.msk.bf16.vlgmr.msra.gmra.mxu2 %vm958_vm0, %v1558_v8 }
 0x9b4   : > { %v1587_v10 = vpop.f32.mrf.mxu2 }
 0x9b5   : > { %v2623_v11 = vadd.f32 %v1587_v10, %v2596_v36 }
 0x9b7   : > { %v1594_v12 = vsel %vm958_vm0, %v2623_v11, 0.0 }
 0x9b8   : > { %1595 = vadd.xlane.f32.xlu1 %v1594_v12 }
 0x9bc   : > { %v1589_v13 = vpop.f32.mrf.mxu2 }
 0xa2b   : > { %v1596_v14 = vpop.xlane.xlu1 %1595 }
 0xa2c   : > { %v1597_v15 = vmul.f32 %v1596_v14, %v2525_v9 }
 0xa2e   : > { %v1598_v16 = vsub.f32 %v2623_v11, %v1597_v15 }
 0xa30   : > { %v1599_v17 = vmul.f32 %v1598_v16, %v1598_v16 }
 0xa32   : > { %v1600_v18 = vsel %vm958_vm0, %v1599_v17, 0.0 }
 0xa33   : > { %1601 = vadd.xlane.f32.xlu1 %v1600_v18 }
 0xaa6   : > { %v1602_v36 = vpop.xlane.xlu1 %1601 }
 0xaa7   : > { %v1603_v21 = vmul.f32 %v1602_v36, %v2525_v9 }
 0xaa9   : > { %v1604_v22 = vadd.f32 1e-05, %v1603_v21 }
 0xaab   : > { %2181 = vrsqrt.f32 %v1604_v22  ;;  %vm1611_vm3 = vweird.f32 %v1604_v22 }
 0xab1   : > { %v2182_v23 = vpop.eup %2181 }
 0xab2   : > { %v1606_v25 = vmul.f32 %v2182_v23, %v1604_v22  ;;  %vm1612_vm2 = vweird.f32 %v2182_v23  ;;  %v2166_v22 = vld [vmem:[%s2451_s27] ss:$0 sm:$0xff] }
 0xab3   : > { %vm1613_vm4 = vmor %vm1611_vm3, %vm1612_vm2 }
 0xab4   : > { %v1607_v26 = vmul.f32 %v2182_v23, %v1606_v25 }
 0xab6   : > { %v1608_v27 = vmul.f32 0.5, %v1607_v26 }
 0xab8   : > { %v1609_v28 = vsub.f32 1.5, %v1608_v27 }
 0xaba   : > { %v1610_v29 = vmul.f32 %v2182_v23, %v1609_v28 }
 0xabc   : > { %v1614_v31 = vsel %vm1613_vm4, %v2182_v23, %v1610_v29 }
 0xabd   : > { %v1615_v32 = vmul.f32 %v1614_v31, %v1598_v16 }
 0xabf   : > { %v1619_v1 = vmul.f32 %v2163_v30, %v1615_v32 }
 0xac1   : > { %v1623_v34 = vadd.f32 %v2164_v33, %v1619_v1 }
 0xac3   : > { %v1624_v35 = vpack.c.bf16 %v1623_v34, %v1623_v34 }
 0xac5   : > { %2004 = vmatmul.msk.bf16.vlgmr.msra.gmra.mxu3 %vm958_vm0, %v1624_v35 }
 0xb48   : > { %v1657_v38 = vpop.f32.mrf.mxu3 }
 0xb49   : > { %v1658_v39 = vadd.f32 %v2165_v37, %v1657_v38 }
 0xb4b   : > { %v1662_v40 = vmul.f32 0.70710677, %v1658_v39  ;;  %v1661_v19 = vmul.f32 0.5, %v1658_v39 }
 0xb4d   : > { %v1663_v41 = vmul.f32 %v1662_v40, %v1662_v40 }
 0xb4f   : > { %v1664_v42 = vmin.f32 %v1663_v41, 16.0 }
 0xb50   : > { %v1659_v43 = vpop.f32.mrf.mxu3 }
 0xb51   : > { %v1665_v45 = vmul.f32 2.1237322e-06, %v1664_v42  ;;  %v1676_v24 = vmul.f32 3.8918573e-05, %v1664_v42  ;;  %v2167_v43 = vld [vmem:[%s2734_s4] ss:$0 sm:$0xff] }
 0xb52   : > { %s2201_s4 = sshra.s32 %s1809_s8, 4  ;;  %s2202_s4 = int_to_ptr.hbm [resolvable:$true] %s2201_s4 }
 0xb53   : > { %v1666_v46 = vadd.f32 0.00028619796, %v1665_v45  ;;  %v1677_v47 = vadd.f32 0.001143296, %v1676_v24  ;;  %v2168_v45 = vld [vmem:[%s2461_s12] ss:$0 sm:$0xff]  ;;  %p2208_p1 = scmp.lt.s32.totalorder %s2202_s4, %s2466_s6 }
 0xb54   : > { %s2203_s1 = scalar_lea.hbm %s2202_s4, 8 }
 0xb55   : > { %v1667_v48 = vmul.f32 %v1666_v46, %v1664_v42  ;;  %v1678_v49 = vmul.f32 %v1677_v47, %v1664_v42  ;;  %p2204_p12 = scmp.ne.s32.totalorder %s2202_s4, %s2203_s1  ;;  %p2209_p2 = scmp.lt.s32.totalorder %s2207_s9, %s2203_s1 }
 0xb57   : > { %v1679_v51 = vadd.f32 0.014752088, %v1678_v49  ;;  %v1668_v52 = vadd.f32 0.0036580483, %v1667_v48  ;;  %p2205_p13 = pnand %p2204_p12, %p2506_p5  ;;  %p2210_p3 = por %p2209_p2, %p2208_p1 }
 0xb59   : > { %v1680_v53 = vmul.f32 %v1679_v51, %v1664_v42  ;;  %v1669_v56 = vmul.f32 %v1668_v52, %v1664_v42  ;;  %p2206_p0 = pneg %p2205_p13 }
 0xb5b   : > { %v1681_v55 = vadd.f32 0.112945676, %v1680_v53  ;;  %v1670_v59 = vadd.f32 0.05243302, %v1669_v56  ;;  %p2211_p4 = pnand %p2210_p3, %p2206_p0 }
 0xb5d   : > { %v1682_v57 = vmul.f32 %v1681_v55, %v1664_v42  ;;  %v1671_v62 = vmul.f32 %v1670_v59, %v1664_v42 }
 0xb5f   : > { %v1683_v58 = vadd.f32 0.4994258, %v1682_v57  ;;  %v1672_v63 = vadd.f32 0.18741608, %v1671_v62 }
 0xb61   : > { %v1684_v60 = vmul.f32 %v1683_v58, %v1664_v42  ;;  %v1673_v3 = vmul.f32 %v1672_v63, %v1664_v42 }
 0xb63   : > { %v1685_v61 = vadd.f32 1.0, %v1684_v60  ;;  %v1674_v7 = vadd.f32 1.1283791, %v1673_v3 }
 0xb65   : > { %2183 = vrcp.f32 %v1685_v61  ;;  %v1697_v6 = vand.u32 2147483648, %v1685_v61  ;;  %v1695_v10 = vand.u32 2147483647, %v1685_v61  ;;  %vm1691_vm6 = vweird.f32 %v1685_v61 }
 0xb66   : > { %v1675_v14 = vmul.f32 %v1674_v7, %v1662_v40 }
 0xb67   : > { %v1698_v13 = vor.u32 1.1754944e-38, %v1697_v6  ;;  %vm1696_vm8 = vcmp.eq.f32.partialorder %v1695_v10, 8.507059e+37 }
 0xb6b   : > { %v2184_v2 = vpop.eup %2183 }
 0xb6c   : > { %v1687_v4 = vmul.f32 %v2184_v2, %v1685_v61  ;;  %vm1692_vm5 = vweird.f32 %v2184_v2 }
 0xb6d   : > { %vm1693_vm7 = vmor %vm1691_vm6, %vm1692_vm5 }
 0xb6e   : > { %v1688_v5 = vsub.f32 1.0, %v1687_v4 }
 0xb70   : > { %v1689_v8 = vmul.f32 %v2184_v2, %v1688_v5 }
 0xb72   : > { %v1690_v12 = vadd.f32 %v2184_v2, %v1689_v8 }
 0xb74   : > { %v1694_v15 = vsel %vm1693_vm7, %v2184_v2, %v1690_v12 }
 0xb75   : > { %v1699_v16 = vsel %vm1696_vm8, %v1698_v13, %v1694_v15 }
 0xb76   : > { %v1700_v17 = vmul.f32 %v1699_v16, %v1675_v14 }
 0xb78   : > { %v2005_v18 = vclamps-f32 %v1700_v17, 1.0 }
 0xb7a   : > { %v1703_v20 = vadd.f32 1.0, %v2005_v18 }
 0xb7c   : > { %v1704_v36 = vmul.f32 %v1703_v20, %v1661_v19 }
 0xb7e   : > { %v1705_v21 = vpack.c.bf16 %v1704_v36, %v1704_v36 }
 0xb80   : > { %2022 = vmatmul.msk.bf16.vlgmr.msrb.gmra.mxu0 %vm1114_vm9, %v1705_v21 }
 0xbfd   : > { %v1754_v23 = vpop.f32.mrf.mxu0 }
 0xbfe   : > { %v1755_v25 = vadd.f32 %v2166_v22, %v1754_v23 }
 0xc00   : > { %v1758_v26 = vmul.f32 0.5, %v1755_v25 }
 0xc02   : > { %v1759_v27 = vadd.f32 %v1758_v26, %v2623_v11 }
 0xc04   : > { %v1762_v28 = vsel %vm958_vm0, %v1759_v27, 0.0 }
 0xc05   : > { %v1756_v29 = vpop.f32.mrf.mxu0  ;;  %1763 = vadd.xlane.f32.xlu2 %v1762_v28 }
 0xc78   : > { %v1764_v30 = vpop.xlane.xlu2 %1763 }
 0xc79   : > { %v1765_v31 = vmul.f32 %v1764_v30, %v2525_v9 }
 0xc7b   : > { %v1766_v32 = vsub.f32 %v1759_v27, %v1765_v31 }
 0xc7d   : > { %v1767_v33 = vmul.f32 %v1766_v32, %v1766_v32 }
 0xc7f   : > { %v1768_v1 = vsel %vm958_vm0, %v1767_v33, 0.0 }
 0xc80   : > { %1769 = vadd.xlane.f32.xlu2 %v1768_v1 }
 0xcf3   : > { %v1770_v34 = vpop.xlane.xlu2 %1769 }
 0xcf4   : > { %v1771_v35 = vmul.f32 %v1770_v34, %v2525_v9 }
 0xcf6   : > { %v1772_v37 = vadd.f32 1e-05, %v1771_v35 }
 0xcf8   : > { %2185 = vrsqrt.f32 %v1772_v37  ;;  %vm1779_vm10 = vweird.f32 %v1772_v37 }
 0xcfe   : > { %v2186_v11 = vpop.eup %2185 }
 0xcff   : > { %v1774_v38 = vmul.f32 %v2186_v11, %v1772_v37  ;;  %vm1780_vm9 = vweird.f32 %v2186_v11 }
 0xd00   : > { %vm1781_vm11 = vmor %vm1779_vm10, %vm1780_vm9 }
 0xd01   : > { %v1775_v39 = vmul.f32 %v2186_v11, %v1774_v38 }
 0xd03   : > { %v1776_v40 = vmul.f32 0.5, %v1775_v39 }
 0xd05   : > { %v1777_v41 = vsub.f32 1.5, %v1776_v40 }
 0xd07   : > { %v1778_v42 = vmul.f32 %v2186_v11, %v1777_v41 }
 0xd09   : > { %v1782_v9 = vsel %vm1781_vm11, %v2186_v11, %v1778_v42 }
 0xd0a   : > { %v1783_v44 = vmul.f32 %v1782_v9, %v1766_v32 }
 0xd0c   : > { %v1787_v24 = vmul.f32 %v2167_v43, %v1783_v44 }
 0xd0e   : > { %v1791_v46 = vadd.f32 %v2168_v45, %v1787_v24 }
 0xd10   : > { %1792 = vst.msk [vmem:[%s949_s5] sm:$0xff] %vm958_vm0, %v1791_v46 }
 0xd11   : > { %2214 = shalt.err (!%p2211_p4)
}
 0xd12   : > { %2047 = dma.vmem_to_hbm [thread:$0]  (%p2506_p5), %s1807_s3, 128, %s1809_s8, %s1794_s7  }
 0xd13 PF: > { %p2053_p7 = scmp.ge.s32.totalorder %s2253_s28, 2  ;;  %s1820_s18 = sand.u32 1, %s2241_s22  }
 0xd14   : > { %s1821_s5 = scalar_lea.sflag [#allocation5], %s1820_s18 }
 0xd15   : > { %p2050_p8 = pnand %p2053_p7, %p2510_p6 }
 0xd17   : > { %p2051_p9 = pneg %p2050_p8 }
 0xd19   : > { %2236 = dma.done.wait (%p2051_p9), %s1821_s5, 128  }
 0xd1a   : > { %2238 = vsyncadd (%p2051_p9), %s1821_s5, 4294967168  ;;  %p73_p10 = scmp.ge.s32.totalorder %s2493_s2, 4   ;;  %s2736_s22 = smov %s2245_s23 }
 0xd1b   : > { %s2737_s23 = smov %s2249_s26  ;;  %s2738_s26 = smov %s2504_s11 }
 0xd1c   : > { %s2739_s28 = smov %s2493_s2  ;;  %75 = sbr.rel (!%p73_p10) target bundleno = 62 (0x3e), region = 243 }
 0xd21   :  { %1827 = vsyncpa [#allocation5], 1 }
 0xd22   :  { %1829 = vsyncpa [#allocation5 + $0x1], 1 }

// kernel: conformer_encoder_layer.1
= control target key start
LH: loop header
LB: loop body
LE: loop exit
PB: predicated region body
PF: predicated region fallthrough
CT: control target
= control target key end

     0   :  { %s2259_s6 = smov 1   ;;  %s2260_s10 = smov 2   ;;  %s2682_s0 = inlined_call_operand.smem [shape: u32[32], index: -1, kind: input, shape index: {}] }
   0x1   :  { %s2311_s5 = sld [smem:[%s2682_s0]]   ;;  %s2261_s14 = smov 3  }
   0x2   :  { %s2316_s9 = sld [smem:[%s2682_s0 + %s2259_s6]]   ;;  %s2262_s18 = smov 4  }
   0x3   :  { %s2321_s13 = sld [smem:[%s2682_s0 + %s2260_s10]]   ;;  %s2263_s22 = smov 5  }
   0x4   :  { %s2326_s17 = sld [smem:[%s2682_s0 + %s2261_s14]]   ;;  %s2264_s26 = smov 6  }
   0x5   :  { %s2331_s21 = sld [smem:[%s2682_s0 + %s2262_s18]]   ;;  %s2265_s30 = smov 7  }
   0x6   :  { %s2336_s25 = sld [smem:[%s2682_s0 + %s2263_s22]]   ;;  %s2266_s4 = smov 8  }
   0x7   :  { %2691 = sst [smem:[#allocation7_spill]] %s2311_s5  ;;  %s2267_s10 = smov 9  }
   0x8   :  { %2692 = sst [smem:[#allocation8_spill]] %s2316_s9  ;;  %s2268_s15 = smov 10  }
   0x9   :  { %2693 = sst [smem:[#allocation9_spill]] %s2321_s13  ;;  %s2269_s20 = smov 11  }
   0xa   :  { %s2341_s29 = sld [smem:[%s2682_s0 + %s2264_s26]]   ;;  %s2270_s26 = smov 12  }
   0xb   :  { %s2346_s3 = sld [smem:[%s2682_s0 + %s2265_s30]]   ;;  %s2271_s1 = smov 13  }
   0xc   :  { %s2351_s8 = sld [smem:[%s2682_s0 + %s2266_s4]]   ;;  %s2272_s7 = smov 14  }
   0xd   :  { %s2356_s14 = sld [smem:[%s2682_s0 + %s2267_s10]]   ;;  %s2274_s22 = smov 16  }
   0xe   :  { %s2361_s19 = sld [smem:[%s2682_s0 + %s2268_s15]]   ;;  %s2273_s15 = smov 15  }
   0xf   :  { %s2366_s24 = sld [smem:[%s2682_s0 + %s2269_s20]]   ;;  %s2275_s28 = smov 17  }
  0x10   :  { %s2371_s30 = sld [smem:[%s2682_s0 + %s2270_s26]]  }
  0x11   :  { %2694 = sst [smem:[#allocation10_spill]] %s2346_s3 }
  0x12   :  { %2695 = sst [smem:[#allocation11_spill]] %s2351_s8 }
  0x13   :  { %2696 = sst [smem:[#allocation12_spill]] %s2356_s14 }
  0x14   :  { %s2376_s6 = sld [smem:[%s2682_s0 + %s2271_s1]]  }
  0x15   :  { %s2381_s12 = sld [smem:[%s2682_s0 + %s2272_s7]]   ;;  %s2276_s7 = smov 18  }
  0x16   :  { %s2386_s20 = sld [smem:[%s2682_s0 + %s2273_s15]]   ;;  %s2277_s15 = smov 19  }
  0x17   :  { %s2391_s27 = sld [smem:[%s2682_s0 + %s2274_s22]]   ;;  %s2278_s22 = smov 20  }
  0x18   :  { %s2396_s4 = sld [smem:[%s2682_s0 + %s2275_s28]]   ;;  %s2279_s28 = smov 21  }
  0x1a   :  { %2697 = sst [smem:[#allocation13_spill]] %s2376_s6 }
  0x1b   :  { %2698 = sst [smem:[#allocation14_spill]] %s2381_s12 }
  0x1c   :  { %s2401_s12 = sld [smem:[%s2682_s0 + %s2276_s7]]   ;;  %s2280_s7 = smov 22  }
  0x1d   :  { %2699 = sst [smem:[#allocation15_spill]] %s2391_s27 }
  0x1e   :  { %2700 = sst [smem:[#allocation16_spill]] %s2396_s4 }
  0x1f   :  { %s2406_s6 = sld [smem:[%s2682_s0 + %s2277_s15]]   ;;  %s2281_s15 = smov 23  }
  0x20   :  { %s2411_s27 = sld [smem:[%s2682_s0 + %s2278_s22]]   ;;  %s2282_s22 = smov 24  }
  0x21   :  { %s2416_s4 = sld [smem:[%s2682_s0 + %s2279_s28]]   ;;  %s2283_s28 = smov 25  }
  0x22   :  { %2701 = sst [smem:[#allocation17_spill]] %s2401_s12 }
  0x23   :  { %s2421_s12 = sld [smem:[%s2682_s0 + %s2280_s7]]   ;;  %s2284_s7 = smov 26  }
  0x25   :  { %2702 = sst [smem:[#allocation18_spill]] %s2406_s6 }
  0x26   :  { %2703 = sst [smem:[#allocation19_spill]] %s2411_s27 }
  0x27   :  { %2704 = sst [smem:[#allocation20_spill]] %s2416_s4 }
  0x28   :  { %s2426_s6 = sld [smem:[%s2682_s0 + %s2281_s15]]   ;;  %s2285_s15 = smov 27  }
  0x29   :  { %2705 = sst [smem:[#allocation21_spill]] %s2421_s12 }
  0x2a   :  { %s2431_s27 = sld [smem:[%s2682_s0 + %s2282_s22]]   ;;  %s2286_s22 = smov 28  }
  0x2b   :  { %s2436_s4 = sld [smem:[%s2682_s0 + %s2283_s28]]   ;;  %s2287_s28 = smov 29  }
  0x2c   :  { %s2441_s12 = sld [smem:[%s2682_s0 + %s2284_s7]]   ;;  %s2288_s7 = smov 30  }
  0x2e   :  { %2706 = sst [smem:[#allocation22_spill]] %s2426_s6 }
  0x2f   :  { %s2446_s6 = sld [smem:[%s2682_s0 + %s2285_s15]]   ;;  %s2289_s15 = smov 31  }
  0x30   :  { %2707 = sst [smem:[#allocation23_spill]] %s2431_s27 }
  0x31   :  { %2708 = sst [smem:[#allocation24_spill]] %s2436_s4 }
  0x32   :  { %2709 = sst [smem:[#allocation25_spill]] %s2441_s12 }
  0x33   :  { %s2451_s27 = sld [smem:[%s2682_s0 + %s2286_s22]]  }
  0x34   :  { %s2456_s4 = sld [smem:[%s2682_s0 + %s2287_s28]]  }
  0x35   :  { %2710 = sst [smem:[#allocation26_spill]] %s2446_s6 }
  0x36   :  { %s2461_s12 = sld [smem:[%s2682_s0 + %s2288_s7]]  }
  0x37   :  { %s2466_s6 = sld [smem:[%s2682_s0 + %s2289_s15]]  }
  0x3a   :  { %2711 = sst [smem:[#allocation27_spill]] %s2456_s4 }
  0x3b   :  { %68 = vsyncpa [#allocation5], 0 }
  0x3c   :  { %70 = vsyncpa [#allocation5 + $0x1], 0  ;;  %s2468_s22 = smov 0   ;;  %s2470_s23 = smov 0  }
  0x3d   :  { %s2472_s26 = smov 0   ;;  %s2474_s28 = smov 0  }
  0x3e LB: > { %s2712_s14 = sld [smem:[#allocation12_spill]]  ;;  %s2489_s0 = sadd.s32 4294967295, %s2253_s28   ;;  %s2241_s22 = sphi %s2468_s22, %s2736_s22   ;;  %s2253_s28 = sphi %s2474_s28, %s2739_s28   ;;  %s2249_s26 = sphi %s2472_s26, %s2738_s26   ;;  %s2245_s23 = sphi %s2470_s23, %s2737_s23  }
  0x3f   : > { %s1914_s1 = sadd.s32 4294967294, %s2253_s28   ;;  %s2493_s2 = sadd.s32 1, %s2253_s28  }
  0x40   : > { %s739_s7 = sadd.s32 1, %s2249_s26  ;;  %s736_s10 = ssub.s32 %s2253_s28, %s2493_s2 }
  0x41   : > { %p749_p0 = scmp.ne.s32.totalorder %s2249_s26, %s2245_s23  ;;  %p737_p1 = scmp.eq.s32.totalorder %s736_s10, 0 }
  0x42   : > { %p750_p2 = scmp.eq.s32.totalorder %s2489_s0, 1  ;;  %p755_p3 = scmp.ne.s32.totalorder %s2245_s23, %s2241_s22 }
  0x43   : > { %p756_p4 = scmp.eq.s32.totalorder %s1914_s1, 1  ;;  %p1917_p7 = scmp.ge.s32.totalorder %s2253_s28, 1 }
  0x44   : > { %s2504_s11 = scalar_select %p737_p1, %s2249_s26, %s739_s7  }
  0x45   : > { %p2506_p5 = por %p750_p2, %p749_p0  ;;  %p2510_p6 = por %p756_p4, %p755_p3 }
  0x46   : > { %p871_p8 = scmp.lt.s32.totalorder %s2253_s28, 3 }
  0x48   : > { %p872_p9 = pnand %p1917_p7, %p871_p8 }
  0x49   : > { %s2715_s5 = sld [smem:[#allocation7_spill]] (!%p872_p9)  ;;  %p950_p10 = scmp.lt.s32.totalorder (!%p872_p9), %s2489_s0, 1 }
  0x4a   : > { %875 = sbr.rel (%p872_p9) target bundleno = 3347 (0xd13), region = 144  ;;  %s2687_s10 = sand.u32 (!%p872_p9), 1, %s2245_s23  }
  0x4b   : > { %s2716_s9 = sld [smem:[#allocation8_spill]] (!%p872_p9) }
  0x4c   : > { %s2717_s13 = sld [smem:[#allocation9_spill]] (!%p872_p9) }
  0x4d   : > { %s2718_s3 = sld [smem:[#allocation10_spill]] (!%p872_p9) }
  0x4e   : > { %s2719_s8 = sld [smem:[#allocation11_spill]] (!%p872_p9) }
  0x4f   : > { %vm958_vm0 = vcmask 261120   ;;  %v2290_v0 = vmov 0.0   ;;  %s951_s18 = scalar_select %p950_p10, %s2489_s0, 1  ;;  %v2291_v3 = vmov 32.0   ;;  %v2028_v15 = vld [vmem:[%s2326_s17 + $0x8] sm:$0xff]  ;;  %v2027_v16 = vld [vmem:[%s2326_s17] sm:$0xff] }
  0x50   : > { %1260 = vst.msk [vmem:[#allocation3] sm:$0xff] %vm958_vm0, %v2290_v0  ;;  %2145 = vrcp.f32 %v2291_v3  ;;  %1026 = vmatpush.bf16.msra.mxu0 %v2028_v15  ;;  %v2140_v33 = vld [vmem:[%s2331_s21] ss:$0 sm:$0xff]  ;;  %v2032_v40 = vld [vmem:[%s2336_s25 + $0x18] sm:$0xff]  ;;  %v2031_v45 = vld [vmem:[%s2336_s25 + $0x10] sm:$0xff]  ;;  %vm1114_vm9 = vcmask 523264  }
  0x51   : > { %s1919_s1 = sshll.u32 %s951_s18, 3  ;;  %s2533_s18 = sshll.u32 %s2687_s10, 3  ;;  %v2138_v26 = vld [vmem:[%s2716_s9] ss:$0 sm:$0xff]  ;;  %1122 = vmatpush.bf16.msra.mxu1 %v2032_v40  ;;  %v2030_v48 = vld [vmem:[%s2336_s25 + $0x8] sm:$0xff]  ;;  %vm1202_vm13 = vcmask 64512  }
  0x52   : > { %s953_s7 = scalar_lea.vmem %s2715_s5, %s1919_s1  ;;  %v2139_v29 = vld [vmem:[%s2717_s13] ss:$0 sm:$0xff]  ;;  %s2292_s1 = smov 96  }
  0x53   : > { %v2521_v1 = vld [vmem:[%s953_s7] sm:$0xff]  ;;  %s2293_s7 = smov 104   ;;  %s2294_s10 = smov 120  }
  0x54   : > { %v959_v2 = vsel %vm958_vm0, %v2521_v1, 0.0  ;;  %1027 = vmatpush.bf16.msra.mxu0 %v2027_v16  ;;  %v2029_v52 = vld [vmem:[%s2336_s25] sm:$0xff]  ;;  %s2296_s5 = smov 64   ;;  %s2298_s9 = smov 40  }
  0x55   : > { %960 = vadd.xlane.f32.xlu0 %v959_v2  ;;  %1123 = vmatpush.bf16.msra.mxu1 %v2031_v45  ;;  %v2143_v45 = vld [vmem:[%s2719_s8] ss:$0 sm:$0xff]  ;;  %s2297_s8 = smov 112   ;;  %s2299_s13 = smov 88  }
  0x56   : > { %v2146_v4 = vpop.eup %2145 }
  0x57   : > { %v963_v5 = vmul.f32 32.0, %v2146_v4  ;;  %vm967_vm1 = vweird.f32 %v2146_v4 }
  0x59   : > { %v964_v6 = vsub.f32 1.0, %v963_v5  ;;  %1124 = vmatpush.bf16.msra.mxu1 %v2030_v48 }
  0x5b   : > { %v965_v7 = vmul.f32 %v2146_v4, %v964_v6 }
  0x5d   : > { %v966_v8 = vadd.f32 %v2146_v4, %v965_v7  ;;  %1125 = vmatpush.bf16.msra.mxu1 %v2029_v52 }
  0x5f   : > { %v2525_v9 = vsel %vm967_vm1, %v2146_v4, %v966_v8 }
  0xc8   : > { %v961_v10 = vpop.xlane.xlu0 %960 }
  0xc9   : > { %v969_v11 = vmul.f32 %v2525_v9, %v961_v10 }
  0xcb   : > { %v970_v12 = vsub.f32 %v2521_v1, %v969_v11 }
  0xcd   : > { %v971_v13 = vmul.f32 %v970_v12, %v970_v12 }
  0xcf   : > { %v972_v14 = vsel %vm958_vm0, %v971_v13, 0.0 }
  0xd0   : > { %973 = vadd.xlane.f32.xlu0 %v972_v14 }
 0x143   : > { %v974_v17 = vpop.xlane.xlu0 %973 }
 0x144   : > { %v975_v18 = vmul.f32 %v974_v17, %v2525_v9 }
 0x146   : > { %v976_v19 = vadd.f32 1e-05, %v975_v18 }
 0x148   : > { %2147 = vrsqrt.f32 %v976_v19  ;;  %vm983_vm3 = vweird.f32 %v976_v19 }
 0x14e   : > { %v2148_v20 = vpop.eup %2147 }
 0x14f   : > { %v978_v21 = vmul.f32 %v2148_v20, %v976_v19  ;;  %vm984_vm2 = vweird.f32 %v2148_v20 }
 0x150   : > { %vm985_vm4 = vmor %vm983_vm3, %vm984_vm2 }
 0x151   : > { %v979_v22 = vmul.f32 %v2148_v20, %v978_v21 }
 0x153   : > { %v980_v23 = vmul.f32 0.5, %v979_v22 }
 0x155   : > { %v981_v24 = vsub.f32 1.5, %v980_v23 }
 0x157   : > { %v982_v25 = vmul.f32 %v2148_v20, %v981_v24 }
 0x159   : > { %v986_v27 = vsel %vm985_vm4, %v2148_v20, %v982_v25  ;;  %v2141_v20 = vld [vmem:[%s2341_s29] ss:$0 sm:$0xff] }
 0x15a   : > { %v987_v28 = vmul.f32 %v986_v27, %v970_v12 }
 0x15c   : > { %v991_v30 = vmul.f32 %v2138_v26, %v987_v28 }
 0x15e   : > { %v995_v31 = vadd.f32 %v2139_v29, %v991_v30 }
 0x160   : > { %v996_v32 = vpack.c.bf16 %v995_v31, %v995_v31 }
 0x162   : > { %1928 = vmatmul.msk.bf16.vlgmr.msra.gmra.mxu0 %vm958_vm0, %v996_v32  ;;  %v2034_v32 = vld [vmem:[%s2712_s14 + $0x8] sm:$0xff] }
 0x163   : > { %1195 = vmatpush.bf16.msra.mxu2 %v2034_v32 }
 0x1df   : > { %v1029_v34 = vpop.f32.mrf.mxu0 }
 0x1e0   : > { %v1030_v35 = vadd.f32 %v2140_v33, %v1029_v34  ;;  %v2033_v33 = vld [vmem:[%s2712_s14] sm:$0xff]  ;;  %s2300_s14 = smov 80  }
 0x1e1   : > { %1196 = vmatpush.bf16.msra.mxu2 %v2033_v33 }
 0x1e2   : > { %v1034_v36 = vmul.f32 0.70710677, %v1030_v35  ;;  %v1033_v16 = vmul.f32 0.5, %v1030_v35 }
 0x1e4   : > { %v1035_v37 = vmul.f32 %v1034_v36, %v1034_v36 }
 0x1e6   : > { %v1036_v38 = vmin.f32 %v1035_v37, 16.0 }
 0x1e7   : > { %v1031_v39 = vpop.f32.mrf.mxu0 }
 0x1e8   : > { %v1037_v41 = vmul.f32 2.1237322e-06, %v1036_v38  ;;  %v1048_v42 = vmul.f32 3.8918573e-05, %v1036_v38 }
 0x1ea   : > { %v1038_v43 = vadd.f32 0.00028619796, %v1037_v41  ;;  %v1049_v44 = vadd.f32 0.001143296, %v1048_v42  ;;  %v2142_v42 = vld [vmem:[%s2718_s3] ss:$0 sm:$0xff] }
 0x1eb   : > { %s2295_s3 = smov 48  }
 0x1ec   : > { %v1039_v46 = vmul.f32 %v1038_v43, %v1036_v38  ;;  %v1050_v47 = vmul.f32 %v1049_v44, %v1036_v38 }
 0x1ee   : > { %v1051_v49 = vadd.f32 0.014752088, %v1050_v47  ;;  %v1040_v50 = vadd.f32 0.0036580483, %v1039_v46 }
 0x1f0   : > { %v1052_v51 = vmul.f32 %v1051_v49, %v1036_v38  ;;  %v1041_v54 = vmul.f32 %v1040_v50, %v1036_v38  ;;  %v2144_v49 = vld [vmem:[%s2361_s19] ss:$0 sm:$0xff] }
 0x1f2   : > { %v1053_v53 = vadd.f32 0.112945676, %v1052_v51  ;;  %v1042_v57 = vadd.f32 0.05243302, %v1041_v54 }
 0x1f4   : > { %v1054_v55 = vmul.f32 %v1053_v53, %v1036_v38  ;;  %v1043_v60 = vmul.f32 %v1042_v57, %v1036_v38 }
 0x1f6   : > { %v1055_v56 = vadd.f32 0.4994258, %v1054_v55  ;;  %v1044_v61 = vadd.f32 0.18741608, %v1043_v60 }
 0x1f8   : > { %v1056_v58 = vmul.f32 %v1055_v56, %v1036_v38  ;;  %v1045_v63 = vmul.f32 %v1044_v61, %v1036_v38 }
 0x1fa   : > { %v1057_v59 = vadd.f32 1.0, %v1056_v58  ;;  %v1046_v5 = vadd.f32 1.1283791, %v1045_v63 }
 0x1fc   : > { %2149 = vrcp.f32 %v1057_v59  ;;  %v1069_v4 = vand.u32 2147483648, %v1057_v59  ;;  %v1067_v7 = vand.u32 2147483647, %v1057_v59  ;;  %vm1063_vm6 = vweird.f32 %v1057_v59 }
 0x1fd   : > { %v1047_v11 = vmul.f32 %v1046_v5, %v1034_v36 }
 0x1fe   : > { %v1070_v10 = vor.u32 1.1754944e-38, %v1069_v4  ;;  %vm1068_vm8 = vcmp.eq.f32.partialorder %v1067_v7, 8.507059e+37 }
 0x202   : > { %v2150_v62 = vpop.eup %2149 }
 0x203   : > { %v1059_v2 = vmul.f32 %v2150_v62, %v1057_v59  ;;  %vm1064_vm5 = vweird.f32 %v2150_v62 }
 0x204   : > { %vm1065_vm7 = vmor %vm1063_vm6, %vm1064_vm5 }
 0x205   : > { %v1060_v3 = vsub.f32 1.0, %v1059_v2 }
 0x207   : > { %v1061_v6 = vmul.f32 %v2150_v62, %v1060_v3 }
 0x209   : > { %v1062_v8 = vadd.f32 %v2150_v62, %v1061_v6 }
 0x20b   : > { %v1066_v12 = vsel %vm1065_vm7, %v2150_v62, %v1062_v8 }
 0x20c   : > { %v1071_v13 = vsel %vm1068_vm8, %v1070_v10, %v1066_v12 }
 0x20d   : > { %v1072_v14 = vmul.f32 %v1071_v13, %v1047_v11 }
 0x20f   : > { %v1929_v15 = vclamps-f32 %v1072_v14, 1.0 }
 0x211   : > { %v1075_v17 = vadd.f32 1.0, %v1929_v15 }
 0x213   : > { %v1076_v18 = vmul.f32 %v1075_v17, %v1033_v16 }
 0x215   : > { %v1077_v19 = vpack.c.bf16 %v1076_v18, %v1076_v18 }
 0x217   : > { %1946 = vmatmul.msk.bf16.vlgmr.msra.gmra.mxu1 %vm1114_vm9, %v1077_v19 }
 0x294   : > { %v1127_v21 = vpop.f32.mrf.mxu1 }
 0x295   : > { %v1128_v22 = vadd.f32 %v2141_v20, %v1127_v21 }
 0x297   : > { %v1131_v23 = vmul.f32 0.5, %v1128_v22 }
 0x299   : > { %v2549_v24 = vadd.f32 %v1131_v23, %v2521_v1 }
 0x29b   : > { %v1135_v25 = vsel %vm958_vm0, %v2549_v24, 0.0 }
 0x29c   : > { %v1129_v26 = vpop.f32.mrf.mxu1  ;;  %1136 = vadd.xlane.f32.xlu1 %v1135_v25 }
 0x30f   : > { %v1137_v27 = vpop.xlane.xlu1 %1136 }
 0x310   : > { %v1138_v28 = vmul.f32 %v1137_v27, %v2525_v9 }
 0x312   : > { %v1139_v29 = vsub.f32 %v2549_v24, %v1138_v28 }
 0x314   : > { %v1140_v30 = vmul.f32 %v1139_v29, %v1139_v29 }
 0x316   : > { %v1141_v31 = vsel %vm958_vm0, %v1140_v30, 0.0 }
 0x317   : > { %1142 = vadd.xlane.f32.xlu1 %v1141_v31 }
 0x38a   : > { %v1143_v1 = vpop.xlane.xlu1 %1142 }
 0x38b   : > { %v1144_v34 = vmul.f32 %v1143_v1, %v2525_v9 }
 0x38d   : > { %v1145_v35 = vadd.f32 1e-05, %v1144_v34 }
 0x38f   : > { %2151 = vrsqrt.f32 %v1145_v35  ;;  %vm1152_vm11 = vweird.f32 %v1145_v35 }
 0x395   : > { %v2152_v36 = vpop.eup %2151 }
 0x396   : > { %v1147_v37 = vmul.f32 %v2152_v36, %v1145_v35  ;;  %vm1153_vm10 = vweird.f32 %v2152_v36 }
 0x397   : > { %vm1154_vm12 = vmor %vm1152_vm11, %vm1153_vm10 }
 0x398   : > { %v1148_v38 = vmul.f32 %v2152_v36, %v1147_v37 }
 0x39a   : > { %v1149_v39 = vmul.f32 0.5, %v1148_v38 }
 0x39c   : > { %v1150_v40 = vsub.f32 1.5, %v1149_v39 }
 0x39e   : > { %v1151_v41 = vmul.f32 %v2152_v36, %v1150_v40 }
 0x3a0   : > { %v1155_v43 = vsel %vm1154_vm12, %v2152_v36, %v1151_v41 }
 0x3a1   : > { %v1156_v44 = vmul.f32 %v1155_v43, %v1139_v29 }
 0x3a3   : > { %v1160_v46 = vmul.f32 %v2142_v42, %v1156_v44 }
 0x3a5   : > { %v1164_v47 = vadd.f32 %v2143_v45, %v1160_v46 }
 0x3a7   : > { %v1165_v48 = vpack.c.bf16 %v1164_v47, %v1164_v47 }
 0x3a9   : > { %1955 = vmatmul.msk.bf16.vlgmr.msra.gmra.mxu2 %vm958_vm0, %v1165_v48 }
 0x42c   : > { %v1198_v50 = vpop.f32.mrf.mxu2 }
 0x42d   : > { %v1199_v51 = vadd.f32 %v2144_v49, %v1198_v50 }
 0x42f   : > { %1220 = vrot.lane.b32.xlu1 %v1199_v51, %s2292_s1  ;;  %1215 = vrot.lane.b32.xlu0 %v1199_v51, %s2293_s7  ;;  %1203 = vst.msk [vmem:[#allocation2] sm:$0xff] %vm1202_vm13, %v1199_v51  ;;  %s2301_s1 = smov 72   ;;  %s2302_s7 = smov 56  }
 0x430   : > { %1205 = vrot.lane.b32.xlu2 %v1199_v51, %s2294_s10 }
 0x434   : > { %v1200_v52 = vpop.f32.mrf.mxu2 }
 0x437   : > { %1250 = vrot.lane.b32.xlu1 %v1199_v51, %s2295_s3  ;;  %1240 = vrot.lane.b32.xlu0 %v1199_v51, %s2296_s5  ;;  %s949_s5 = scalar_lea.vmem [#allocation4], %s2533_s18 }
 0x438   : > { %1210 = vrot.lane.b32.xlu2 %v1199_v51, %s2297_s8 }
 0x43f   : > { %1255 = vrot.lane.b32.xlu0 %v1199_v51, %s2298_s9  ;;  %s2576_s9 = smov 0  }
 0x440   : > { %1225 = vrot.lane.b32.xlu2 %v1199_v51, %s2299_s13 }
 0x448   : > { %1230 = vrot.lane.b32.xlu2 %v1199_v51, %s2300_s14 }
 0x450   : > { %1235 = vrot.lane.b32.xlu2 %v1199_v51, %s2301_s1 }
 0x458   : > { %1245 = vrot.lane.b32.xlu2 %v1199_v51, %s2302_s7 }
 0x48a   : > { %v1206_v53 = vpop.permute.xlu2 %1205 }
 0x48b   : > { %1209 = vst.msk [vmem:[#allocation2 + $0x8] sm:$0xff] %vm1202_vm13, %v1206_v53 }
 0x492   : > { %v1211_v54 = vpop.permute.xlu2 %1210 }
 0x493   : > { %1214 = vst.msk [vmem:[#allocation2 + $0x10] sm:$0xff] %vm1202_vm13, %v1211_v54 }
 0x49a   : > { %v1226_v55 = vpop.permute.xlu2 %1225 }
 0x49b   : > { %1229 = vst.msk [vmem:[#allocation2 + $0x28] sm:$0xff] %vm1202_vm13, %v1226_v55 }
 0x4a1   : > { %v1221_v56 = vpop.permute.xlu1 %1220  ;;  %v1216_v57 = vpop.permute.xlu0 %1215 }
 0x4a2   : > { %1224 = vst.msk [vmem:[#allocation2 + $0x20] sm:$0xff] %vm1202_vm13, %v1221_v56  ;;  %v1231_v58 = vpop.permute.xlu2 %1230 }
 0x4a3   : > { %1219 = vst.msk [vmem:[#allocation2 + $0x18] sm:$0xff] %vm1202_vm13, %v1216_v57 }
 0x4a4   : > { %1234 = vst.msk [vmem:[#allocation2 + $0x30] sm:$0xff] %vm1202_vm13, %v1231_v58 }
 0x4a9   : > { %v1251_v59 = vpop.permute.xlu1 %1250  ;;  %v1241_v60 = vpop.permute.xlu0 %1240 }
 0x4aa   : > { %1254 = vst.msk [vmem:[#allocation2 + $0x50] sm:$0xff] %vm1202_vm13, %v1251_v59  ;;  %v1236_v61 = vpop.permute.xlu2 %1235 }
 0x4ab   : > { %1244 = vst.msk [vmem:[#allocation2 + $0x40] sm:$0xff] %vm1202_vm13, %v1241_v60 }
 0x4ac   : > { %1239 = vst.msk [vmem:[#allocation2 + $0x38] sm:$0xff] %vm1202_vm13, %v1236_v61 }
 0x4b1   : > { %v1256_v62 = vpop.permute.xlu0 %1255 }
 0x4b2   : > { %1259 = vst.msk [vmem:[#allocation2 + $0x58] sm:$0xff] %vm1202_vm13, %v1256_v62  ;;  %v1246_v63 = vpop.permute.xlu2 %1245 }
 0x4b3   : > { %1249 = vst.msk [vmem:[#allocation2 + $0x48] sm:$0xff] %vm1202_vm13, %v1246_v63 }
 0x4b4 LB: >> { %s1956_s13 = sshll.u32 %s2257_s9, 3  ;;  %vm1316_vm14 = vcmask 1043456   ;;  %s1963_s8 = sshll.u32 %s2257_s9, 2  ;;  %v1333_v30 = vld [vmem:[#allocation3] sm:$0xff]  ;;  %s2257_s9 = sphi %s2576_s9, %s1266_s9  }
 0x4b5   : >> { %s1268_s3 = scalar_lea.vmem [#allocation2], %s1956_s13  ;;  %s1336_s14 = scalar_lea.vmem %s2366_s24, %s1963_s8 }
 0x4b6   : >> { %v1337_v25 = vld [vmem:[%s1336_s14] sm:$0xf]  ;;  %s1266_s9 = sadd.s32 1, %s2257_s9  }
 0x4b7   : >> { %v1342_v26 = vsel %vm1316_vm14, %v1337_v25, 0  ;;  %p1263_p11 = scmp.ge.s32.totalorder %s1266_s9, 4  }
 0x4b8   : >> { %1351 = vmatpush.bf16.msra.mxu2 %v1342_v26  ;;  %s2720_s10 = sld [smem:[#allocation15_spill]] (%p1263_p11)  ;;  %v2157_v34 = vld [vmem:[%s2371_s30] ss:$0 sm:$0xff] (%p1263_p11)  ;;  %v2036_v43 = vld [vmem:[%s2386_s20 + $0x8] sm:$0xff] (%p1263_p11) }
 0x4b9   : > { %v2035_v45 = vld [vmem:[%s2386_s20] sm:$0xff] (%p1263_p11)  ;;  %s2721_s1 = sld [smem:[#allocation13_spill]] (%p1263_p11) }
 0x4ba   : >> { %v1958_v2 = vld [vmem:[%s1268_s3 + $0x20] sm:$0xff]  ;;  %s2722_s7 = sld [smem:[#allocation14_spill]] (%p1263_p11) }
 0x4bb   : >> { %v1269_v3 = vld [vmem:[%s1268_s3] sm:$0xff]  ;;  %v1276_v4 = vpack.c.bf16 %v1958_v2, %v1958_v2  ;;  %s2723_s9 = sld [smem:[#allocation21_spill]] (%p1263_p11) }
 0x4bc   : >> { %v1270_v6 = vmul.f32 0.35355338, %v1269_v3  ;;  %v1960_v17 = vld [vmem:[%s1268_s3 + $0x40] sm:$0xff]  ;;  %s2724_s13 = sld [smem:[#allocation20_spill]] (%p1263_p11) }
 0x4bd   : >> { %v1286_v5 = vsel %vm1202_vm13, %v1276_v4, 0  ;;  %v1281_v18 = vpack.c.bf16 %v1960_v17, %v1960_v17  ;;  %s2725_s3 = sld [smem:[#allocation16_spill]] (%p1263_p11) }
 0x4be   : >> { %1295 = vmatpush.bf16.xpose.msra.mxu0 %v1286_v5  ;;  %v1271_v7 = vpack.c.bf16 %v1270_v6, %v1270_v6  ;;  %v2038_v44 = vld [vmem:[%s2720_s10 + $0x8] sm:$0xff] (%p1263_p11)  ;;  %s2726_s8 = sld [smem:[#allocation19_spill]] (%p1263_p11) }
 0x4bf   : >> { %v1318_v19 = vsel %vm1316_vm14, %v1281_v18, 0  ;;  %v2158_v55 = vld [vmem:[%s2721_s1] ss:$0 sm:$0xff] (%p1263_p11)  ;;  %s2727_s14 = sld [smem:[#allocation17_spill]] (%p1263_p11) }
 0x4c0   : >> { %1327 = vmatpush.bf16.msra.mxu1 %v1318_v19  ;;  %v2159_v58 = vld [vmem:[%s2722_s7] ss:$0 sm:$0xff] (%p1263_p11)  ;;  %s2728_s1 = sld [smem:[#allocation18_spill]] (%p1263_p11) }
 0x4c1   : > { %v2040_v62 = vld [vmem:[%s2723_s9 + $0x8] sm:$0xff] (%p1263_p11)  ;;  %v2039_v63 = vld [vmem:[%s2723_s9] sm:$0xff] (%p1263_p11)  ;;  %s2729_s7 = sld [smem:[#allocation24_spill]] (%p1263_p11)  ;;  %s2207_s9 = scalar_lea.hbm (%p1263_p11), %s2466_s6, 16 }
 0x4c2   : > { %v1512_v4 = vld [vmem:[%s2724_s13] sm:$0x1] (%p1263_p11)  ;;  %s2730_s13 = sld [smem:[#allocation22_spill]] (%p1263_p11) }
 0x4c3   : > { %v1513_v6 = vadd.f32 (%p1263_p11), 1e-05, %v1512_v4  ;;  %s2734_s4 = sld [smem:[#allocation27_spill]] (%p1263_p11) }
 0x4c5   : >> { %1961 = vmatmul.msk.bf16.vlgmr.msra.gmra.mxu0 %vm1202_vm13, %v1271_v7  ;;  %vm1520_vm10 = vweird.f32 (%p1263_p11), %v1513_v6 }
 0x4c6   : > { %1424 = vmatpush.bf16.msra.mxu0 (%p1263_p11), %v2036_v43 }
 0x4ca   : > { %1425 = vmatpush.bf16.msra.mxu0 (%p1263_p11), %v2035_v45 }
 0x542   : >> { %v1297_v8 = vpop.f32.mrf.mxu0 }
 0x543   : >> { %v1301_v10 = vsel %vm1202_vm13, %v1297_v8, -inf }
 0x544   : >> { %1302 = vmax.xlane.f32.xlu0 %v1301_v10 }
 0x54a   : >> { %v1299_v11 = vpop.f32.mrf.mxu0 }
 0x5b7   : >> { %v1303_v12 = vpop.xlane.xlu0 %1302 }
 0x5b8   : >> { %v1304_v13 = vsub.f32 %v1297_v8, %v1303_v12 }
 0x5ba   : >> { %v1305_v14 = vmul.f32 1.442695, %v1304_v13  ;;  %v1483_v13 = vlaneseq (%p1263_p11) }
 0x5bc   : >> { %2153 = vpow2.f32 %v1305_v14 }
 0x5c2   : >> { %v2154_v15 = vpop.eup %2153 }
 0x5c3   : >> { %v1307_v16 = vsel %vm1202_vm13, %v2154_v15, 0.0 }
 0x5c4   : >> { %1308 = vadd.xlane.f32.xlu0 %v1307_v16  ;;  %v1484_v16 = vshrl.u32 (%p1263_p11), %v1483_v13, 7 }
 0x5c6   : > { %v1497_v25 = vadd.s32 (%p1263_p11), 1, %v1484_v16 }
 0x5c8   : > { %vm1499_vm8 = vcmp.lt.s32.totalorder (%p1263_p11), %v1497_v25, 8 }
 0x637   : >> { %v1309_v20 = vpop.xlane.xlu0 %1308 }
 0x638   : >> { %2155 = vrcp.f32 %v1309_v20 }
 0x63e   : >> { %v2156_v21 = vpop.eup %2155 }
 0x63f   : >> { %v1311_v22 = vmul.f32 %v2156_v21, %v2154_v15  ;;  %v1486_v21 = vadd.s32 (%p1263_p11), 4294967295, %v1484_v16 }
 0x641   : >> { %v1312_v23 = vpack.c.bf16 %v1311_v22, %v1311_v22  ;;  %vm1487_vm7 = vcmp.ge.s32.totalorder (%p1263_p11), %v1486_v21, 0 }
 0x643   : >> { %1962 = vmatmul.msk.bf16.vlgmr.msra.gmra.mxu1 %vm1202_vm13, %v1312_v23 }
 0x644   : > { %1453 = vmatpush.bf16.msra.mxu1 (%p1263_p11), %v2038_v44 }
 0x6c0   : >> { %v1329_v27 = vpop.f32.mrf.mxu1 }
 0x6c1   : >> { %v1334_v28 = vpack.c.bf16 %v1329_v27, %v1329_v27 }
 0x6c3   : >> { %1964 = vmatmul.msk.bf16.vlgmr.msra.gmra.mxu2 %vm1202_vm13, %v1334_v28 }
 0x6c4   : > { %1584 = vmatpush.bf16.msra.mxu2 (%p1263_p11), %v2040_v62 }
 0x6c8   : >> { %v1331_v29 = vpop.f32.mrf.mxu1  ;;  %1585 = vmatpush.bf16.msra.mxu2 (%p1263_p11), %v2039_v63 }
 0x746   : >> { %v1353_v31 = vpop.f32.mrf.mxu2 }
 0x747   : >> { %v1357_v32 = vadd.f32 %v1353_v31, %v1333_v30  ;;  %v1480_v31 = vld [vmem:[%s2725_s3] sm:$0x7] (%p1263_p11)  ;;  %s2731_s3 = sld [smem:[#allocation23_spill]] (%p1263_p11) }
 0x748   : > { %v1504_v43 = vperm.slane (%p1263_p11), %v1480_v31, 2 }
 0x749   : >> { %1358 = vst.msk [vmem:[#allocation3] sm:$0xff] %vm958_vm0, %v1357_v32 }
 0x74e   : >> { %v1355_v33 = vpop.f32.mrf.mxu2  ;;  %1265 = sbr.rel (!%p1263_p11) target bundleno = 1204 (0x4b4), region = 232 }
 0x750   : > { %v1359_v1 = vld [vmem:[#allocation3] sm:$0xff] (%p1263_p11) }
 0x751   : > { %v1364_v35 = vadd.f32 (%p1263_p11), %v2157_v34, %v1359_v1  ;;  %v1984_v1 = vsel (%p1263_p11), %vm1487_vm7, 1.0, %v2290_v0  ;;  %v1985_v34 = vsel (%p1263_p11), %vm1499_vm8, 1.0, %v2290_v0  ;;  %v2160_v0 = vld [vmem:[%s2726_s8] ss:$0 sm:$0xff] (%p1263_p11)  ;;  %s2732_s8 = sld [smem:[#allocation25_spill]] (%p1263_p11) }
 0x753   : > { %v2596_v36 = vadd.f32 %v1364_v35, %v2549_v24  ;;  %v2037_v24 = vld [vmem:[%s2720_s10] sm:$0xff]  ;;  %v1481_v35 = vperm.slane %v1480_v31, 1 }
 0x754   : > { %1454 = vmatpush.bf16.msra.mxu1 %v2037_v24 }
 0x755   : > { %v1368_v37 = vsel %vm958_vm0, %v2596_v36, 0.0 }
 0x756   : > { %1369 = vadd.xlane.f32.xlu0 %v1368_v37 }
 0x7c9   : > { %v1370_v38 = vpop.xlane.xlu0 %1369 }
 0x7ca   : > { %v1371_v39 = vmul.f32 %v1370_v38, %v2525_v9  ;;  %v1493_v38 = vperm.slane %v1480_v31, 0 }
 0x7cc   : > { %v1372_v40 = vsub.f32 %v2596_v36, %v1371_v39 }
 0x7ce   : > { %v1373_v41 = vmul.f32 %v1372_v40, %v1372_v40 }
 0x7d0   : > { %v1374_v42 = vsel %vm958_vm0, %v1373_v41, 0.0 }
 0x7d1   : > { %1375 = vadd.xlane.f32.xlu0 %v1374_v42 }
 0x844   : > { %v1376_v46 = vpop.xlane.xlu0 %1375 }
 0x845   : > { %v1377_v47 = vmul.f32 %v1376_v46, %v2525_v9 }
 0x847   : > { %v1378_v48 = vadd.f32 1e-05, %v1377_v47 }
 0x849   : > { %2169 = vrsqrt.f32 %v1378_v48  ;;  %vm1385_vm1 = vweird.f32 %v1378_v48 }
 0x84f   : > { %v2170_v49 = vpop.eup %2169 }
 0x850   : > { %v1380_v50 = vmul.f32 %v2170_v49, %v1378_v48  ;;  %vm1386_vm15 = vweird.f32 %v2170_v49 }
 0x851   : > { %vm1387_vm2 = vmor %vm1385_vm1, %vm1386_vm15 }
 0x852   : > { %v1381_v51 = vmul.f32 %v2170_v49, %v1380_v50 }
 0x854   : > { %v1382_v52 = vmul.f32 0.5, %v1381_v51  ;;  %v2161_v51 = vld [vmem:[%s2727_s14] ss:$0 sm:$0xff]  ;;  %s2733_s14 = sld [smem:[#allocation26_spill]] }
 0x856   : > { %v1383_v53 = vsub.f32 1.5, %v1382_v52 }
 0x858   : > { %v1384_v54 = vmul.f32 %v2170_v49, %v1383_v53  ;;  %v2162_v53 = vld [vmem:[%s2728_s1] ss:$0 sm:$0xff]  ;;  %s2024_s1 = sshll.u32 %s2489_s0, 3  ;;  %s2735_s0 = sand.u32 1, %s2245_s23  }
 0x85a   : > { %v1388_v56 = vsel %vm1387_vm2, %v2170_v49, %v1384_v54 }
 0x85b   : > { %v1389_v57 = vmul.f32 %v1388_v56, %v1372_v40 }
 0x85d   : > { %v1393_v59 = vmul.f32 %v2158_v55, %v1389_v57 }
 0x85f   : > { %v1397_v60 = vadd.f32 %v2159_v58, %v1393_v59 }
 0x861   : > { %v1398_v61 = vpack.c.bf16 %v1397_v60, %v1397_v60 }
 0x863   : > { %1973 = vmatmul.msk.bf16.vlgmr.msra.gmra.mxu0 %vm958_vm0, %v1398_v61  ;;  %1982 = vmatmul.msk.bf16.vlgmr.msra.gmra.mxu1 %vm958_vm0, %v1398_v61 }
 0x8e0   : > { %v1427_v2 = vpop.f32.mrf.mxu0  ;;  %v1456_v3 = vpop.f32.mrf.mxu1 }
 0x8e1   : > { %v1983_v5 = vmul.f32 -1.442695, %v1456_v3 }
 0x8e3   : > { %2171 = vpow2.f32 %v1983_v5 }
 0x8e4   : > { %2173 = vrsqrt.f32 %v1513_v6 }
 0x8e8   : > { %v1429_v7 = vpop.f32.mrf.mxu0  ;;  %v1458_v8 = vpop.f32.mrf.mxu1 }
 0x8e9   : > { %v2172_v10 = vpop.eup %2171 }
 0x8ea   : > { %v1463_v11 = vadd.f32 1.0, %v2172_v10  ;;  %v2174_v12 = vpop.eup %2173 }
 0x8eb   : > { %v1515_v14 = vmul.f32 %v2174_v12, %v1513_v6  ;;  %vm1521_vm11 = vweird.f32 %v2174_v12 }
 0x8ec   : > { %2175 = vrcp.f32 %v1463_v11  ;;  %v1475_v20 = vand.u32 2147483648, %v1463_v11  ;;  %v1473_v23 = vand.u32 2147483647, %v1463_v11  ;;  %vm1469_vm4 = vweird.f32 %v1463_v11  ;;  %vm1522_vm12 = vmor %vm1520_vm10, %vm1521_vm11 }
 0x8ed   : > { %v1516_v18 = vmul.f32 %v2174_v12, %v1515_v14 }
 0x8ee   : > { %v1476_v28 = vor.u32 1.1754944e-38, %v1475_v20  ;;  %vm1474_vm6 = vcmp.eq.f32.partialorder %v1473_v23, 8.507059e+37  ;;  %v2041_v20 = vld [vmem:[%s2729_s7] sm:$0xff] }
 0x8ef   : > { %v1517_v26 = vmul.f32 0.5, %v1516_v18 }
 0x8f1   : > { %v1518_v32 = vsub.f32 1.5, %v1517_v26 }
 0x8f2   : > { %v2176_v15 = vpop.eup %2175 }
 0x8f3   : > { %v1465_v17 = vmul.f32 %v2176_v15, %v1463_v11  ;;  %vm1470_vm3 = vweird.f32 %v2176_v15  ;;  %v1519_v40 = vmul.f32 %v2174_v12, %v1518_v32 }
 0x8f4   : > { %vm1471_vm5 = vmor %vm1469_vm4, %vm1470_vm3 }
 0x8f5   : > { %v1466_v19 = vsub.f32 1.0, %v1465_v17  ;;  %v1523_v24 = vsel %vm1522_vm12, %v2174_v12, %v1519_v40 }
 0x8f6   : > { %v1525_v49 = vperm.slane %v1523_v24, 0 }
 0x8f7   : > { %v1467_v22 = vmul.f32 %v2176_v15, %v1466_v19  ;;  %v2042_v19 = vld [vmem:[%s2729_s7 + $0x8] sm:$0xff]  ;;  %s1794_s7 = scalar_lea.sflag [#allocation5], %s2735_s0 }
 0x8f8   : > { %1654 = vmatpush.bf16.msra.mxu3 %v2042_v19 }
 0x8f9   : > { %v1468_v27 = vadd.f32 %v2176_v15, %v1467_v22 }
 0x8fb   : > { %v1472_v29 = vsel %vm1471_vm5, %v2176_v15, %v1468_v27 }
 0x8fc   : > { %v1477_v30 = vsel %vm1474_vm6, %v1476_v28, %v1472_v29  ;;  %1655 = vmatpush.bf16.msra.mxu3 %v2041_v20 }
 0x8fd   : > { %v1479_v33 = vmul.f32 %v1477_v30, %v1427_v2  ;;  %v2163_v30 = vld [vmem:[%s2730_s13] ss:$0 sm:$0xff]  ;;  %s1804_s13 = scalar_lea.hbm %s2466_s6, %s2024_s1 }
 0x8ff   : > { %v1485_v37 = vrot.slane %v1479_v33, 7  ;;  %v1496_v39 = vrot.slane %v1479_v33, 1  ;;  %v1482_v44 = vmul.f32 %v1481_v35, %v1479_v33  ;;  %v2164_v33 = vld [vmem:[%s2731_s3] ss:$0 sm:$0xff]  ;;  %s1806_s3 = sshll.u32 %s949_s5, 4  ;;  %s1807_s3 = int_to_ptr.vmem [resolvable:$true] %s1806_s3 }
 0x901   : > { %v1492_v41 = vmul.f32 %v1984_v1, %v1485_v37  ;;  %v1503_v42 = vmul.f32 %v1985_v34, %v1496_v39  ;;  %v2165_v37 = vld [vmem:[%s2732_s8] ss:$0 sm:$0xff]  ;;  %s1808_s8 = sshll.u32 %s1804_s13, 4  ;;  %s1809_s8 = int_to_ptr.hbm [resolvable:$true] %s1808_s8 }
 0x903   : > { %v1494_v45 = vmul.f32 %v1493_v38, %v1492_v41  ;;  %v1505_v47 = vmul.f32 %v1504_v43, %v1503_v42 }
 0x905   : > { %v1495_v46 = vadd.f32 %v1494_v45, %v1482_v44  ;;  %v2046_v44 = vld [vmem:[%s2733_s14 + $0x18] sm:$0xff] }
 0x906   : > { %1749 = vmatpush.bf16.msrb.mxu0 %v2046_v44 }
 0x907   : > { %v1506_v48 = vadd.f32 %v1505_v47, %v1495_v46 }
 0x909   : > { %v1511_v50 = vsub.f32 %v1506_v48, %v2160_v0  ;;  %v2045_v0 = vld [vmem:[%s2733_s14 + $0x10] sm:$0xff] }
 0x90a   : > { %1750 = vmatpush.bf16.msrb.mxu0 %v2045_v0 }
 0x90b   : > { %v1527_v52 = vmul.f32 %v1525_v49, %v1511_v50  ;;  %v2044_v50 = vld [vmem:[%s2733_s14 + $0x8] sm:$0xff] }
 0x90d   : > { %v1532_v54 = vmul.f32 %v2161_v51, %v1527_v52 }
 0x90e   : > { %1751 = vmatpush.bf16.msrb.mxu0 %v2044_v50 }
 0x90f   : > { %v1537_v55 = vadd.f32 %v2162_v53, %v1532_v54  ;;  %v2043_v54 = vld [vmem:[%s2733_s14] sm:$0xff] }
 0x911   : > { %v1986_v56 = vmul.f32 -1.442695, %v1537_v55 }
 0x912   : > { %1752 = vmatpush.bf16.msrb.mxu0 %v2043_v54 }
 0x913   : > { %2177 = vpow2.f32 %v1986_v56 }
 0x919   : > { %v2178_v57 = vpop.eup %2177 }
 0x91a   : > { %v1541_v58 = vadd.f32 1.0, %v2178_v57 }
 0x91c   : > { %2179 = vrcp.f32 %v1541_v58  ;;  %v1553_v62 = vand.u32 2147483648, %v1541_v58  ;;  %v1551_v2 = vand.u32 2147483647, %v1541_v58  ;;  %vm1547_vm14 = vweird.f32 %v1541_v58 }
 0x91e   : > { %v1554_v4 = vor.u32 1.1754944e-38, %v1553_v62  ;;  %vm1552_vm1 = vcmp.eq.f32.partialorder %v1551_v2, 8.507059e+37 }
 0x922   : > { %v2180_v59 = vpop.eup %2179 }
 0x923   : > { %v1543_v60 = vmul.f32 %v2180_v59, %v1541_v58  ;;  %vm1548_vm13 = vweird.f32 %v2180_v59 }
 0x924   : > { %vm1549_vm15 = vmor %vm1547_vm14, %vm1548_vm13 }
 0x925   : > { %v1544_v61 = vsub.f32 1.0, %v1543_v60 }
 0x927   : > { %v1545_v63 = vmul.f32 %v2180_v59, %v1544_v61 }
 0x929   : > { %v1546_v3 = vadd.f32 %v2180_v59, %v1545_v63 }
 0x92b   : > { %v1550_v5 = vsel %vm1549_vm15, %v2180_v59, %v1546_v3 }
 0x92c   : > { %v1555_v6 = vsel %vm1552_vm1, %v1554_v4, %v1550_v5 }
 0x92d   : > { %v1557_v7 = vmul.f32 %v1555_v6, %v1537_v55 }
 0x92f   : > { %v1558_v8 = vpack.c.bf16 %v1557_v7, %v1557_v7 }
 0x931   : > { %1995 = vmatmul.msk.bf16.vlgmr.msra.gmra.mxu2 %vm958_vm0, %v1558_v8 }
 0x9b4   : > { %v1587_v10 = vpop.f32.mrf.mxu2 }
 0x9b5   : > { %v2623_v11 = vadd.f32 %v1587_v10, %v2596_v36 }
 0x9b7   : > { %v1594_v12 = vsel %vm958_vm0, %v2623_v11, 0.0 }
 0x9b8   : > { %1595 = vadd.xlane.f32.xlu1 %v1594_v12 }
 0x9bc   : > { %v1589_v13 = vpop.f32.mrf.mxu2 }
 0xa2b   : > { %v1596_v14 = vpop.xlane.xlu1 %1595 }
 0xa2c   : > { %v1597_v15 = vmul.f32 %v1596_v14, %v2525_v9 }
 0xa2e   : > { %v1598_v16 = vsub.f32 %v2623_v11, %v1597_v15 }
 0xa30   : > { %v1599_v17 = vmul.f32 %v1598_v16, %v1598_v16 }
 0xa32   : > { %v1600_v18 = vsel %vm958_vm0, %v1599_v17, 0.0 }
 0xa33   : > { %1601 = vadd.xlane.f32.xlu1 %v1600_v18 }
 0xaa6   : > { %v1602_v36 = vpop.xlane.xlu1 %1601 }
 0xaa7   : > { %v1603_v21 = vmul.f32 %v1602_v36, %v2525_v9 }
 0xaa9   : > { %v1604_v22 = vadd.f32 1e-05, %v1603_v21 }
 0xaab   : > { %2181 = vrsqrt.f32 %v1604_v22  ;;  %vm1611_vm3 = vweird.f32 %v1604_v22 }
 0xab1   : > { %v2182_v23 = vpop.eup %2181 }
 0xab2   : > { %v1606_v25 = vmul.f32 %v2182_v23, %v1604_v22  ;;  %vm1612_vm2 = vweird.f32 %v2182_v23  ;;  %v2166_v22 = vld [vmem:[%s2451_s27] ss:$0 sm:$0xff] }
 0xab3   : > { %vm1613_vm4 = vmor %vm1611_vm3, %vm1612_vm2 }
 0xab4   : > { %v1607_v26 = vmul.f32 %v2182_v23, %v1606_v25 }
 0xab6   : > { %v1608_v27 = vmul.f32 0.5, %v1607_v26 }
 0xab8   : > { %v1609_v28 = vsub.f32 1.5, %v1608_v27 }
 0xaba   : > { %v1610_v29 = vmul.f32 %v2182_v23, %v1609_v28 }
 0xabc   : > { %v1614_v31 = vsel %vm1613_vm4, %v2182_v23, %v1610_v29 }
 0xabd   : > { %v1615_v32 = vmul.f32 %v1614_v31, %v1598_v16 }
 0xabf   : > { %v1619_v1 = vmul.f32 %v2163_v30, %v1615_v32 }
 0xac1   : > { %v1623_v34 = vadd.f32 %v2164_v33, %v1619_v1 }
 0xac3   : > { %v1624_v35 = vpack.c.bf16 %v1623_v34, %v1623_v34 }
 0xac5   : > { %2004 = vmatmul.msk.bf16.vlgmr.msra.gmra.mxu3 %vm958_vm0, %v1624_v35 }
 0xb48   : > { %v1657_v38 = vpop.f32.mrf.mxu3 }
 0xb49   : > { %v1658_v39 = vadd.f32 %v2165_v37, %v1657_v38 }
 0xb4b   : > { %v1662_v40 = vmul.f32 0.70710677, %v1658_v39  ;;  %v1661_v19 = vmul.f32 0.5, %v1658_v39 }
 0xb4d   : > { %v1663_v41 = vmul.f32 %v1662_v40, %v1662_v40 }
 0xb4f   : > { %v1664_v42 = vmin.f32 %v1663_v41, 16.0 }
 0xb50   : > { %v1659_v43 = vpop.f32.mrf.mxu3 }
 0xb51   : > { %v1665_v45 = vmul.f32 2.1237322e-06, %v1664_v42  ;;  %v1676_v24 = vmul.f32 3.8918573e-05, %v1664_v42  ;;  %v2167_v43 = vld [vmem:[%s2734_s4] ss:$0 sm:$0xff] }
 0xb52   : > { %s2201_s4 = sshra.s32 %s1809_s8, 4  ;;  %s2202_s4 = int_to_ptr.hbm [resolvable:$true] %s2201_s4 }
 0xb53   : > { %v1666_v46 = vadd.f32 0.00028619796, %v1665_v45  ;;  %v1677_v47 = vadd.f32 0.001143296, %v1676_v24  ;;  %v2168_v45 = vld [vmem:[%s2461_s12] ss:$0 sm:$0xff]  ;;  %p2208_p1 = scmp.lt.s32.totalorder %s2202_s4, %s2466_s6 }
 0xb54   : > { %s2203_s1 = scalar_lea.hbm %s2202_s4, 8 }
 0xb55   : > { %v1667_v48 = vmul.f32 %v1666_v46, %v1664_v42  ;;  %v1678_v49 = vmul.f32 %v1677_v47, %v1664_v42  ;;  %p2204_p12 = scmp.ne.s32.totalorder %s2202_s4, %s2203_s1  ;;  %p2209_p2 = scmp.lt.s32.totalorder %s2207_s9, %s2203_s1 }
 0xb57   : > { %v1679_v51 = vadd.f32 0.014752088, %v1678_v49  ;;  %v1668_v52 = vadd.f32 0.0036580483, %v1667_v48  ;;  %p2205_p13 = pnand %p2204_p12, %p2506_p5  ;;  %p2210_p3 = por %p2209_p2, %p2208_p1 }
 0xb59   : > { %v1680_v53 = vmul.f32 %v1679_v51, %v1664_v42  ;;  %v1669_v56 = vmul.f32 %v1668_v52, %v1664_v42  ;;  %p2206_p0 = pneg %p2205_p13 }
 0xb5b   : > { %v1681_v55 = vadd.f32 0.112945676, %v1680_v53  ;;  %v1670_v59 = vadd.f32 0.05243302, %v1669_v56  ;;  %p2211_p4 = pnand %p2210_p3, %p2206_p0 }
 0xb5d   : > { %v1682_v57 = vmul.f32 %v1681_v55, %v1664_v42  ;;  %v1671_v62 = vmul.f32 %v1670_v59, %v1664_v42 }
 0xb5f   : > { %v1683_v58 = vadd.f32 0.4994258, %v1682_v57  ;;  %v1672_v63 = vadd.f32 0.18741608, %v1671_v62 }
 0xb61   : > { %v1684_v60 = vmul.f32 %v1683_v58, %v1664_v42  ;;  %v1673_v3 = vmul.f32 %v1672_v63, %v1664_v42 }
 0xb63   : > { %v1685_v61 = vadd.f32 1.0, %v1684_v60  ;;  %v1674_v7 = vadd.f32 1.1283791, %v1673_v3 }
 0xb65   : > { %2183 = vrcp.f32 %v1685_v61  ;;  %v1697_v6 = vand.u32 2147483648, %v1685_v61  ;;  %v1695_v10 = vand.u32 2147483647, %v1685_v61  ;;  %vm1691_vm6 = vweird.f32 %v1685_v61 }
 0xb66   : > { %v1675_v14 = vmul.f32 %v1674_v7, %v1662_v40 }
 0xb67   : > { %v1698_v13 = vor.u32 1.1754944e-38, %v1697_v6  ;;  %vm1696_vm8 = vcmp.eq.f32.partialorder %v1695_v10, 8.507059e+37 }
 0xb6b   : > { %v2184_v2 = vpop.eup %2183 }
 0xb6c   : > { %v1687_v4 = vmul.f32 %v2184_v2, %v1685_v61  ;;  %vm1692_vm5 = vweird.f32 %v2184_v2 }
 0xb6d   : > { %vm1693_vm7 = vmor %vm1691_vm6, %vm1692_vm5 }
 0xb6e   : > { %v1688_v5 = vsub.f32 1.0, %v1687_v4 }
 0xb70   : > { %v1689_v8 = vmul.f32 %v2184_v2, %v1688_v5 }
 0xb72   : > { %v1690_v12 = vadd.f32 %v2184_v2, %v1689_v8 }
 0xb74   : > { %v1694_v15 = vsel %vm1693_vm7, %v2184_v2, %v1690_v12 }
 0xb75   : > { %v1699_v16 = vsel %vm1696_vm8, %v1698_v13, %v1694_v15 }
 0xb76   : > { %v1700_v17 = vmul.f32 %v1699_v16, %v1675_v14 }
 0xb78   : > { %v2005_v18 = vclamps-f32 %v1700_v17, 1.0 }
 0xb7a   : > { %v1703_v20 = vadd.f32 1.0, %v2005_v18 }
 0xb7c   : > { %v1704_v36 = vmul.f32 %v1703_v20, %v1661_v19 }
 0xb7e   : > { %v1705_v21 = vpack.c.bf16 %v1704_v36, %v1704_v36 }
 0xb80   : > { %2022 = vmatmul.msk.bf16.vlgmr.msrb.gmra.mxu0 %vm1114_vm9, %v1705_v21 }
 0xbfd   : > { %v1754_v23 = vpop.f32.mrf.mxu0 }
 0xbfe   : > { %v1755_v25 = vadd.f32 %v2166_v22, %v1754_v23 }
 0xc00   : > { %v1758_v26 = vmul.f32 0.5, %v1755_v25 }
 0xc02   : > { %v1759_v27 = vadd.f32 %v1758_v26, %v2623_v11 }
 0xc04   : > { %v1762_v28 = vsel %vm958_vm0, %v1759_v27, 0.0 }
 0xc05   : > { %v1756_v29 = vpop.f32.mrf.mxu0  ;;  %1763 = vadd.xlane.f32.xlu2 %v1762_v28 }
 0xc78   : > { %v1764_v30 = vpop.xlane.xlu2 %1763 }
 0xc79   : > { %v1765_v31 = vmul.f32 %v1764_v30, %v2525_v9 }
 0xc7b   : > { %v1766_v32 = vsub.f32 %v1759_v27, %v1765_v31 }
 0xc7d   : > { %v1767_v33 = vmul.f32 %v1766_v32, %v1766_v32 }
 0xc7f   : > { %v1768_v1 = vsel %vm958_vm0, %v1767_v33, 0.0 }
 0xc80   : > { %1769 = vadd.xlane.f32.xlu2 %v1768_v1 }
 0xcf3   : > { %v1770_v34 = vpop.xlane.xlu2 %1769 }
 0xcf4   : > { %v1771_v35 = vmul.f32 %v1770_v34, %v2525_v9 }
 0xcf6   : > { %v1772_v37 = vadd.f32 1e-05, %v1771_v35 }
 0xcf8   : > { %2185 = vrsqrt.f32 %v1772_v37  ;;  %vm1779_vm10 = vweird.f32 %v1772_v37 }
 0xcfe   : > { %v2186_v11 = vpop.eup %2185 }
 0xcff   : > { %v1774_v38 = vmul.f32 %v2186_v11, %v1772_v37  ;;  %vm1780_vm9 = vweird.f32 %v2186_v11 }
 0xd00   : > { %vm1781_vm11 = vmor %vm1779_vm10, %vm1780_vm9 }
 0xd01   : > { %v1775_v39 = vmul.f32 %v2186_v11, %v1774_v38 }
 0xd03   : > { %v1776_v40 = vmul.f32 0.5, %v1775_v39 }
 0xd05   : > { %v1777_v41 = vsub.f32 1.5, %v1776_v40 }
 0xd07   : > { %v1778_v42 = vmul.f32 %v2186_v11, %v1777_v41 }
 0xd09   : > { %v1782_v9 = vsel %vm1781_vm11, %v2186_v11, %v1778_v42 }
 0xd0a   : > { %v1783_v44 = vmul.f32 %v1782_v9, %v1766_v32 }
 0xd0c   : > { %v1787_v24 = vmul.f32 %v2167_v43, %v1783_v44 }
 0xd0e   : > { %v1791_v46 = vadd.f32 %v2168_v45, %v1787_v24 }
 0xd10   : > { %1792 = vst.msk [vmem:[%s949_s5] sm:$0xff] %vm958_vm0, %v1791_v46 }
 0xd11   : > { %2214 = shalt.err (!%p2211_p4)
}
 0xd12   : > { %2047 = dma.vmem_to_hbm [thread:$0]  (%p2506_p5), %s1807_s3, 128, %s1809_s8, %s1794_s7  }
 0xd13 PF: > { %p2053_p7 = scmp.ge.s32.totalorder %s2253_s28, 2  ;;  %s1820_s18 = sand.u32 1, %s2241_s22  }
 0xd14   : > { %s1821_s5 = scalar_lea.sflag [#allocation5], %s1820_s18 }
 0xd15   : > { %p2050_p8 = pnand %p2053_p7, %p2510_p6 }
 0xd17   : > { %p2051_p9 = pneg %p2050_p8 }
 0xd19   : > { %2236 = dma.done.wait (%p2051_p9), %s1821_s5, 128  }
 0xd1a   : > { %2238 = vsyncadd (%p2051_p9), %s1821_s5, 4294967168  ;;  %p73_p10 = scmp.ge.s32.totalorder %s2493_s2, 4   ;;  %s2736_s22 = smov %s2245_s23 }
 0xd1b   : > { %s2737_s23 = smov %s2249_s26  ;;  %s2738_s26 = smov %s2504_s11 }
 0xd1c   : > { %s2739_s28 = smov %s2493_s2  ;;  %75 = sbr.rel (!%p73_p10) target bundleno = 62 (0x3e), region = 243 }
 0xd21   :  { %1827 = vsyncpa [#allocation5], 1 }
 0xd22   :  { %1829 = vsyncpa [#allocation5 + $0x1], 1 }

</bundles_post_ra>
